<compile_context>
chip_gen: v7x
topology: tpu7x:2x2x1
jax: 0.10.0
libtpu: 0.0.40
codegen_flags: <defaults>
</compile_context>

<pallas_src>
import functools
import numpy as np

import jax
import jax.numpy as jnp
from jax import lax
from jax.experimental import pallas as pl
from jax.experimental.pallas import tpu as pltpu


# ----------------------------------------------------------------- glue -----
def get_positional_embeddings(seq_len, d, mode="trig"):
    # result[i, j] = sin(i / 10000^(j/d)) if j even else cos(i / 10000^((j-1)/d))
    i = np.arange(seq_len, dtype=np.float64)[:, None]
    j = np.arange(d, dtype=np.float64)[None, :]
    denom = 10000.0 ** ((j - (j % 2)) / d)
    ang = i / denom
    pe = np.where(j % 2 == 0, np.sin(ang), np.cos(ang))
    return pe.astype(np.float32)


def image_to_patches(images, n_patches):
    # images: (B, C, H, W) -> patches: (B, n_patches**2, C*ph*pw), same flatten
    # order as the reference PyTorch loop (patch index = i*n_patches + j,
    # inner flatten over (C, ph, pw)).
    B, C, H, W = images.shape
    ph, pw = H // n_patches, W // n_patches
    x = images.reshape(B, C, n_patches, ph, n_patches, pw)
    x = jnp.transpose(x, (0, 2, 4, 1, 3, 5))          # B, i, j, C, ph, pw
    return x.reshape(B, n_patches * n_patches, C * ph * pw)


# --------------------------------------------------------- in-kernel math ----
def _mm(a, w):
    # plain 2-D MXU matmul with f32 accumulation
    return jnp.dot(a, w, preferred_element_type=jnp.float32)


def _layernorm(x, g, b, eps=1e-5):
    mu = jnp.mean(x, axis=-1, keepdims=True)
    var = jnp.mean(jnp.square(x - mu), axis=-1, keepdims=True)
    return (x - mu) * lax.rsqrt(var + eps) * g + b


def _softmax_lastdim(x, approx=False):
    m = jnp.max(x, axis=-1, keepdims=True)
    e = jnp.exp(x - m)
    return e * pl.reciprocal(jnp.sum(e, axis=-1, keepdims=True), approx=approx)


def _gelu_erf(x):
    # Exact (erf-based) GELU, matching torch.nn.GELU(approximate='none').
    # erf via Abramowitz & Stegun 7.1.26 rational approx (|err| < 1.5e-7).
    z = x * np.float32(1.0 / np.sqrt(2.0))
    a1, a2, a3, a4, a5 = 0.254829592, -0.284496736, 1.421413741, -1.453152027, 1.061405429
    p = 0.3275911
    s = jnp.where(z >= 0.0, 1.0, -1.0)
    az = jnp.abs(z)
    t = 1.0 / (1.0 + p * az)
    poly = ((((a5 * t + a4) * t + a3) * t + a2) * t + a1) * t
    erf = s * (1.0 - poly * jnp.exp(-az * az))
    return 0.5 * x * (1.0 + erf)


# ---------------------------------------------------------------- kernel ----
def vit_kernel(n_heads, n_blocks,
               patches_ref, addend_ref, mask_ref, w_emb_ref,
               ln1g_ref, ln1b_ref,
               wq_ref, bq_ref, wk_ref, bk_ref, wv_ref, bv_ref,
               ln2g_ref, ln2b_ref, w1_ref, b1_ref, w2_ref, b2_ref,
               wcls_ref, bcls_ref,
               out_ref):
    _, S, _In = patches_ref.shape
    D = w_emb_ref.shape[1]
    H = n_heads
    dh = D // H
    scale = 1.0 / float(np.sqrt(dh))
    head_mask = mask_ref[...]                                # (H, 1, D), 0/1

    # ---- patch embedding; addend = b_emb + pos with row 0 = cls + pos[0]
    # (row 0 of the patch slab is all-zero, so its matmul output is zero and
    #  the class token appears via the addend — no iota / where / scratch).
    x = _mm(patches_ref[0], w_emb_ref[...]) + addend_ref[...]          # (S, D)

    # ---- transformer blocks (res=True, layer=True), unrolled (tiny weights)
    for blk in range(n_blocks):
        # multi-head self-attention on norm1(x), residual add
        h = _layernorm(x, ln1g_ref[blk], ln1b_ref[blk])
        q = _mm(h, wq_ref[blk]) + bq_ref[blk]                          # (S, D)
        k = _mm(h, wk_ref[blk]) + bk_ref[blk]
        v = _mm(h, wv_ref[blk]) + bv_ref[blk]

        # head-vectorized attention: the (H,1,D) 0/1 mask isolates each
        # head's dh slice inside a full-D contraction (heads are disjoint).
        qm = (q * scale)[None, :, :] * head_mask                       # (H, S, D)
        kb = jnp.broadcast_to(k[None, :, :], (H, S, D))                # (H, S, D)
        vm = v[None, :, :] * head_mask                                 # (H, S, D)
        scores = jnp.einsum("hqd,hkd->hqk", qm, kb,
                            preferred_element_type=jnp.float32)        # (H, S, S)
        attn = _softmax_lastdim(scores, approx=True)
        o = jnp.einsum("hqk,hkd->hqd", attn, vm,
                       preferred_element_type=jnp.float32)             # (H, S, D)
        x = x + jnp.sum(o, axis=0)           # disjoint head slices -> concat

        # MLP on norm2(x), residual add
        h = _layernorm(x, ln2g_ref[blk], ln2b_ref[blk])
        m = _gelu_erf(_mm(h, w1_ref[blk]) + b1_ref[blk])
        x = x + _mm(m, w2_ref[blk]) + b2_ref[blk]

    # ---- classification head on the class token (+ exact softmax), written
    #      as a lane-dense 128-wide slab (padded logits are -1e30 -> prob 0).
    logits = _mm(x[0:1, :], wcls_ref[...]) + bcls_ref[...]             # (1, Cp)
    out_ref[0] = _softmax_lastdim(logits, approx=False)


# --------------------------------------------------------------- wrapper ----
def vit_forward(images, params, *, n_patches, n_heads, n_blocks):
    B = images.shape[0]
    patches = image_to_patches(images, n_patches)            # (B, P, In)
    _, P, In = patches.shape
    S = P + 1
    D = params["w_emb"].shape[1]
    C = params["w_cls"].shape[1]
    C_pad = ((C + 127) // 128) * 128
    dh = D // n_heads

    # dummy zero "patch" row at position 0; its (zero) embedding is replaced
    # by the class token via `addend` row 0.
    patches_pad = jnp.pad(patches, ((0, 0), (1, 0), (0, 0)))

    addend = params["pos"] + params["b_emb"]                           # (S, D)
    addend = addend.at[0].set(params["cls"][0] + params["pos"][0])

    head_mask = jnp.asarray(
        np.repeat(np.eye(n_heads, dtype=np.float32), dh, axis=1)[:, None, :])

    w_cls_pad = jnp.pad(params["w_cls"], ((0, 0), (0, C_pad - C)))
    b_cls_pad = jnp.pad(params["b_cls"], ((0, 0), (0, C_pad - C)),
                        constant_values=-1e30)

    operands = (patches_pad, addend, head_mask, params["w_emb"],
                params["ln1g"], params["ln1b"],
                params["wq"], params["bq"], params["wk"], params["bk"],
                params["wv"], params["bv"],
                params["ln2g"], params["ln2b"],
                params["w1"], params["b1"], params["w2"], params["b2"],
                w_cls_pad, b_cls_pad)

    def full(a):  # whole-array block, resident across the batch grid
        return pl.BlockSpec(a.shape, lambda b, _n=a.ndim: (0,) * _n)

    in_specs = [pl.BlockSpec((1, S, In), lambda b: (b, 0, 0))]
    in_specs += [full(a) for a in operands[1:]]

    kernel = functools.partial(vit_kernel, n_heads, n_blocks)
    out = pl.pallas_call(
        kernel,
        out_shape=jax.ShapeDtypeStruct((B, 1, C_pad), jnp.float32),
        grid_spec=pltpu.PrefetchScalarGridSpec(
            num_scalar_prefetch=0,
            grid=(B,),
            in_specs=in_specs,
            out_specs=pl.BlockSpec((1, 1, C_pad), lambda b: (b, 0, 0))),
        compiler_params=pltpu.CompilerParams(
            dimension_semantics=("parallel",)),
    )(*operands)
    return out[:, 0, :C]                                      # (B, C)


# ------------------------------------------------------------ parameters ----
def init_params(key, *, input_dim, hidden_dim, n_heads, n_blocks, n_classes,
                n_patches, mlp_ratio=4):
    D = hidden_dim
    S = n_patches ** 2 + 1

    def linear_init(k, fan_in, fan_out):
        kw, kbias = jax.random.split(k)
        bound = 1.0 / float(np.sqrt(fan_in))
        w = jax.random.uniform(kw, (fan_in, fan_out), jnp.float32, -bound, bound)
        b = jax.random.uniform(kbias, (1, fan_out), jnp.float32, -bound, bound)
        return w, b

    keys = jax.random.split(key, 3 + n_blocks)
    k_emb, k_cls, k_head = keys[0], keys[1], keys[2]
    block_keys = keys[3:]

    w_emb, b_emb = linear_init(k_emb, input_dim, D)
    cls_token = jax.random.normal(k_cls, (1, D), jnp.float32)
    pos = jnp.asarray(get_positional_embeddings(S, D, "trig"))
    w_cls, b_cls = linear_init(k_head, D, n_classes)

    L = {name: [] for name in
         ("ln1g", "ln1b", "ln2g", "ln2b", "wq", "bq", "wk", "bk",
          "wv", "bv", "w1", "b1", "w2", "b2")}
    for bkey in block_keys:
        ks = jax.random.split(bkey, 5)
        wq_i, bq_i = linear_init(ks[0], D, D)
        wk_i, bk_i = linear_init(ks[1], D, D)
        wv_i, bv_i = linear_init(ks[2], D, D)
        w1_i, b1_i = linear_init(ks[3], D, mlp_ratio * D)
        w2_i, b2_i = linear_init(ks[4], mlp_ratio * D, D)
        L["ln1g"].append(jnp.ones((1, D), jnp.float32))
        L["ln1b"].append(jnp.zeros((1, D), jnp.float32))
        L["ln2g"].append(jnp.ones((1, D), jnp.float32))
        L["ln2b"].append(jnp.zeros((1, D), jnp.float32))
        L["wq"].append(wq_i); L["bq"].append(bq_i)
        L["wk"].append(wk_i); L["bk"].append(bk_i)
        L["wv"].append(wv_i); L["bv"].append(bv_i)
        L["w1"].append(w1_i); L["b1"].append(b1_i)
        L["w2"].append(w2_i); L["b2"].append(b2_i)

    params = {k: jnp.stack(v, axis=0) for k, v in L.items()}
    params.update(
        w_emb=w_emb, b_emb=b_emb,          # b_emb: (1, D)
        cls=cls_token, pos=pos,
        w_cls=w_cls, b_cls=b_cls,          # b_cls: (1, C)
    )
    return params


# ------------------------------------------------------------------ main ----
if __name__ == "__main__":
    # small config consistent with the module: chw=(4,16,16), n_patches=4
    B, C_in, H_img, W_img = 2, 4, 16, 16
    n_patches, n_blocks, hidden_dim, n_heads, n_classes = 4, 2, 32, 4, 10
    input_dim = C_in * (H_img // n_patches) * (W_img // n_patches)   # 64

    key = jax.random.PRNGKey(0)
    k_img, k_par = jax.random.split(key)
    images = jax.random.normal(k_img, (B, C_in, H_img, W_img), jnp.float32)

    params = init_params(k_par, input_dim=input_dim, hidden_dim=hidden_dim,
                         n_heads=n_heads, n_blocks=n_blocks,
                         n_classes=n_classes, n_patches=n_patches)

    out = vit_forward(images, params, n_patches=n_patches,
                      n_heads=n_heads, n_blocks=n_blocks)
    out = jax.block_until_ready(out)

    assert out.shape == (B, n_classes), out.shape
    assert bool(jnp.all(jnp.isfinite(out)))
    assert bool(jnp.allclose(jnp.sum(out, axis=-1), 1.0, atol=1e-3))
    print("KERNEL_OK")
</pallas_src>

<mosaic_0001>
module attributes {stable_mosaic.version = 11 : i64} {
  func.func @vit_kernel(%arg0: i32, %arg1: memref<1x17x64xf32, #tpu.memory_space<vmem>>, %arg2: memref<17x32xf32, #tpu.memory_space<vmem>>, %arg3: memref<4x1x32xf32, #tpu.memory_space<vmem>>, %arg4: memref<64x32xf32, #tpu.memory_space<vmem>>, %arg5: memref<2x1x32xf32, #tpu.memory_space<vmem>>, %arg6: memref<2x1x32xf32, #tpu.memory_space<vmem>>, %arg7: memref<2x32x32xf32, #tpu.memory_space<vmem>>, %arg8: memref<2x1x32xf32, #tpu.memory_space<vmem>>, %arg9: memref<2x32x32xf32, #tpu.memory_space<vmem>>, %arg10: memref<2x1x32xf32, #tpu.memory_space<vmem>>, %arg11: memref<2x32x32xf32, #tpu.memory_space<vmem>>, %arg12: memref<2x1x32xf32, #tpu.memory_space<vmem>>, %arg13: memref<2x1x32xf32, #tpu.memory_space<vmem>>, %arg14: memref<2x1x32xf32, #tpu.memory_space<vmem>>, %arg15: memref<2x32x128xf32, #tpu.memory_space<vmem>>, %arg16: memref<2x1x128xf32, #tpu.memory_space<vmem>>, %arg17: memref<2x128x32xf32, #tpu.memory_space<vmem>>, %arg18: memref<2x1x32xf32, #tpu.memory_space<vmem>>, %arg19: memref<32x128xf32, #tpu.memory_space<vmem>>, %arg20: memref<1x128xf32, #tpu.memory_space<vmem>>, %arg21: memref<1x1x128xf32, #tpu.memory_space<vmem>>) attributes {dimension_semantics = [#tpu.dimension_semantics<parallel>], iteration_bounds = array<i64: 2>, scalar_prefetch = 0 : i64, scratch_operands = 0 : i64, tpu.core_type = #tpu.core_type<tc>, window_params = [{transform_indices = @transform_0, window_bounds = array<i64: 1, 17, 64>}, {pipeline_mode = #tpu.pipeline_mode<synchronous>, transform_indices = @transform_1, window_bounds = array<i64: 17, 32>}, {pipeline_mode = #tpu.pipeline_mode<synchronous>, transform_indices = @transform_2, window_bounds = array<i64: 4, 1, 32>}, {pipeline_mode = #tpu.pipeline_mode<synchronous>, transform_indices = @transform_3, window_bounds = array<i64: 64, 32>}, {pipeline_mode = #tpu.pipeline_mode<synchronous>, transform_indices = @transform_4, window_bounds = array<i64: 2, 1, 32>}, {pipeline_mode = #tpu.pipeline_mode<synchronous>, transform_indices = @transform_5, window_bounds = array<i64: 2, 1, 32>}, {pipeline_mode = #tpu.pipeline_mode<synchronous>, transform_indices = @transform_6, window_bounds = array<i64: 2, 32, 32>}, {pipeline_mode = #tpu.pipeline_mode<synchronous>, transform_indices = @transform_7, window_bounds = array<i64: 2, 1, 32>}, {pipeline_mode = #tpu.pipeline_mode<synchronous>, transform_indices = @transform_8, window_bounds = array<i64: 2, 32, 32>}, {pipeline_mode = #tpu.pipeline_mode<synchronous>, transform_indices = @transform_9, window_bounds = array<i64: 2, 1, 32>}, {pipeline_mode = #tpu.pipeline_mode<synchronous>, transform_indices = @transform_10, window_bounds = array<i64: 2, 32, 32>}, {pipeline_mode = #tpu.pipeline_mode<synchronous>, transform_indices = @transform_11, window_bounds = array<i64: 2, 1, 32>}, {pipeline_mode = #tpu.pipeline_mode<synchronous>, transform_indices = @transform_12, window_bounds = array<i64: 2, 1, 32>}, {pipeline_mode = #tpu.pipeline_mode<synchronous>, transform_indices = @transform_13, window_bounds = array<i64: 2, 1, 32>}, {pipeline_mode = #tpu.pipeline_mode<synchronous>, transform_indices = @transform_14, window_bounds = array<i64: 2, 32, 128>}, {pipeline_mode = #tpu.pipeline_mode<synchronous>, transform_indices = @transform_15, window_bounds = array<i64: 2, 1, 128>}, {pipeline_mode = #tpu.pipeline_mode<synchronous>, transform_indices = @transform_16, window_bounds = array<i64: 2, 128, 32>}, {pipeline_mode = #tpu.pipeline_mode<synchronous>, transform_indices = @transform_17, window_bounds = array<i64: 2, 1, 32>}, {pipeline_mode = #tpu.pipeline_mode<synchronous>, transform_indices = @transform_18, window_bounds = array<i64: 32, 128>}, {pipeline_mode = #tpu.pipeline_mode<synchronous>, transform_indices = @transform_19, window_bounds = array<i64: 1, 128>}, {transform_indices = @transform_20, window_bounds = array<i64: 1, 1, 128>}]} {
    %c0 = arith.constant 0 : index
    %c0_0 = arith.constant 0 : index
    %c0_1 = arith.constant 0 : index
    %0 = vector.load %arg3[%c0, %c0_0, %c0_1] : memref<4x1x32xf32, #tpu.memory_space<vmem>>, vector<4x1x32xf32>
    %c0_2 = arith.constant 0 : index
    %c0_3 = arith.constant 0 : index
    %c0_4 = arith.constant 0 : index
    %1 = vector.load %arg1[%c0_2, %c0_3, %c0_4] : memref<1x17x64xf32, #tpu.memory_space<vmem>>, vector<1x17x64xf32>
    %2 = vector.shape_cast %1 : vector<1x17x64xf32> to vector<17x64xf32>
    %c0_5 = arith.constant 0 : index
    %c0_6 = arith.constant 0 : index
    %3 = vector.load %arg4[%c0_5, %c0_6] : memref<64x32xf32, #tpu.memory_space<vmem>>, vector<64x32xf32>
    %cst = arith.constant dense<0.000000e+00> : vector<17x32xf32>
    %4 = tpu.matmul %2, %3, %cst {dimension_numbers = #tpu.dot_dimension_numbers<[1], [0], [0], [1], [0, 0, 1, 1], [], []>} : vector<17x64xf32>, vector<64x32xf32>, vector<17x32xf32> -> vector<17x32xf32>
    %c0_7 = arith.constant 0 : index
    %c0_8 = arith.constant 0 : index
    %5 = vector.load %arg2[%c0_7, %c0_8] : memref<17x32xf32, #tpu.memory_space<vmem>>, vector<17x32xf32>
    %6 = arith.addf %4, %5 : vector<17x32xf32>
    %c0_9 = arith.constant 0 : index
    %c0_10 = arith.constant 0 : index
    %c0_11 = arith.constant 0 : index
    %7 = vector.load %arg5[%c0_9, %c0_10, %c0_11] : memref<2x1x32xf32, #tpu.memory_space<vmem>>, vector<1x1x32xf32>
    %8 = vector.shape_cast %7 : vector<1x1x32xf32> to vector<1x32xf32>
    %c0_12 = arith.constant 0 : index
    %c0_13 = arith.constant 0 : index
    %c0_14 = arith.constant 0 : index
    %9 = vector.load %arg6[%c0_12, %c0_13, %c0_14] : memref<2x1x32xf32, #tpu.memory_space<vmem>>, vector<1x1x32xf32>
    %10 = vector.shape_cast %9 : vector<1x1x32xf32> to vector<1x32xf32>
    %cst_15 = arith.constant dense<0.000000e+00> : vector<17xf32>
    %11 = vector.multi_reduction <add>, %6, %cst_15 [1] : vector<17x32xf32> to vector<17xf32>
    %12 = vector.shape_cast %11 : vector<17xf32> to vector<17x1xf32>
    %cst_16 = arith.constant 3.200000e+01 : f32
    %13 = vector.broadcast %cst_16 : f32 to vector<17x1xf32>
    %14 = arith.divf %12, %13 : vector<17x1xf32>
    %15 = vector.broadcast %14 : vector<17x1xf32> to vector<17x32xf32>
    %16 = arith.subf %6, %15 : vector<17x32xf32>
    %17 = arith.mulf %16, %16 : vector<17x32xf32>
    %cst_17 = arith.constant dense<0.000000e+00> : vector<17xf32>
    %18 = vector.multi_reduction <add>, %17, %cst_17 [1] : vector<17x32xf32> to vector<17xf32>
    %19 = vector.shape_cast %18 : vector<17xf32> to vector<17x1xf32>
    %cst_18 = arith.constant 3.200000e+01 : f32
    %20 = vector.broadcast %cst_18 : f32 to vector<17x1xf32>
    %21 = arith.divf %19, %20 : vector<17x1xf32>
    %22 = vector.broadcast %14 : vector<17x1xf32> to vector<17x32xf32>
    %23 = arith.subf %6, %22 : vector<17x32xf32>
    %cst_19 = arith.constant 9.99999974E-6 : f32
    %24 = vector.broadcast %cst_19 : f32 to vector<17x1xf32>
    %25 = arith.addf %21, %24 : vector<17x1xf32>
    %26 = math.rsqrt %25 : vector<17x1xf32>
    %27 = vector.broadcast %26 : vector<17x1xf32> to vector<17x32xf32>
    %28 = arith.mulf %23, %27 : vector<17x32xf32>
    %29 = vector.broadcast %8 : vector<1x32xf32> to vector<17x32xf32>
    %30 = arith.mulf %28, %29 : vector<17x32xf32>
    %31 = vector.broadcast %10 : vector<1x32xf32> to vector<17x32xf32>
    %32 = arith.addf %30, %31 : vector<17x32xf32>
    %c0_20 = arith.constant 0 : index
    %c0_21 = arith.constant 0 : index
    %c0_22 = arith.constant 0 : index
    %33 = vector.load %arg7[%c0_20, %c0_21, %c0_22] : memref<2x32x32xf32, #tpu.memory_space<vmem>>, vector<1x32x32xf32>
    %34 = vector.shape_cast %33 : vector<1x32x32xf32> to vector<32x32xf32>
    %cst_23 = arith.constant dense<0.000000e+00> : vector<17x32xf32>
    %35 = tpu.matmul %32, %34, %cst_23 {dimension_numbers = #tpu.dot_dimension_numbers<[1], [0], [0], [1], [0, 0, 1, 1], [], []>} : vector<17x32xf32>, vector<32x32xf32>, vector<17x32xf32> -> vector<17x32xf32>
    %c0_24 = arith.constant 0 : index
    %c0_25 = arith.constant 0 : index
    %c0_26 = arith.constant 0 : index
    %36 = vector.load %arg8[%c0_24, %c0_25, %c0_26] : memref<2x1x32xf32, #tpu.memory_space<vmem>>, vector<1x1x32xf32>
    %37 = vector.shape_cast %36 : vector<1x1x32xf32> to vector<1x32xf32>
    %38 = vector.broadcast %37 : vector<1x32xf32> to vector<17x32xf32>
    %39 = arith.addf %35, %38 : vector<17x32xf32>
    %c0_27 = arith.constant 0 : index
    %c0_28 = arith.constant 0 : index
    %c0_29 = arith.constant 0 : index
    %40 = vector.load %arg9[%c0_27, %c0_28, %c0_29] : memref<2x32x32xf32, #tpu.memory_space<vmem>>, vector<1x32x32xf32>
    %41 = vector.shape_cast %40 : vector<1x32x32xf32> to vector<32x32xf32>
    %cst_30 = arith.constant dense<0.000000e+00> : vector<17x32xf32>
    %42 = tpu.matmul %32, %41, %cst_30 {dimension_numbers = #tpu.dot_dimension_numbers<[1], [0], [0], [1], [0, 0, 1, 1], [], []>} : vector<17x32xf32>, vector<32x32xf32>, vector<17x32xf32> -> vector<17x32xf32>
    %c0_31 = arith.constant 0 : index
    %c0_32 = arith.constant 0 : index
    %c0_33 = arith.constant 0 : index
    %43 = vector.load %arg10[%c0_31, %c0_32, %c0_33] : memref<2x1x32xf32, #tpu.memory_space<vmem>>, vector<1x1x32xf32>
    %44 = vector.shape_cast %43 : vector<1x1x32xf32> to vector<1x32xf32>
    %45 = vector.broadcast %44 : vector<1x32xf32> to vector<17x32xf32>
    %46 = arith.addf %42, %45 : vector<17x32xf32>
    %c0_34 = arith.constant 0 : index
    %c0_35 = arith.constant 0 : index
    %c0_36 = arith.constant 0 : index
    %47 = vector.load %arg11[%c0_34, %c0_35, %c0_36] : memref<2x32x32xf32, #tpu.memory_space<vmem>>, vector<1x32x32xf32>
    %48 = vector.shape_cast %47 : vector<1x32x32xf32> to vector<32x32xf32>
    %cst_37 = arith.constant dense<0.000000e+00> : vector<17x32xf32>
    %49 = tpu.matmul %32, %48, %cst_37 {dimension_numbers = #tpu.dot_dimension_numbers<[1], [0], [0], [1], [0, 0, 1, 1], [], []>} : vector<17x32xf32>, vector<32x32xf32>, vector<17x32xf32> -> vector<17x32xf32>
    %c0_38 = arith.constant 0 : index
    %c0_39 = arith.constant 0 : index
    %c0_40 = arith.constant 0 : index
    %50 = vector.load %arg12[%c0_38, %c0_39, %c0_40] : memref<2x1x32xf32, #tpu.memory_space<vmem>>, vector<1x1x32xf32>
    %51 = vector.shape_cast %50 : vector<1x1x32xf32> to vector<1x32xf32>
    %52 = vector.broadcast %51 : vector<1x32xf32> to vector<17x32xf32>
    %53 = arith.addf %49, %52 : vector<17x32xf32>
    %cst_41 = arith.constant 0.353553385 : f32
    %54 = vector.broadcast %cst_41 : f32 to vector<17x32xf32>
    %55 = arith.mulf %39, %54 : vector<17x32xf32>
    %56 = vector.shape_cast %55 : vector<17x32xf32> to vector<1x17x32xf32>
    %57 = vector.broadcast %56 : vector<1x17x32xf32> to vector<4x17x32xf32>
    %58 = vector.broadcast %0 : vector<4x1x32xf32> to vector<4x17x32xf32>
    %59 = arith.mulf %57, %58 : vector<4x17x32xf32>
    %60 = vector.shape_cast %46 : vector<17x32xf32> to vector<1x17x32xf32>
    %61 = vector.shape_cast %60 : vector<1x17x32xf32> to vector<1x17x32xf32>
    %62 = vector.broadcast %61 : vector<1x17x32xf32> to vector<4x17x32xf32>
    %63 = vector.shape_cast %53 : vector<17x32xf32> to vector<1x17x32xf32>
    %64 = vector.broadcast %63 : vector<1x17x32xf32> to vector<4x17x32xf32>
    %65 = vector.broadcast %0 : vector<4x1x32xf32> to vector<4x17x32xf32>
    %66 = arith.mulf %64, %65 : vector<4x17x32xf32>
    "tpu.trace_start"() <{level = 10 : i32, message = "hqd,hkd->hqk"}> : () -> ()
    %cst_42 = arith.constant dense<0.000000e+00> : vector<4x17x17xf32>
    %67 = tpu.matmul %59, %62, %cst_42 {dimension_numbers = #tpu.dot_dimension_numbers<[2], [2], [1], [1], [0, 0, 0, 1, 1, 1], [0], [0]>} : vector<4x17x32xf32>, vector<4x17x32xf32>, vector<4x17x17xf32> -> vector<4x17x17xf32>
    "tpu.trace_stop"() : () -> ()
    %cst_43 = arith.constant dense<0xFF800000> : vector<4x17xf32>
    %68 = vector.multi_reduction <maximumf>, %67, %cst_43 [2] : vector<4x17x17xf32> to vector<4x17xf32>
    %69 = vector.shape_cast %68 : vector<4x17xf32> to vector<4x17x1xf32>
    %70 = vector.broadcast %69 : vector<4x17x1xf32> to vector<4x17x17xf32>
    %71 = arith.subf %67, %70 : vector<4x17x17xf32>
    %72 = math.exp %71 : vector<4x17x17xf32>
    %cst_44 = arith.constant dense<0.000000e+00> : vector<4x17xf32>
    %73 = vector.multi_reduction <add>, %72, %cst_44 [2] : vector<4x17x17xf32> to vector<4x17xf32>
    %74 = vector.shape_cast %73 : vector<4x17xf32> to vector<4x17x1xf32>
    %75 = tpu.reciprocal %74 {approx = true} : vector<4x17x1xf32> -> vector<4x17x1xf32>
    %76 = vector.broadcast %75 : vector<4x17x1xf32> to vector<4x17x17xf32>
    %77 = arith.mulf %72, %76 : vector<4x17x17xf32>
    "tpu.trace_start"() <{level = 10 : i32, message = "hqk,hkd->hqd"}> : () -> ()
    %cst_45 = arith.constant dense<0.000000e+00> : vector<4x17x32xf32>
    %78 = tpu.matmul %77, %66, %cst_45 {dimension_numbers = #tpu.dot_dimension_numbers<[2], [1], [1], [2], [0, 0, 0, 1, 1, 2], [0], [0]>} : vector<4x17x17xf32>, vector<4x17x32xf32>, vector<4x17x32xf32> -> vector<4x17x32xf32>
    "tpu.trace_stop"() : () -> ()
    %cst_46 = arith.constant dense<0.000000e+00> : vector<17x32xf32>
    %79 = vector.multi_reduction <add>, %78, %cst_46 [0] : vector<4x17x32xf32> to vector<17x32xf32>
    %80 = arith.addf %6, %79 : vector<17x32xf32>
    %c0_47 = arith.constant 0 : index
    %c0_48 = arith.constant 0 : index
    %c0_49 = arith.constant 0 : index
    %81 = vector.load %arg13[%c0_47, %c0_48, %c0_49] : memref<2x1x32xf32, #tpu.memory_space<vmem>>, vector<1x1x32xf32>
    %82 = vector.shape_cast %81 : vector<1x1x32xf32> to vector<1x32xf32>
    %c0_50 = arith.constant 0 : index
    %c0_51 = arith.constant 0 : index
    %c0_52 = arith.constant 0 : index
    %83 = vector.load %arg14[%c0_50, %c0_51, %c0_52] : memref<2x1x32xf32, #tpu.memory_space<vmem>>, vector<1x1x32xf32>
    %84 = vector.shape_cast %83 : vector<1x1x32xf32> to vector<1x32xf32>
    %cst_53 = arith.constant dense<0.000000e+00> : vector<17xf32>
    %85 = vector.multi_reduction <add>, %80, %cst_53 [1] : vector<17x32xf32> to vector<17xf32>
    %86 = vector.shape_cast %85 : vector<17xf32> to vector<17x1xf32>
    %cst_54 = arith.constant 3.200000e+01 : f32
    %87 = vector.broadcast %cst_54 : f32 to vector<17x1xf32>
    %88 = arith.divf %86, %87 : vector<17x1xf32>
    %89 = vector.broadcast %88 : vector<17x1xf32> to vector<17x32xf32>
    %90 = arith.subf %80, %89 : vector<17x32xf32>
    %91 = arith.mulf %90, %90 : vector<17x32xf32>
    %cst_55 = arith.constant dense<0.000000e+00> : vector<17xf32>
    %92 = vector.multi_reduction <add>, %91, %cst_55 [1] : vector<17x32xf32> to vector<17xf32>
    %93 = vector.shape_cast %92 : vector<17xf32> to vector<17x1xf32>
    %cst_56 = arith.constant 3.200000e+01 : f32
    %94 = vector.broadcast %cst_56 : f32 to vector<17x1xf32>
    %95 = arith.divf %93, %94 : vector<17x1xf32>
    %96 = vector.broadcast %88 : vector<17x1xf32> to vector<17x32xf32>
    %97 = arith.subf %80, %96 : vector<17x32xf32>
    %cst_57 = arith.constant 9.99999974E-6 : f32
    %98 = vector.broadcast %cst_57 : f32 to vector<17x1xf32>
    %99 = arith.addf %95, %98 : vector<17x1xf32>
    %100 = math.rsqrt %99 : vector<17x1xf32>
    %101 = vector.broadcast %100 : vector<17x1xf32> to vector<17x32xf32>
    %102 = arith.mulf %97, %101 : vector<17x32xf32>
    %103 = vector.broadcast %82 : vector<1x32xf32> to vector<17x32xf32>
    %104 = arith.mulf %102, %103 : vector<17x32xf32>
    %105 = vector.broadcast %84 : vector<1x32xf32> to vector<17x32xf32>
    %106 = arith.addf %104, %105 : vector<17x32xf32>
    %c0_58 = arith.constant 0 : index
    %c0_59 = arith.constant 0 : index
    %c0_60 = arith.constant 0 : index
    %107 = vector.load %arg15[%c0_58, %c0_59, %c0_60] : memref<2x32x128xf32, #tpu.memory_space<vmem>>, vector<1x32x128xf32>
    %108 = vector.shape_cast %107 : vector<1x32x128xf32> to vector<32x128xf32>
    %cst_61 = arith.constant dense<0.000000e+00> : vector<17x128xf32>
    %109 = tpu.matmul %106, %108, %cst_61 {dimension_numbers = #tpu.dot_dimension_numbers<[1], [0], [0], [1], [0, 0, 1, 1], [], []>} : vector<17x32xf32>, vector<32x128xf32>, vector<17x128xf32> -> vector<17x128xf32>
    %c0_62 = arith.constant 0 : index
    %c0_63 = arith.constant 0 : index
    %c0_64 = arith.constant 0 : index
    %110 = vector.load %arg16[%c0_62, %c0_63, %c0_64] : memref<2x1x128xf32, #tpu.memory_space<vmem>>, vector<1x1x128xf32>
    %111 = vector.shape_cast %110 : vector<1x1x128xf32> to vector<1x128xf32>
    %112 = vector.broadcast %111 : vector<1x128xf32> to vector<17x128xf32>
    %113 = arith.addf %109, %112 : vector<17x128xf32>
    %cst_65 = arith.constant 0.707106769 : f32
    %114 = vector.broadcast %cst_65 : f32 to vector<17x128xf32>
    %115 = arith.mulf %113, %114 : vector<17x128xf32>
    %cst_66 = arith.constant 0.000000e+00 : f32
    %116 = vector.broadcast %cst_66 : f32 to vector<17x128xf32>
    %117 = arith.cmpf oge, %115, %116 : vector<17x128xf32>
    %cst_67 = arith.constant 1.000000e+00 : f32
    %cst_68 = arith.constant -1.000000e+00 : f32
    %118 = vector.broadcast %cst_67 : f32 to vector<17x128xf32>
    %119 = vector.broadcast %cst_68 : f32 to vector<17x128xf32>
    %120 = arith.select %117, %118, %119 : vector<17x128xi1>, vector<17x128xf32>
    %121 = math.absf %115 : vector<17x128xf32>
    %cst_69 = arith.constant 0.327591091 : f32
    %122 = vector.broadcast %cst_69 : f32 to vector<17x128xf32>
    %123 = arith.mulf %122, %121 : vector<17x128xf32>
    %cst_70 = arith.constant 1.000000e+00 : f32
    %124 = vector.broadcast %cst_70 : f32 to vector<17x128xf32>
    %125 = arith.addf %124, %123 : vector<17x128xf32>
    %cst_71 = arith.constant 1.000000e+00 : f32
    %126 = vector.broadcast %cst_71 : f32 to vector<17x128xf32>
    %127 = arith.divf %126, %125 : vector<17x128xf32>
    %cst_72 = arith.constant 1.06140542 : f32
    %128 = vector.broadcast %cst_72 : f32 to vector<17x128xf32>
    %129 = arith.mulf %128, %127 : vector<17x128xf32>
    %cst_73 = arith.constant -1.45315206 : f32
    %130 = vector.broadcast %cst_73 : f32 to vector<17x128xf32>
    %131 = arith.addf %129, %130 : vector<17x128xf32>
    %132 = arith.mulf %131, %127 : vector<17x128xf32>
    %cst_74 = arith.constant 1.42141378 : f32
    %133 = vector.broadcast %cst_74 : f32 to vector<17x128xf32>
    %134 = arith.addf %132, %133 : vector<17x128xf32>
    %135 = arith.mulf %134, %127 : vector<17x128xf32>
    %cst_75 = arith.constant -0.284496725 : f32
    %136 = vector.broadcast %cst_75 : f32 to vector<17x128xf32>
    %137 = arith.addf %135, %136 : vector<17x128xf32>
    %138 = arith.mulf %137, %127 : vector<17x128xf32>
    %cst_76 = arith.constant 0.254829586 : f32
    %139 = vector.broadcast %cst_76 : f32 to vector<17x128xf32>
    %140 = arith.addf %138, %139 : vector<17x128xf32>
    %141 = arith.mulf %140, %127 : vector<17x128xf32>
    %cst_77 = arith.constant 0.000000e+00 : f32
    %142 = vector.broadcast %cst_77 : f32 to vector<17x128xf32>
    %143 = arith.subf %142, %121 : vector<17x128xf32>
    %144 = arith.mulf %143, %121 : vector<17x128xf32>
    %145 = math.exp %144 : vector<17x128xf32>
    %146 = arith.mulf %141, %145 : vector<17x128xf32>
    %cst_78 = arith.constant 1.000000e+00 : f32
    %147 = vector.broadcast %cst_78 : f32 to vector<17x128xf32>
    %148 = arith.subf %147, %146 : vector<17x128xf32>
    %149 = arith.mulf %120, %148 : vector<17x128xf32>
    %cst_79 = arith.constant 5.000000e-01 : f32
    %150 = vector.broadcast %cst_79 : f32 to vector<17x128xf32>
    %151 = arith.mulf %150, %113 : vector<17x128xf32>
    %cst_80 = arith.constant 1.000000e+00 : f32
    %152 = vector.broadcast %cst_80 : f32 to vector<17x128xf32>
    %153 = arith.addf %152, %149 : vector<17x128xf32>
    %154 = arith.mulf %151, %153 : vector<17x128xf32>
    %c0_81 = arith.constant 0 : index
    %c0_82 = arith.constant 0 : index
    %c0_83 = arith.constant 0 : index
    %155 = vector.load %arg17[%c0_81, %c0_82, %c0_83] : memref<2x128x32xf32, #tpu.memory_space<vmem>>, vector<1x128x32xf32>
    %156 = vector.shape_cast %155 : vector<1x128x32xf32> to vector<128x32xf32>
    %cst_84 = arith.constant dense<0.000000e+00> : vector<17x32xf32>
    %157 = tpu.matmul %154, %156, %cst_84 {dimension_numbers = #tpu.dot_dimension_numbers<[1], [0], [0], [1], [0, 0, 1, 1], [], []>} : vector<17x128xf32>, vector<128x32xf32>, vector<17x32xf32> -> vector<17x32xf32>
    %158 = arith.addf %80, %157 : vector<17x32xf32>
    %c0_85 = arith.constant 0 : index
    %c0_86 = arith.constant 0 : index
    %c0_87 = arith.constant 0 : index
    %159 = vector.load %arg18[%c0_85, %c0_86, %c0_87] : memref<2x1x32xf32, #tpu.memory_space<vmem>>, vector<1x1x32xf32>
    %160 = vector.shape_cast %159 : vector<1x1x32xf32> to vector<1x32xf32>
    %161 = vector.broadcast %160 : vector<1x32xf32> to vector<17x32xf32>
    %162 = arith.addf %158, %161 : vector<17x32xf32>
    %c1 = arith.constant 1 : index
    %c0_88 = arith.constant 0 : index
    %c0_89 = arith.constant 0 : index
    %163 = vector.load %arg5[%c1, %c0_88, %c0_89] : memref<2x1x32xf32, #tpu.memory_space<vmem>>, vector<1x1x32xf32>
    %164 = vector.shape_cast %163 : vector<1x1x32xf32> to vector<1x32xf32>
    %c1_90 = arith.constant 1 : index
    %c0_91 = arith.constant 0 : index
    %c0_92 = arith.constant 0 : index
    %165 = vector.load %arg6[%c1_90, %c0_91, %c0_92] : memref<2x1x32xf32, #tpu.memory_space<vmem>>, vector<1x1x32xf32>
    %166 = vector.shape_cast %165 : vector<1x1x32xf32> to vector<1x32xf32>
    %cst_93 = arith.constant dense<0.000000e+00> : vector<17xf32>
    %167 = vector.multi_reduction <add>, %162, %cst_93 [1] : vector<17x32xf32> to vector<17xf32>
    %168 = vector.shape_cast %167 : vector<17xf32> to vector<17x1xf32>
    %cst_94 = arith.constant 3.200000e+01 : f32
    %169 = vector.broadcast %cst_94 : f32 to vector<17x1xf32>
    %170 = arith.divf %168, %169 : vector<17x1xf32>
    %171 = vector.broadcast %170 : vector<17x1xf32> to vector<17x32xf32>
    %172 = arith.subf %162, %171 : vector<17x32xf32>
    %173 = arith.mulf %172, %172 : vector<17x32xf32>
    %cst_95 = arith.constant dense<0.000000e+00> : vector<17xf32>
    %174 = vector.multi_reduction <add>, %173, %cst_95 [1] : vector<17x32xf32> to vector<17xf32>
    %175 = vector.shape_cast %174 : vector<17xf32> to vector<17x1xf32>
    %cst_96 = arith.constant 3.200000e+01 : f32
    %176 = vector.broadcast %cst_96 : f32 to vector<17x1xf32>
    %177 = arith.divf %175, %176 : vector<17x1xf32>
    %178 = vector.broadcast %170 : vector<17x1xf32> to vector<17x32xf32>
    %179 = arith.subf %162, %178 : vector<17x32xf32>
    %cst_97 = arith.constant 9.99999974E-6 : f32
    %180 = vector.broadcast %cst_97 : f32 to vector<17x1xf32>
    %181 = arith.addf %177, %180 : vector<17x1xf32>
    %182 = math.rsqrt %181 : vector<17x1xf32>
    %183 = vector.broadcast %182 : vector<17x1xf32> to vector<17x32xf32>
    %184 = arith.mulf %179, %183 : vector<17x32xf32>
    %185 = vector.broadcast %164 : vector<1x32xf32> to vector<17x32xf32>
    %186 = arith.mulf %184, %185 : vector<17x32xf32>
    %187 = vector.broadcast %166 : vector<1x32xf32> to vector<17x32xf32>
    %188 = arith.addf %186, %187 : vector<17x32xf32>
    %c1_98 = arith.constant 1 : index
    %c0_99 = arith.constant 0 : index
    %c0_100 = arith.constant 0 : index
    %189 = vector.load %arg7[%c1_98, %c0_99, %c0_100] : memref<2x32x32xf32, #tpu.memory_space<vmem>>, vector<1x32x32xf32>
    %190 = vector.shape_cast %189 : vector<1x32x32xf32> to vector<32x32xf32>
    %cst_101 = arith.constant dense<0.000000e+00> : vector<17x32xf32>
    %191 = tpu.matmul %188, %190, %cst_101 {dimension_numbers = #tpu.dot_dimension_numbers<[1], [0], [0], [1], [0, 0, 1, 1], [], []>} : vector<17x32xf32>, vector<32x32xf32>, vector<17x32xf32> -> vector<17x32xf32>
    %c1_102 = arith.constant 1 : index
    %c0_103 = arith.constant 0 : index
    %c0_104 = arith.constant 0 : index
    %192 = vector.load %arg8[%c1_102, %c0_103, %c0_104] : memref<2x1x32xf32, #tpu.memory_space<vmem>>, vector<1x1x32xf32>
    %193 = vector.shape_cast %192 : vector<1x1x32xf32> to vector<1x32xf32>
    %194 = vector.broadcast %193 : vector<1x32xf32> to vector<17x32xf32>
    %195 = arith.addf %191, %194 : vector<17x32xf32>
    %c1_105 = arith.constant 1 : index
    %c0_106 = arith.constant 0 : index
    %c0_107 = arith.constant 0 : index
    %196 = vector.load %arg9[%c1_105, %c0_106, %c0_107] : memref<2x32x32xf32, #tpu.memory_space<vmem>>, vector<1x32x32xf32>
    %197 = vector.shape_cast %196 : vector<1x32x32xf32> to vector<32x32xf32>
    %cst_108 = arith.constant dense<0.000000e+00> : vector<17x32xf32>
    %198 = tpu.matmul %188, %197, %cst_108 {dimension_numbers = #tpu.dot_dimension_numbers<[1], [0], [0], [1], [0, 0, 1, 1], [], []>} : vector<17x32xf32>, vector<32x32xf32>, vector<17x32xf32> -> vector<17x32xf32>
    %c1_109 = arith.constant 1 : index
    %c0_110 = arith.constant 0 : index
    %c0_111 = arith.constant 0 : index
    %199 = vector.load %arg10[%c1_109, %c0_110, %c0_111] : memref<2x1x32xf32, #tpu.memory_space<vmem>>, vector<1x1x32xf32>
    %200 = vector.shape_cast %199 : vector<1x1x32xf32> to vector<1x32xf32>
    %201 = vector.broadcast %200 : vector<1x32xf32> to vector<17x32xf32>
    %202 = arith.addf %198, %201 : vector<17x32xf32>
    %c1_112 = arith.constant 1 : index
    %c0_113 = arith.constant 0 : index
    %c0_114 = arith.constant 0 : index
    %203 = vector.load %arg11[%c1_112, %c0_113, %c0_114] : memref<2x32x32xf32, #tpu.memory_space<vmem>>, vector<1x32x32xf32>
    %204 = vector.shape_cast %203 : vector<1x32x32xf32> to vector<32x32xf32>
    %cst_115 = arith.constant dense<0.000000e+00> : vector<17x32xf32>
    %205 = tpu.matmul %188, %204, %cst_115 {dimension_numbers = #tpu.dot_dimension_numbers<[1], [0], [0], [1], [0, 0, 1, 1], [], []>} : vector<17x32xf32>, vector<32x32xf32>, vector<17x32xf32> -> vector<17x32xf32>
    %c1_116 = arith.constant 1 : index
    %c0_117 = arith.constant 0 : index
    %c0_118 = arith.constant 0 : index
    %206 = vector.load %arg12[%c1_116, %c0_117, %c0_118] : memref<2x1x32xf32, #tpu.memory_space<vmem>>, vector<1x1x32xf32>
    %207 = vector.shape_cast %206 : vector<1x1x32xf32> to vector<1x32xf32>
    %208 = vector.broadcast %207 : vector<1x32xf32> to vector<17x32xf32>
    %209 = arith.addf %205, %208 : vector<17x32xf32>
    %cst_119 = arith.constant 0.353553385 : f32
    %210 = vector.broadcast %cst_119 : f32 to vector<17x32xf32>
    %211 = arith.mulf %195, %210 : vector<17x32xf32>
    %212 = vector.shape_cast %211 : vector<17x32xf32> to vector<1x17x32xf32>
    %213 = vector.broadcast %212 : vector<1x17x32xf32> to vector<4x17x32xf32>
    %214 = vector.broadcast %0 : vector<4x1x32xf32> to vector<4x17x32xf32>
    %215 = arith.mulf %213, %214 : vector<4x17x32xf32>
    %216 = vector.shape_cast %202 : vector<17x32xf32> to vector<1x17x32xf32>
    %217 = vector.shape_cast %216 : vector<1x17x32xf32> to vector<1x17x32xf32>
    %218 = vector.broadcast %217 : vector<1x17x32xf32> to vector<4x17x32xf32>
    %219 = vector.shape_cast %209 : vector<17x32xf32> to vector<1x17x32xf32>
    %220 = vector.broadcast %219 : vector<1x17x32xf32> to vector<4x17x32xf32>
    %221 = vector.broadcast %0 : vector<4x1x32xf32> to vector<4x17x32xf32>
    %222 = arith.mulf %220, %221 : vector<4x17x32xf32>
    "tpu.trace_start"() <{level = 10 : i32, message = "hqd,hkd->hqk"}> : () -> ()
    %cst_120 = arith.constant dense<0.000000e+00> : vector<4x17x17xf32>
    %223 = tpu.matmul %215, %218, %cst_120 {dimension_numbers = #tpu.dot_dimension_numbers<[2], [2], [1], [1], [0, 0, 0, 1, 1, 1], [0], [0]>} : vector<4x17x32xf32>, vector<4x17x32xf32>, vector<4x17x17xf32> -> vector<4x17x17xf32>
    "tpu.trace_stop"() : () -> ()
    %cst_121 = arith.constant dense<0xFF800000> : vector<4x17xf32>
    %224 = vector.multi_reduction <maximumf>, %223, %cst_121 [2] : vector<4x17x17xf32> to vector<4x17xf32>
    %225 = vector.shape_cast %224 : vector<4x17xf32> to vector<4x17x1xf32>
    %226 = vector.broadcast %225 : vector<4x17x1xf32> to vector<4x17x17xf32>
    %227 = arith.subf %223, %226 : vector<4x17x17xf32>
    %228 = math.exp %227 : vector<4x17x17xf32>
    %cst_122 = arith.constant dense<0.000000e+00> : vector<4x17xf32>
    %229 = vector.multi_reduction <add>, %228, %cst_122 [2] : vector<4x17x17xf32> to vector<4x17xf32>
    %230 = vector.shape_cast %229 : vector<4x17xf32> to vector<4x17x1xf32>
    %231 = tpu.reciprocal %230 {approx = true} : vector<4x17x1xf32> -> vector<4x17x1xf32>
    %232 = vector.broadcast %231 : vector<4x17x1xf32> to vector<4x17x17xf32>
    %233 = arith.mulf %228, %232 : vector<4x17x17xf32>
    "tpu.trace_start"() <{level = 10 : i32, message = "hqk,hkd->hqd"}> : () -> ()
    %cst_123 = arith.constant dense<0.000000e+00> : vector<4x17x32xf32>
    %234 = tpu.matmul %233, %222, %cst_123 {dimension_numbers = #tpu.dot_dimension_numbers<[2], [1], [1], [2], [0, 0, 0, 1, 1, 2], [0], [0]>} : vector<4x17x17xf32>, vector<4x17x32xf32>, vector<4x17x32xf32> -> vector<4x17x32xf32>
    "tpu.trace_stop"() : () -> ()
    %cst_124 = arith.constant dense<0.000000e+00> : vector<17x32xf32>
    %235 = vector.multi_reduction <add>, %234, %cst_124 [0] : vector<4x17x32xf32> to vector<17x32xf32>
    %236 = arith.addf %162, %235 : vector<17x32xf32>
    %c1_125 = arith.constant 1 : index
    %c0_126 = arith.constant 0 : index
    %c0_127 = arith.constant 0 : index
    %237 = vector.load %arg13[%c1_125, %c0_126, %c0_127] : memref<2x1x32xf32, #tpu.memory_space<vmem>>, vector<1x1x32xf32>
    %238 = vector.shape_cast %237 : vector<1x1x32xf32> to vector<1x32xf32>
    %c1_128 = arith.constant 1 : index
    %c0_129 = arith.constant 0 : index
    %c0_130 = arith.constant 0 : index
    %239 = vector.load %arg14[%c1_128, %c0_129, %c0_130] : memref<2x1x32xf32, #tpu.memory_space<vmem>>, vector<1x1x32xf32>
    %240 = vector.shape_cast %239 : vector<1x1x32xf32> to vector<1x32xf32>
    %cst_131 = arith.constant dense<0.000000e+00> : vector<17xf32>
    %241 = vector.multi_reduction <add>, %236, %cst_131 [1] : vector<17x32xf32> to vector<17xf32>
    %242 = vector.shape_cast %241 : vector<17xf32> to vector<17x1xf32>
    %cst_132 = arith.constant 3.200000e+01 : f32
    %243 = vector.broadcast %cst_132 : f32 to vector<17x1xf32>
    %244 = arith.divf %242, %243 : vector<17x1xf32>
    %245 = vector.broadcast %244 : vector<17x1xf32> to vector<17x32xf32>
    %246 = arith.subf %236, %245 : vector<17x32xf32>
    %247 = arith.mulf %246, %246 : vector<17x32xf32>
    %cst_133 = arith.constant dense<0.000000e+00> : vector<17xf32>
    %248 = vector.multi_reduction <add>, %247, %cst_133 [1] : vector<17x32xf32> to vector<17xf32>
    %249 = vector.shape_cast %248 : vector<17xf32> to vector<17x1xf32>
    %cst_134 = arith.constant 3.200000e+01 : f32
    %250 = vector.broadcast %cst_134 : f32 to vector<17x1xf32>
    %251 = arith.divf %249, %250 : vector<17x1xf32>
    %252 = vector.broadcast %244 : vector<17x1xf32> to vector<17x32xf32>
    %253 = arith.subf %236, %252 : vector<17x32xf32>
    %cst_135 = arith.constant 9.99999974E-6 : f32
    %254 = vector.broadcast %cst_135 : f32 to vector<17x1xf32>
    %255 = arith.addf %251, %254 : vector<17x1xf32>
    %256 = math.rsqrt %255 : vector<17x1xf32>
    %257 = vector.broadcast %256 : vector<17x1xf32> to vector<17x32xf32>
    %258 = arith.mulf %253, %257 : vector<17x32xf32>
    %259 = vector.broadcast %238 : vector<1x32xf32> to vector<17x32xf32>
    %260 = arith.mulf %258, %259 : vector<17x32xf32>
    %261 = vector.broadcast %240 : vector<1x32xf32> to vector<17x32xf32>
    %262 = arith.addf %260, %261 : vector<17x32xf32>
    %c1_136 = arith.constant 1 : index
    %c0_137 = arith.constant 0 : index
    %c0_138 = arith.constant 0 : index
    %263 = vector.load %arg15[%c1_136, %c0_137, %c0_138] : memref<2x32x128xf32, #tpu.memory_space<vmem>>, vector<1x32x128xf32>
    %264 = vector.shape_cast %263 : vector<1x32x128xf32> to vector<32x128xf32>
    %cst_139 = arith.constant dense<0.000000e+00> : vector<17x128xf32>
    %265 = tpu.matmul %262, %264, %cst_139 {dimension_numbers = #tpu.dot_dimension_numbers<[1], [0], [0], [1], [0, 0, 1, 1], [], []>} : vector<17x32xf32>, vector<32x128xf32>, vector<17x128xf32> -> vector<17x128xf32>
    %c1_140 = arith.constant 1 : index
    %c0_141 = arith.constant 0 : index
    %c0_142 = arith.constant 0 : index
    %266 = vector.load %arg16[%c1_140, %c0_141, %c0_142] : memref<2x1x128xf32, #tpu.memory_space<vmem>>, vector<1x1x128xf32>
    %267 = vector.shape_cast %266 : vector<1x1x128xf32> to vector<1x128xf32>
    %268 = vector.broadcast %267 : vector<1x128xf32> to vector<17x128xf32>
    %269 = arith.addf %265, %268 : vector<17x128xf32>
    %cst_143 = arith.constant 0.707106769 : f32
    %270 = vector.broadcast %cst_143 : f32 to vector<17x128xf32>
    %271 = arith.mulf %269, %270 : vector<17x128xf32>
    %cst_144 = arith.constant 0.000000e+00 : f32
    %272 = vector.broadcast %cst_144 : f32 to vector<17x128xf32>
    %273 = arith.cmpf oge, %271, %272 : vector<17x128xf32>
    %cst_145 = arith.constant 1.000000e+00 : f32
    %cst_146 = arith.constant -1.000000e+00 : f32
    %274 = vector.broadcast %cst_145 : f32 to vector<17x128xf32>
    %275 = vector.broadcast %cst_146 : f32 to vector<17x128xf32>
    %276 = arith.select %273, %274, %275 : vector<17x128xi1>, vector<17x128xf32>
    %277 = math.absf %271 : vector<17x128xf32>
    %cst_147 = arith.constant 0.327591091 : f32
    %278 = vector.broadcast %cst_147 : f32 to vector<17x128xf32>
    %279 = arith.mulf %278, %277 : vector<17x128xf32>
    %cst_148 = arith.constant 1.000000e+00 : f32
    %280 = vector.broadcast %cst_148 : f32 to vector<17x128xf32>
    %281 = arith.addf %280, %279 : vector<17x128xf32>
    %cst_149 = arith.constant 1.000000e+00 : f32
    %282 = vector.broadcast %cst_149 : f32 to vector<17x128xf32>
    %283 = arith.divf %282, %281 : vector<17x128xf32>
    %cst_150 = arith.constant 1.06140542 : f32
    %284 = vector.broadcast %cst_150 : f32 to vector<17x128xf32>
    %285 = arith.mulf %284, %283 : vector<17x128xf32>
    %cst_151 = arith.constant -1.45315206 : f32
    %286 = vector.broadcast %cst_151 : f32 to vector<17x128xf32>
    %287 = arith.addf %285, %286 : vector<17x128xf32>
    %288 = arith.mulf %287, %283 : vector<17x128xf32>
    %cst_152 = arith.constant 1.42141378 : f32
    %289 = vector.broadcast %cst_152 : f32 to vector<17x128xf32>
    %290 = arith.addf %288, %289 : vector<17x128xf32>
    %291 = arith.mulf %290, %283 : vector<17x128xf32>
    %cst_153 = arith.constant -0.284496725 : f32
    %292 = vector.broadcast %cst_153 : f32 to vector<17x128xf32>
    %293 = arith.addf %291, %292 : vector<17x128xf32>
    %294 = arith.mulf %293, %283 : vector<17x128xf32>
    %cst_154 = arith.constant 0.254829586 : f32
    %295 = vector.broadcast %cst_154 : f32 to vector<17x128xf32>
    %296 = arith.addf %294, %295 : vector<17x128xf32>
    %297 = arith.mulf %296, %283 : vector<17x128xf32>
    %cst_155 = arith.constant 0.000000e+00 : f32
    %298 = vector.broadcast %cst_155 : f32 to vector<17x128xf32>
    %299 = arith.subf %298, %277 : vector<17x128xf32>
    %300 = arith.mulf %299, %277 : vector<17x128xf32>
    %301 = math.exp %300 : vector<17x128xf32>
    %302 = arith.mulf %297, %301 : vector<17x128xf32>
    %cst_156 = arith.constant 1.000000e+00 : f32
    %303 = vector.broadcast %cst_156 : f32 to vector<17x128xf32>
    %304 = arith.subf %303, %302 : vector<17x128xf32>
    %305 = arith.mulf %276, %304 : vector<17x128xf32>
    %cst_157 = arith.constant 5.000000e-01 : f32
    %306 = vector.broadcast %cst_157 : f32 to vector<17x128xf32>
    %307 = arith.mulf %306, %269 : vector<17x128xf32>
    %cst_158 = arith.constant 1.000000e+00 : f32
    %308 = vector.broadcast %cst_158 : f32 to vector<17x128xf32>
    %309 = arith.addf %308, %305 : vector<17x128xf32>
    %310 = arith.mulf %307, %309 : vector<17x128xf32>
    %c1_159 = arith.constant 1 : index
    %c0_160 = arith.constant 0 : index
    %c0_161 = arith.constant 0 : index
    %311 = vector.load %arg17[%c1_159, %c0_160, %c0_161] : memref<2x128x32xf32, #tpu.memory_space<vmem>>, vector<1x128x32xf32>
    %312 = vector.shape_cast %311 : vector<1x128x32xf32> to vector<128x32xf32>
    %cst_162 = arith.constant dense<0.000000e+00> : vector<17x32xf32>
    %313 = tpu.matmul %310, %312, %cst_162 {dimension_numbers = #tpu.dot_dimension_numbers<[1], [0], [0], [1], [0, 0, 1, 1], [], []>} : vector<17x128xf32>, vector<128x32xf32>, vector<17x32xf32> -> vector<17x32xf32>
    %314 = arith.addf %236, %313 : vector<17x32xf32>
    %c1_163 = arith.constant 1 : index
    %c0_164 = arith.constant 0 : index
    %c0_165 = arith.constant 0 : index
    %315 = vector.load %arg18[%c1_163, %c0_164, %c0_165] : memref<2x1x32xf32, #tpu.memory_space<vmem>>, vector<1x1x32xf32>
    %316 = vector.shape_cast %315 : vector<1x1x32xf32> to vector<1x32xf32>
    %317 = vector.broadcast %316 : vector<1x32xf32> to vector<17x32xf32>
    %318 = arith.addf %314, %317 : vector<17x32xf32>
    %319 = vector.extract_strided_slice %318 {offsets = [0, 0], sizes = [1, 32], strides = [1, 1]} : vector<17x32xf32> to vector<1x32xf32>
    %c0_166 = arith.constant 0 : index
    %c0_167 = arith.constant 0 : index
    %320 = vector.load %arg19[%c0_166, %c0_167] : memref<32x128xf32, #tpu.memory_space<vmem>>, vector<32x128xf32>
    %cst_168 = arith.constant dense<0.000000e+00> : vector<1x128xf32>
    %321 = tpu.matmul %319, %320, %cst_168 {dimension_numbers = #tpu.dot_dimension_numbers<[1], [0], [0], [1], [0, 0, 1, 1], [], []>} : vector<1x32xf32>, vector<32x128xf32>, vector<1x128xf32> -> vector<1x128xf32>
    %c0_169 = arith.constant 0 : index
    %c0_170 = arith.constant 0 : index
    %322 = vector.load %arg20[%c0_169, %c0_170] : memref<1x128xf32, #tpu.memory_space<vmem>>, vector<1x128xf32>
    %323 = arith.addf %321, %322 : vector<1x128xf32>
    %cst_171 = arith.constant dense<0xFF800000> : vector<1xf32>
    %324 = vector.multi_reduction <maximumf>, %323, %cst_171 [1] : vector<1x128xf32> to vector<1xf32>
    %325 = vector.shape_cast %324 : vector<1xf32> to vector<1x1xf32>
    %326 = vector.broadcast %325 : vector<1x1xf32> to vector<1x128xf32>
    %327 = arith.subf %323, %326 : vector<1x128xf32>
    %328 = math.exp %327 : vector<1x128xf32>
    %cst_172 = arith.constant dense<0.000000e+00> : vector<1xf32>
    %329 = vector.multi_reduction <add>, %328, %cst_172 [1] : vector<1x128xf32> to vector<1xf32>
    %330 = vector.shape_cast %329 : vector<1xf32> to vector<1x1xf32>
    %331 = tpu.reciprocal %330 : vector<1x1xf32> -> vector<1x1xf32>
    %332 = vector.broadcast %331 : vector<1x1xf32> to vector<1x128xf32>
    %333 = arith.mulf %328, %332 : vector<1x128xf32>
    %c0_173 = arith.constant 0 : index
    %c0_174 = arith.constant 0 : index
    %c0_175 = arith.constant 0 : index
    %334 = vector.load %arg21[%c0_173, %c0_174, %c0_175] : memref<1x1x128xf32, #tpu.memory_space<vmem>>, vector<1x1x128xf32>
    %335 = vector.shape_cast %334 : vector<1x1x128xf32> to vector<1x128xf32>
    %336 = vector.shape_cast %333 : vector<1x128xf32> to vector<1x1x128xf32>
    tpu.vector_store %arg21[%c0_173, %c0_174, %c0_175], %336 {strides = array<i32>} : memref<1x1x128xf32, #tpu.memory_space<vmem>>, vector<1x1x128xf32>,
    return
  }
  func.func @transform_0(%arg0: i32) -> (i32, i32, i32) {
    %c0_i32 = arith.constant 0 : i32
    %c0_i32_0 = arith.constant 0 : i32
    %c0_i32_1 = arith.constant 0 : i32
    return %arg0, %c0_i32, %c0_i32_0 : i32, i32, i32
  }
  func.func @transform_1(%arg0: i32) -> (i32, i32) {
    %c0_i32 = arith.constant 0 : i32
    %c0_i32_0 = arith.constant 0 : i32
    %c0_i32_1 = arith.constant 0 : i32
    return %c0_i32, %c0_i32_0 : i32, i32
  }
  func.func @transform_2(%arg0: i32) -> (i32, i32, i32) {
    %c0_i32 = arith.constant 0 : i32
    %c0_i32_0 = arith.constant 0 : i32
    %c0_i32_1 = arith.constant 0 : i32
    %c0_i32_2 = arith.constant 0 : i32
    return %c0_i32, %c0_i32_0, %c0_i32_1 : i32, i32, i32
  }
  func.func @transform_3(%arg0: i32) -> (i32, i32) {
    %c0_i32 = arith.constant 0 : i32
    %c0_i32_0 = arith.constant 0 : i32
    %c0_i32_1 = arith.constant 0 : i32
    return %c0_i32, %c0_i32_0 : i32, i32
  }
  func.func @transform_4(%arg0: i32) -> (i32, i32, i32) {
    %c0_i32 = arith.constant 0 : i32
    %c0_i32_0 = arith.constant 0 : i32
    %c0_i32_1 = arith.constant 0 : i32
    %c0_i32_2 = arith.constant 0 : i32
    return %c0_i32, %c0_i32_0, %c0_i32_1 : i32, i32, i32
  }
  func.func @transform_5(%arg0: i32) -> (i32, i32, i32) {
    %c0_i32 = arith.constant 0 : i32
    %c0_i32_0 = arith.constant 0 : i32
    %c0_i32_1 = arith.constant 0 : i32
    %c0_i32_2 = arith.constant 0 : i32
    return %c0_i32, %c0_i32_0, %c0_i32_1 : i32, i32, i32
  }
  func.func @transform_6(%arg0: i32) -> (i32, i32, i32) {
    %c0_i32 = arith.constant 0 : i32
    %c0_i32_0 = arith.constant 0 : i32
    %c0_i32_1 = arith.constant 0 : i32
    %c0_i32_2 = arith.constant 0 : i32
    return %c0_i32, %c0_i32_0, %c0_i32_1 : i32, i32, i32
  }
  func.func @transform_7(%arg0: i32) -> (i32, i32, i32) {
    %c0_i32 = arith.constant 0 : i32
    %c0_i32_0 = arith.constant 0 : i32
    %c0_i32_1 = arith.constant 0 : i32
    %c0_i32_2 = arith.constant 0 : i32
    return %c0_i32, %c0_i32_0, %c0_i32_1 : i32, i32, i32
  }
  func.func @transform_8(%arg0: i32) -> (i32, i32, i32) {
    %c0_i32 = arith.constant 0 : i32
    %c0_i32_0 = arith.constant 0 : i32
    %c0_i32_1 = arith.constant 0 : i32
    %c0_i32_2 = arith.constant 0 : i32
    return %c0_i32, %c0_i32_0, %c0_i32_1 : i32, i32, i32
  }
  func.func @transform_9(%arg0: i32) -> (i32, i32, i32) {
    %c0_i32 = arith.constant 0 : i32
    %c0_i32_0 = arith.constant 0 : i32
    %c0_i32_1 = arith.constant 0 : i32
    %c0_i32_2 = arith.constant 0 : i32
    return %c0_i32, %c0_i32_0, %c0_i32_1 : i32, i32, i32
  }
  func.func @transform_10(%arg0: i32) -> (i32, i32, i32) {
    %c0_i32 = arith.constant 0 : i32
    %c0_i32_0 = arith.constant 0 : i32
    %c0_i32_1 = arith.constant 0 : i32
    %c0_i32_2 = arith.constant 0 : i32
    return %c0_i32, %c0_i32_0, %c0_i32_1 : i32, i32, i32
  }
  func.func @transform_11(%arg0: i32) -> (i32, i32, i32) {
    %c0_i32 = arith.constant 0 : i32
    %c0_i32_0 = arith.constant 0 : i32
    %c0_i32_1 = arith.constant 0 : i32
    %c0_i32_2 = arith.constant 0 : i32
    return %c0_i32, %c0_i32_0, %c0_i32_1 : i32, i32, i32
  }
  func.func @transform_12(%arg0: i32) -> (i32, i32, i32) {
    %c0_i32 = arith.constant 0 : i32
    %c0_i32_0 = arith.constant 0 : i32
    %c0_i32_1 = arith.constant 0 : i32
    %c0_i32_2 = arith.constant 0 : i32
    return %c0_i32, %c0_i32_0, %c0_i32_1 : i32, i32, i32
  }
  func.func @transform_13(%arg0: i32) -> (i32, i32, i32) {
    %c0_i32 = arith.constant 0 : i32
    %c0_i32_0 = arith.constant 0 : i32
    %c0_i32_1 = arith.constant 0 : i32
    %c0_i32_2 = arith.constant 0 : i32
    return %c0_i32, %c0_i32_0, %c0_i32_1 : i32, i32, i32
  }
  func.func @transform_14(%arg0: i32) -> (i32, i32, i32) {
    %c0_i32 = arith.constant 0 : i32
    %c0_i32_0 = arith.constant 0 : i32
    %c0_i32_1 = arith.constant 0 : i32
    %c0_i32_2 = arith.constant 0 : i32
    return %c0_i32, %c0_i32_0, %c0_i32_1 : i32, i32, i32
  }
  func.func @transform_15(%arg0: i32) -> (i32, i32, i32) {
    %c0_i32 = arith.constant 0 : i32
    %c0_i32_0 = arith.constant 0 : i32
    %c0_i32_1 = arith.constant 0 : i32
    %c0_i32_2 = arith.constant 0 : i32
    return %c0_i32, %c0_i32_0, %c0_i32_1 : i32, i32, i32
  }
  func.func @transform_16(%arg0: i32) -> (i32, i32, i32) {
    %c0_i32 = arith.constant 0 : i32
    %c0_i32_0 = arith.constant 0 : i32
    %c0_i32_1 = arith.constant 0 : i32
    %c0_i32_2 = arith.constant 0 : i32
    return %c0_i32, %c0_i32_0, %c0_i32_1 : i32, i32, i32
  }
  func.func @transform_17(%arg0: i32) -> (i32, i32, i32) {
    %c0_i32 = arith.constant 0 : i32
    %c0_i32_0 = arith.constant 0 : i32
    %c0_i32_1 = arith.constant 0 : i32
    %c0_i32_2 = arith.constant 0 : i32
    return %c0_i32, %c0_i32_0, %c0_i32_1 : i32, i32, i32
  }
  func.func @transform_18(%arg0: i32) -> (i32, i32) {
    %c0_i32 = arith.constant 0 : i32
    %c0_i32_0 = arith.constant 0 : i32
    %c0_i32_1 = arith.constant 0 : i32
    return %c0_i32, %c0_i32_0 : i32, i32
  }
  func.func @transform_19(%arg0: i32) -> (i32, i32) {
    %c0_i32 = arith.constant 0 : i32
    %c0_i32_0 = arith.constant 0 : i32
    %c0_i32_1 = arith.constant 0 : i32
    return %c0_i32, %c0_i32_0 : i32, i32
  }
  func.func @transform_20(%arg0: i32) -> (i32, i32, i32) {
    %c0_i32 = arith.constant 0 : i32
    %c0_i32_0 = arith.constant 0 : i32
    %c0_i32_1 = arith.constant 0 : i32
    return %arg0, %c0_i32, %c0_i32_0 : i32, i32, i32
  }
}

</mosaic_0001>

<bundles_post_ra>
// kernel: tpu_custom_call.1
= control target key start
LH: loop header
LB: loop body
LE: loop exit
PB: predicated region body
PF: predicated region fallthrough
CT: control target
= control target key end

     0   :  { %s6731_s0 = inlined_call_operand.vmem [shape: f32[2,17,64], index: 0, kind: input, shape index: {}]   ;;  %s6732_s1 = inlined_call_operand.vmem [shape: f32[17,32], index: 1, kind: input, shape index: {}]   ;;  %s6733_s2 = inlined_call_operand.vmem [shape: f32[4,1,32], index: 2, kind: input, shape index: {}]   ;;  %s6734_s3 = inlined_call_operand.vmem [shape: f32[64,32], index: 3, kind: input, shape index: {}]   ;;  %s6735_s4 = inlined_call_operand.vmem [shape: f32[2,1,32], index: 4, kind: input, shape index: {}]   ;;  %s6736_s5 = inlined_call_operand.vmem [shape: f32[2,1,32], index: 5, kind: input, shape index: {}]   ;;  %s6737_s6 = inlined_call_operand.vmem [shape: f32[2,32,32], index: 6, kind: input, shape index: {}]   ;;  %s6738_s7 = inlined_call_operand.vmem [shape: f32[2,1,32], index: 7, kind: input, shape index: {}]   ;;  %s6739_s8 = inlined_call_operand.vmem [shape: f32[2,32,32], index: 8, kind: input, shape index: {}]   ;;  %s6740_s9 = inlined_call_operand.vmem [shape: f32[2,1,32], index: 9, kind: input, shape index: {}]   ;;  %s6741_s10 = inlined_call_operand.vmem [shape: f32[2,32,32], index: 10, kind: input, shape index: {}]   ;;  %s6742_s11 = inlined_call_operand.vmem [shape: f32[2,1,32], index: 11, kind: input, shape index: {}]   ;;  %s6743_s12 = inlined_call_operand.vmem [shape: f32[2,1,32], index: 12, kind: input, shape index: {}]   ;;  %s6744_s13 = inlined_call_operand.vmem [shape: f32[2,1,32], index: 13, kind: input, shape index: {}]   ;;  %s6745_s14 = inlined_call_operand.vmem [shape: f32[2,32,128], index: 14, kind: input, shape index: {}]   ;;  %s6746_s15 = inlined_call_operand.vmem [shape: f32[2,1,128], index: 15, kind: input, shape index: {}]   ;;  %s6747_s16 = inlined_call_operand.vmem [shape: f32[2,128,32], index: 16, kind: input, shape index: {}]   ;;  %s6748_s17 = inlined_call_operand.vmem [shape: f32[2,1,32], index: 17, kind: input, shape index: {}]   ;;  %s6749_s18 = inlined_call_operand.vmem [shape: f32[32,128], index: 18, kind: input, shape index: {}]   ;;  %s6750_s19 = inlined_call_operand.vmem [shape: f32[1,128], index: 19, kind: input, shape index: {}]   ;;  %s6751_s20 = inlined_call_operand.hbm [shape: f32[2,1,128], index: 20, kind: output, shape index: {}]  }
   0x1   :  { %6763 = sst [smem:[#allocation10_spill]] %s6731_s0 }
   0x2   :  { %6764 = sst [smem:[#allocation11_spill]] %s6732_s1 }
   0x3   :  { %6765 = sst [smem:[#allocation12_spill]] %s6733_s2 }
   0x4   :  { %6766 = sst [smem:[#allocation13_spill]] %s6734_s3 }
   0x5   :  { %6767 = sst [smem:[#allocation14_spill]] %s6735_s4 }
   0x6   :  { %6768 = sst [smem:[#allocation15_spill]] %s6736_s5 }
   0x7   :  { %6769 = sst [smem:[#allocation16_spill]] %s6737_s6 }
   0x8   :  { %25 = vsyncpa [#allocation3], 0 }
   0x9   :  { %27 = vsyncpa [#allocation3 + $0x1], 0  ;;  %s5562_s1 = smov 0   ;;  %s5564_s22 = smov 0  }
   0xa   :  { %s5566_s23 = smov 0   ;;  %s5568_s24 = smov 0  }
   0xb LB: > { %6770 = sst [smem:[#allocation5_spill]] %s5438_s1  ;;  %s5583_s2 = sadd.s32 4294967295, %s5450_s24   ;;  %s5450_s24 = sphi %s5568_s24, %s6789_s24   ;;  %s5446_s23 = sphi %s5566_s23, %s6791_s23   ;;  %s5442_s22 = sphi %s5564_s22, %s6793_s22   ;;  %s5438_s1 = sphi %s5562_s1, %s6792_s1  }
   0xc   : > { %6771 = sst [smem:[#allocation6_spill]] %s5446_s23  ;;  %s4143_s25 = sadd.s32 4294967294, %s5450_s24  }
   0xd   : > { %s5587_s3 = sadd.s32 1, %s5450_s24   ;;  %s465_s26 = sadd.s32 1, %s5446_s23 }
   0xe   : > { %6772 = sst [smem:[#allocation7_spill]] %s5587_s3  ;;  %s462_s27 = ssub.s32 %s5450_s24, %s5587_s3 }
   0xf   : > { %p475_p0 = scmp.ne.s32.totalorder %s5446_s23, %s5442_s22  ;;  %p463_p1 = scmp.eq.s32.totalorder %s462_s27, 0 }
  0x10   : > { %p476_p2 = scmp.eq.s32.totalorder %s5583_s2, 1  ;;  %p481_p3 = scmp.ne.s32.totalorder %s5442_s22, %s5438_s1 }
  0x11   : > { %p482_p4 = scmp.eq.s32.totalorder %s4143_s25, 1  ;;  %p4146_p7 = scmp.ge.s32.totalorder %s5450_s24, 1 }
  0x12   : > { %s5598_s28 = scalar_select %p463_p1, %s5446_s23, %s465_s26  }
  0x13   : > { %p5600_p5 = por %p476_p2, %p475_p0  ;;  %p5604_p6 = por %p482_p4, %p481_p3 }
  0x14   : > { %6773 = sst [smem:[#allocation8_spill]] %s5598_s28  ;;  %p565_p8 = scmp.lt.s32.totalorder %s5450_s24, 3 }
  0x15   : > { %s6775_s29 = scalar_select %p5604_p6, 1, 0 }
  0x16   : > { %p566_p9 = pnand %p4146_p7, %p565_p8 }
  0x17   : > { %6776 = sst [smem:[#allocation9_spill]] %s6775_s29  ;;  %v5452_v3 = vmov (!%p566_p9), 0.0|0.0   ;;  %vm5453_vm0 = vmmov (!%p566_p9), 0   ;;  %v5454_v6 = vmov (!%p566_p9), 0.0   ;;  %p622_p10 = scmp.lt.s32.totalorder (!%p566_p9), %s5583_s2, 1  ;;  %vm645_vm1 = vcmask (!%p566_p9), 523264  }
  0x18   : > { %569 = sbr.rel (%p566_p9) target bundleno = 5057 (0x13c1), region = 100  ;;  %s6777_s21 = sld [smem:[#allocation13_spill]] (!%p566_p9)  ;;  %5022 = vmatprep.subr.bf16.mxu0 (!%p566_p9), %v5452_v3  ;;  %4544 = vmatprep.mubr.msk.f32.mxu0 (!%p566_p9), %vm5453_vm0, %v5454_v6  ;;  %vm737_vm2 = vcmask (!%p566_p9), 261120   ;;  %vm744_vm3 = vcmask (!%p566_p9), 253952   ;;  %v897_v49 = vld [vmem:[%s6739_s8] sm:$0xff] (!%p566_p9)  ;;  %v898_v51 = vld [vmem:[%s6739_s8 + $0x8] sm:$0xff] (!%p566_p9) }
  0x19   : > { %5040 = vmatprep.subr.bf16.mxu1 (!%p566_p9), %v5452_v3  ;;  %4578 = vmatprep.mubr.msk.f32.mxu1 (!%p566_p9), %vm5453_vm0, %v5454_v6  ;;  %s6778_s23 = sld [smem:[#allocation10_spill]] (!%p566_p9)  ;;  %s6780_s6 = sld [smem:[#allocation16_spill]] (!%p566_p9)  ;;  %v5041_v52 = vpack.c.bf16 (!%p566_p9), %v898_v51, %v897_v49  ;;  %v899_v55 = vld [vmem:[%s6739_s8 + $0x10] sm:$0xff] (!%p566_p9)  ;;  %v900_v57 = vld [vmem:[%s6739_s8 + $0x18] sm:$0xff] (!%p566_p9)  ;;  %vm5765_vm4 = vmpackc.low (!%p566_p9), %vm737_vm2, %vm737_vm2  ;;  %vm1638_vm5 = vcmask (!%p566_p9), 1040384   ;;  %vm1495_vm6 = vcmask (!%p566_p9), 138240  }
  0x1a   : > { %v5044_v58 = vpack.c.bf16 (!%p566_p9), %v900_v57, %v899_v55  ;;  %s6781_s30 = sld [smem:[#allocation14_spill]] (!%p566_p9)  ;;  %s6782_s5 = sld [smem:[#allocation15_spill]] (!%p566_p9)  ;;  %vm1502_vm7 = vcmask (!%p566_p9), 131072  }
  0x1b   : > { %5042 = vmatpush3.bf16.msra.mxu1 (!%p566_p9), %v5041_v52 }
  0x1c   : > { %5043 = vmatprep.subr.bf16.mxu1 (!%p566_p9), %v5452_v3 }
  0x1e   : > { %v634_v0 = vld [vmem:[%s6777_s21] sm:$0xff] (!%p566_p9)  ;;  %v635_v1 = vld [vmem:[%s6777_s21 + $0x8] sm:$0xff] (!%p566_p9)  ;;  %v636_v2 = vld [vmem:[%s6777_s21 + $0x10] sm:$0xff] (!%p566_p9) }
  0x1f   : > { %v5023_v4 = vpack.c.bf16 %v635_v1, %v634_v0  ;;  %v637_v5 = vld [vmem:[%s6777_s21 + $0x18] sm:$0xff]  ;;  %v638_v8 = vld [vmem:[%s6777_s21 + $0x20] sm:$0xff]  ;;  %v639_v9 = vld [vmem:[%s6777_s21 + $0x28] sm:$0xff]  ;;  %s623_s0 = scalar_select %p622_p10, %s5583_s2, 1  ;;  %5045 = vmatpush3.bf16.msra.mxu1 %v5044_v58 }
  0x20   : > { %v5026_v7 = vpack.c.bf16 %v637_v5, %v636_v2  ;;  %v5029_v10 = vpack.c.bf16 %v639_v9, %v638_v8  ;;  %v640_v11 = vld [vmem:[%s6777_s21 + $0x30] sm:$0xff]  ;;  %v641_v12 = vld [vmem:[%s6777_s21 + $0x38] sm:$0xff]  ;;  %v797_v47 = vld [vmem:[%s6780_s6] sm:$0xff]  ;;  %5052 = vmatprep.subr.bf16.mxu1 %v5452_v3 }
  0x21   : > { %5024 = vmatpush3.bf16.msra.mxu0 %v5023_v4  ;;  %s5192_s1 = smul.u32 24, %s623_s0  ;;  %v5032_v13 = vpack.c.bf16 %v641_v12, %v640_v11  ;;  %s6779_s0 = sld [smem:[#allocation11_spill]]  ;;  %v798_v48 = vld [vmem:[%s6780_s6 + $0x8] sm:$0xff]  ;;  %v799_v53 = vld [vmem:[%s6780_s6 + $0x10] sm:$0xff]  ;;  %v800_v54 = vld [vmem:[%s6780_s6 + $0x18] sm:$0xff] }
  0x22   : > { %5025 = vmatprep.subr.bf16.mxu0 %v5452_v3  ;;  %v5035_v50 = vpack.c.bf16 %v798_v48, %v797_v47  ;;  %v5038_v56 = vpack.c.bf16 %v800_v54, %v799_v53  ;;  %v4152_v9 = vld [vmem:[%s6782_s5] ss:$0 sm:$0xff]  ;;  %v989_v11 = vld [vmem:[%s6741_s10 + $0x8] sm:$0xff] }
  0x23   : > { %s626_s3 = scalar_lea.vmem %s6778_s23, %s5192_s1  ;;  %v5776_v48 = vld [vmem:[%s6742_s11] ss:$0 sm:$0xff]  ;;  %s6785_s23 = sld [smem:[#allocation12_spill]] }
  0x24   : > { %v631_v14 = vld [vmem:[%s626_s3] sm:$0xff]  ;;  %v632_v15 = vld [vmem:[%s626_s3 + $0x8] sm:$0xff]  ;;  %v633_v16 = vld [vmem:[%s626_s3 + $0x10] sm:$0x1]  ;;  %s620_s3 = sand.u32 1, %s5442_s22  }
  0x25   : > { %5027 = vmatpush3.bf16.msra.mxu0 %v5026_v7  ;;  %v4151_v7 = vld [vmem:[%s6781_s30] ss:$0 sm:$0xff]  ;;  %s621_s1 = scalar_lea.vmem [#allocation2], %s620_s3  ;;  %s4076_s28 = scalar_lea.sflag [#allocation3], %s620_s3 }
  0x26   : > { %5028 = vmatprep.subr.bf16.mxu0 %v5452_v3  ;;  %s4088_s29 = sshll.u32 %s621_s1, 4  ;;  %s6691_s29 = int_to_ptr.vmem [resolvable:$true] %s4088_s29 }
  0x27   : > { %v642_v17 = vld [vmem:[%s6779_s0] sm:$0xff]  ;;  %v643_v21 = vld [vmem:[%s6779_s0 + $0x8] sm:$0xff]  ;;  %v644_v26 = vld [vmem:[%s6779_s0 + $0x10] sm:$0x1] }
  0x29   : > { %5030 = vmatpush3.bf16.msra.mxu0 %v5029_v10  ;;  %v988_v10 = vld [vmem:[%s6741_s10] sm:$0xff]  ;;  %s6786_s0 = smov %s6785_s23 }
  0x2a   : > { %5031 = vmatprep.subr.bf16.mxu0 %v5452_v3  ;;  %v5783_v52 = vld [vmem:[%s6785_s23] ss:$0 sm:$0xff]  ;;  %v5788_v53 = vld [vmem:[%s6786_s0 + $0x1] ss:$0 sm:$0xff]  ;;  %s5388_s23 = scalar_lea.vmem %s6691_s29, 16 }
  0x2b   : > { %p5389_p11 = scmp.ne.s32.totalorder %s6691_s29, %s5388_s23 }
  0x2d   : > { %5033 = vmatpush3.bf16.msra.mxu0 %v5032_v13  ;;  %p5390_p12 = pnand %p5389_p11, %p5600_p5 }
  0x2e   : > { %5034 = vmatprep.subr.bf16.mxu0 %v5452_v3 }
  0x2f   : > { %p5391_p13 = pneg %p5390_p12 }
  0x30   : > { %4545 = vmatmul.mubr.msk.f32.vlgmr.msra.gmra.mrb[0].mxu0 %vm645_vm1, %v631_v14 }
  0x31   : > { %4547 = vmatprep.mubr.msk.f32.mxu0 %vm5453_vm0, %v5454_v6  ;;  %5036 = vmatpush3.bf16.msra.mxu0 %v5035_v50 }
  0x32   : > { %5037 = vmatprep.subr.bf16.mxu0 %v5452_v3 }
  0x34   : > { %4548 = vmatmul.mubr.msk.f32.gmra.mrb[2].mxu0 %vm645_vm1, %v632_v15 }
  0x35   : > { %4550 = vmatprep.mubr.msk.f32.mxu0 %vm5453_vm0, %v5454_v6  ;;  %5039 = vmatpush3.bf16.msra.mxu0 %v5038_v56 }
  0x36   : > { %5046 = vmatprep.subr.bf16.mxu0 %v5452_v3 }
  0x38   : > { %4551 = vmatmul.mubr.msk.f32.gmra.mrb[4].mxu0 %vm645_vm1, %v633_v16  ;;  %v5047_v16 = vpack.c.bf16 %v989_v11, %v988_v10 }
  0x39   : > { %4561 = vmatprep.mubr.msk.f32.mxu0 %vm5453_vm0, %v5454_v6 }
 0x103   : > { %v721_v18 = vpop.f32.mrb[0].mxu0 }
 0x104   : > { %v5658_v19 = vadd.f32 %v721_v18, %v642_v17  ;;  %v4546_v20 = vpop.f32.mrb[1].mxu0  ;;  %v990_v17 = vld [vmem:[%s6741_s10 + $0x10] sm:$0xff]  ;;  %v991_v18 = vld [vmem:[%s6741_s10 + $0x18] sm:$0xff] }
 0x106   : > { %v738_v22 = vsel %vm737_vm2, %v5658_v19, 0.0 }
 0x107   : > { %739 = vadd.xlane.f32.xlu0 %v738_v22  ;;  %v726_v23 = vpop.f32.mrb[2].mxu0 }
 0x108   : > { %v5665_v24 = vadd.f32 %v726_v23, %v643_v21  ;;  %v4549_v25 = vpop.f32.mrb[3].mxu0 }
 0x109   : > { %v5050_v25 = vpack.c.bf16 %v991_v18, %v990_v17 }
 0x10a   : > { %v741_v27 = vsel %vm737_vm2, %v5665_v24, 0.0 }
 0x10b   : > { %742 = vadd.xlane.f32.xlu0 %v741_v27  ;;  %v731_v28 = vpop.f32.mrb[4].mxu0 }
 0x10c   : > { %v5672_v29 = vadd.f32 %v731_v28, %v644_v26  ;;  %v4552_v30 = vpop.f32.mrb[5].mxu0 }
 0x10e   : > { %v745_v31 = vsel %vm744_vm3, %v5672_v29, 0.0 }
 0x10f   : > { %746 = vadd.xlane.f32.xlu1 %v745_v31 }
 0x194   : > { %v740_v32 = vpop.xlane.xlu0 %739 }
 0x195   : > { %v749_v33 = vmul.f32 0.03125, %v740_v32 }
 0x197   : > { %v752_v34 = vsub.f32 %v5658_v19, %v749_v33  ;;  %v4157_v33 = vld [vmem:[%s6740_s9] ss:$0 sm:$0xff] }
 0x198   : > { %v743_v35 = vpop.xlane.xlu0 %742 }
 0x199   : > { %v750_v36 = vmul.f32 0.03125, %v743_v35  ;;  %v755_v37 = vmul.f32 %v752_v34, %v752_v34 }
 0x19b   : > { %v753_v38 = vsub.f32 %v5665_v24, %v750_v36  ;;  %v758_v39 = vsel %vm737_vm2, %v755_v37, 0.0 }
 0x19c   : > { %759 = vadd.xlane.f32.xlu1 %v758_v39  ;;  %v747_v40 = vpop.xlane.xlu1 %746 }
 0x19d   : > { %v751_v41 = vmul.f32 0.03125, %v747_v40  ;;  %v756_v42 = vmul.f32 %v753_v38, %v753_v38 }
 0x19f   : > { %v754_v43 = vsub.f32 %v5672_v29, %v751_v41  ;;  %v761_v44 = vsel %vm737_vm2, %v756_v42, 0.0 }
 0x1a0   : > { %762 = vadd.xlane.f32.xlu0 %v761_v44 }
 0x1a1   : > { %v757_v45 = vmul.f32 %v754_v43, %v754_v43 }
 0x1a3   : > { %v764_v46 = vsel %vm744_vm3, %v757_v45, 0.0 }
 0x1a4   : > { %765 = vadd.xlane.f32.xlu1 %v764_v46 }
 0x229   : > { %v760_v59 = vpop.xlane.xlu1 %759 }
 0x22a   : > { %v767_v60 = vmul.f32 0.03125, %v760_v59 }
 0x22c   : > { %v770_v61 = vadd.f32 1e-05, %v767_v60 }
 0x22d   : > { %v763_v62 = vpop.xlane.xlu0 %762 }
 0x22e   : > { %5236 = vrsqrt.f32 %v770_v61  ;;  %v768_v63 = vmul.f32 0.03125, %v763_v62  ;;  %v5797_v62 = vld [vmem:[%s6786_s0 + $0x2] ss:$0 sm:$0xff] }
 0x230   : > { %v771_v0 = vadd.f32 1e-05, %v768_v63  ;;  %v5802_v63 = vld [vmem:[%s6786_s0 + $0x3] ss:$0 sm:$0xff] }
 0x231   : > { %v766_v1 = vpop.xlane.xlu1 %765 }
 0x232   : > { %5238 = vrsqrt.f32 %v771_v0  ;;  %v769_v2 = vmul.f32 0.03125, %v766_v1 }
 0x234   : > { %v772_v4 = vadd.f32 1e-05, %v769_v2 }
 0x236   : > { %5240 = vrsqrt.f32 %v772_v4 }
 0x238   : > { %v5237_v5 = vpop.eup %5236 }
 0x239   : > { %v776_v8 = vmul.f32 %v5237_v5, %v752_v34 }
 0x23b   : > { %v785_v12 = vmul.f32 %v4151_v7, %v776_v8 }
 0x23c   : > { %v5239_v13 = vpop.eup %5238 }
 0x23d   : > { %v794_v14 = vadd.f32 %v4152_v9, %v785_v12  ;;  %v777_v15 = vmul.f32 %v5239_v13, %v753_v38  ;;  %v4153_v38 = vld [vmem:[%s6738_s7] ss:$0 sm:$0xff] }
 0x23f   : > { %4562 = vmatmul.mubr.msk.f32.vlgmr.msra.gmra.mrb[6].mxu0 %vm737_vm2, %v794_v14  ;;  %4579 = vmatmul.mubr.msk.f32.vlgmr.msra.gmra.mrb[0].mxu1 %vm737_vm2, %v794_v14  ;;  %v786_v20 = vmul.f32 %v4151_v7, %v777_v15 }
 0x240   : > { %v5241_v21 = vpop.eup %5240  ;;  %4564 = vmatprep.mubr.msk.f32.mxu0 %vm5453_vm0, %v5454_v6  ;;  %4581 = vmatprep.mubr.msk.f32.mxu1 %vm5453_vm0, %v5454_v6 }
 0x241   : > { %v795_v22 = vadd.f32 %v4152_v9, %v786_v20  ;;  %5048 = vmatpush3.bf16.msra.mxu0 %v5047_v16  ;;  %v778_v23 = vmul.f32 %v5241_v21, %v754_v43 }
 0x242   : > { %5049 = vmatprep.subr.bf16.mxu0 %v5452_v3 }
 0x243   : > { %4565 = vmatmul.mubr.msk.f32.gmra.mrb[8].mxu0 %vm737_vm2, %v795_v22  ;;  %4582 = vmatmul.mubr.msk.f32.gmra.mrb[2].mxu1 %vm737_vm2, %v795_v22  ;;  %v787_v26 = vmul.f32 %v4151_v7, %v778_v23 }
 0x244   : > { %4567 = vmatprep.mubr.msk.f32.mxu0 %vm5453_vm0, %v5454_v6  ;;  %4584 = vmatprep.mubr.msk.f32.mxu1 %vm5453_vm0, %v5454_v6 }
 0x245   : > { %v796_v27 = vadd.f32 %v4152_v9, %v787_v26  ;;  %5051 = vmatpush3.bf16.msra.mxu0 %v5050_v25 }
 0x246   : > { %5056 = vmatprep.subr.bf16.mxu0 %v5452_v3 }
 0x247   : > { %4568 = vmatmul.mubr.msk.f32.gmra.mrb[10].mxu0 %vm737_vm2, %v796_v27  ;;  %4585 = vmatmul.mubr.msk.f32.gmra.mrb[4].mxu1 %vm737_vm2, %v796_v27 }
 0x248   : > { %4595 = vmatprep.mubr.msk.f32.mxu0 %vm5453_vm0, %v5454_v6  ;;  %4610 = vmatprep.mubr.msk.f32.mxu1 %vm5453_vm0, %v5454_v6 }
 0x24b   : > { %4596 = vmatmul.mubr.msk.f32.vlgmr.msra.gmra.mrb[12].mxu0 %vm737_vm2, %v794_v14 }
 0x24c   : > { %4598 = vmatprep.mubr.msk.f32.mxu0 %vm5453_vm0, %v5454_v6 }
 0x24f   : > { %4599 = vmatmul.mubr.msk.f32.gmra.mrb[14].mxu0 %vm737_vm2, %v795_v22 }
 0x250   : > { %4601 = vmatprep.mubr.msk.f32.mxu0 %vm5453_vm0, %v5454_v6 }
 0x253   : > { %4602 = vmatmul.mubr.msk.f32.gmra.mrb[16].mxu0 %vm737_vm2, %v796_v27 }
 0x254   : > { %4625 = vmatprep.mubr.msk.f32.mxu0 %vm5453_vm0, %v5454_v6 }
 0x312   : > { %v883_v28 = vpop.f32.mrb[6].mxu0  ;;  %v974_v30 = vpop.f32.mrb[0].mxu1 }
 0x313   : > { %v4563_v31 = vpop.f32.mrb[7].mxu0  ;;  %v4580_v32 = vpop.f32.mrb[1].mxu1  ;;  %v975_v39 = vadd.f32 %v4157_v33, %v974_v30  ;;  %v884_v45 = vadd.f32 %v4153_v38, %v883_v28 }
 0x315   : > { %v1079_v50 = vmul.f32 0.35355338, %v884_v45 }
 0x316   : > { %v888_v34 = vpop.f32.mrb[8].mxu0  ;;  %v979_v35 = vpop.f32.mrb[2].mxu1 }
 0x317   : > { %v4566_v36 = vpop.f32.mrb[9].mxu0  ;;  %v4583_v37 = vpop.f32.mrb[3].mxu1  ;;  %v980_v40 = vadd.f32 %v4157_v33, %v979_v35  ;;  %v889_v54 = vadd.f32 %v4153_v38, %v888_v34  ;;  %v1106_v58 = vmul.f32 %v5783_v52, %v1079_v50  ;;  %v1109_v59 = vmul.f32 %v5788_v53, %v1079_v50 }
 0x318   : > { %v1112_v25 = vmul.f32 %v5797_v62, %v1079_v50  ;;  %v1115_v26 = vmul.f32 %v5802_v63, %v1079_v50 }
 0x319   : > { %v5053_v42 = vpack.c.bf16 %v980_v40, %v975_v39  ;;  %v1080_v0 = vmul.f32 0.35355338, %v889_v54 }
 0x31a   : > { %v893_v43 = vpop.f32.mrb[10].mxu0  ;;  %v984_v44 = vpop.f32.mrb[4].mxu1 }
 0x31b   : > { %v4569_v46 = vpop.f32.mrb[11].mxu0  ;;  %v4586_v47 = vpop.f32.mrb[5].mxu1  ;;  %5055 = vmatpush3.bf16.xpose.msk.msra.mxu1 %vm5765_vm4, %v5053_v42  ;;  %5059 = vmatpush3.bf16.xpose.msk.msra.mxu0 %vm5765_vm4, %v5053_v42  ;;  %v985_v56 = vadd.f32 %v4157_v33, %v984_v44  ;;  %v894_v1 = vadd.f32 %v4153_v38, %v893_v43  ;;  %v1107_v20 = vmul.f32 %v5783_v52, %v1080_v0 }
 0x31c   : > { %4608 = vmatprep.subr.mxu1 %v5454_v6  ;;  %4623 = vmatprep.subr.mxu0 %v5454_v6  ;;  %v1110_v21 = vmul.f32 %v5788_v53, %v1080_v0  ;;  %v1113_v28 = vmul.f32 %v5797_v62, %v1080_v0  ;;  %v1116_v30 = vmul.f32 %v5802_v63, %v1080_v0 }
 0x31d   : > { %v1081_v18 = vmul.f32 0.35355338, %v894_v1 }
 0x31e   : > { %v1065_v49 = vpop.f32.mrb[12].mxu0 }
 0x31f   : > { %v4597_v51 = vpop.f32.mrb[13].mxu0  ;;  %v1066_v55 = vadd.f32 %v5776_v48, %v1065_v49  ;;  %v1108_v22 = vmul.f32 %v5783_v52, %v1081_v18  ;;  %v1111_v23 = vmul.f32 %v5788_v53, %v1081_v18  ;;  %v1114_v33 = vmul.f32 %v5797_v62, %v1081_v18 }
 0x320   : > { %v1117_v34 = vmul.f32 %v5802_v63, %v1081_v18 }
 0x321   : > { %v1118_v2 = vmul.f32 %v5783_v52, %v1066_v55  ;;  %v1121_v4 = vmul.f32 %v5788_v53, %v1066_v55  ;;  %v5818_v10 = vmul.f32 %v5797_v62, %v1066_v55  ;;  %v5821_v11 = vmul.f32 %v5802_v63, %v1066_v55 }
 0x322   : > { %v1070_v57 = vpop.f32.mrb[14].mxu0 }
 0x323   : > { %v1071_v60 = vadd.f32 %v5776_v48, %v1070_v57  ;;  %v4600_v61 = vpop.f32.mrb[15].mxu0  ;;  %4609 = vmatpush3.xpose.msk.msra.mxu1 %vm737_vm2, %v985_v56  ;;  %4624 = vmatpush3.xpose.msk.msra.mxu0 %vm737_vm2, %v985_v56 }
 0x324   : > { %5060 = vmatprep.subr.bf16.mxu1 %v5452_v3  ;;  %5064 = vmatprep.subr.bf16.mxu0 %v5452_v3 }
 0x325   : > { %v1119_v5 = vmul.f32 %v5783_v52, %v1071_v60  ;;  %v1122_v7 = vmul.f32 %v5788_v53, %v1071_v60  ;;  %v5811_v8 = vmul.f32 %v5797_v62, %v1071_v60  ;;  %v5814_v9 = vmul.f32 %v5802_v63, %v1071_v60 }
 0x326   : > { %v1075_v12 = vpop.f32.mrb[16].mxu0  ;;  %4611 = vmatmul.mubr.msk.f32.vlgmr.msra.gmra.mrb[6].mxu1 %vm737_vm2, %v1106_v58  ;;  %4626 = vmatmul.mubr.msk.f32.vlgmr.msra.gmra.mrb[18].mxu0 %vm737_vm2, %v1109_v59 }
 0x327   : > { %v4603_v13 = vpop.f32.mrb[17].mxu0  ;;  %v5069_v14 = vpack.c.bf16 %v1119_v5, %v1118_v2  ;;  %v5072_v15 = vpack.c.bf16 %v1122_v7, %v1121_v4  ;;  %5063 = vmatpush3.bf16.xpose.msk.msra.mxu1 %vm5765_vm4, %v5053_v42  ;;  %5067 = vmatpush3.bf16.xpose.msk.msra.mxu0 %vm5765_vm4, %v5053_v42  ;;  %v5075_v16 = vpack.c.bf16 %v5811_v8, %v5818_v10 }
 0x328   : > { %v5078_v17 = vpack.c.bf16 %v5814_v9, %v5821_v11  ;;  %4613 = vmatprep.mubr.msk.f32.mxu1 %vm5453_vm0, %v5454_v6  ;;  %4628 = vmatprep.mubr.msk.f32.mxu0 %vm5453_vm0, %v5454_v6  ;;  %v5861_v27 = vadd.f32 %v5776_v48, %v1075_v12 }
 0x329   : > { %4638 = vmatprep.subr.mxu1 %v5454_v6  ;;  %4653 = vmatprep.subr.mxu0 %v5454_v6 }
 0x32a   : > { %4614 = vmatmul.mubr.msk.f32.gmra.mrb[8].mxu1 %vm737_vm2, %v1107_v20  ;;  %4629 = vmatmul.mubr.msk.f32.gmra.mrb[20].mxu0 %vm737_vm2, %v1110_v21  ;;  %v1120_v31 = vmul.f32 %v5783_v52, %v5861_v27  ;;  %v1123_v32 = vmul.f32 %v5788_v53, %v5861_v27  ;;  %v1129_v9 = vmul.f32 %v5802_v63, %v5861_v27 }
 0x32b   : > { %4616 = vmatprep.mubr.msk.f32.mxu1 %vm5453_vm0, %v5454_v6  ;;  %4631 = vmatprep.mubr.msk.f32.mxu0 %vm5453_vm0, %v5454_v6 }
 0x32e   : > { %4617 = vmatmul.mubr.msk.f32.gmra.mrb[10].mxu1 %vm737_vm2, %v1108_v22  ;;  %4632 = vmatmul.mubr.msk.f32.gmra.mrb[22].mxu0 %vm737_vm2, %v1111_v23 }
 0x32f   : > { %4639 = vmatpush3.xpose.msk.msra.mxu1 %vm737_vm2, %v985_v56  ;;  %4654 = vmatpush3.xpose.msk.msra.mxu0 %vm737_vm2, %v985_v56 }
 0x330   : > { %4640 = vmatprep.mubr.msk.f32.mxu1 %vm5453_vm0, %v5454_v6  ;;  %4655 = vmatprep.mubr.msk.f32.mxu0 %vm5453_vm0, %v5454_v6 }
 0x331   : > { %5068 = vmatprep.subr.bf16.mxu1 %v5452_v3  ;;  %5071 = vmatprep.subr.bf16.mxu0 %v5452_v3 }
 0x332   : > { %4641 = vmatmul.mubr.msk.f32.vlgmr.msra.gmra.mrb[12].mxu1 %vm737_vm2, %v1112_v25  ;;  %4656 = vmatmul.mubr.msk.f32.vlgmr.msra.gmra.mrb[24].mxu0 %vm737_vm2, %v1115_v26 }
 0x333   : > { %5070 = vmatpush3.bf16.msra.mxu1 %v5069_v14  ;;  %5073 = vmatpush3.bf16.msra.mxu0 %v5072_v15 }
 0x334   : > { %4643 = vmatprep.mubr.msk.f32.mxu1 %vm5453_vm0, %v5454_v6  ;;  %4658 = vmatprep.mubr.msk.f32.mxu0 %vm5453_vm0, %v5454_v6 }
 0x335   : > { %4668 = vmatprep.subr.mxu1 %v5454_v6  ;;  %4683 = vmatprep.subr.mxu0 %v5454_v6 }
 0x336   : > { %4644 = vmatmul.mubr.msk.f32.gmra.mrb[14].mxu1 %vm737_vm2, %v1113_v28  ;;  %4659 = vmatmul.mubr.msk.f32.gmra.mrb[26].mxu0 %vm737_vm2, %v1116_v30 }
 0x337   : > { %4669 = vmatpush3.msk.msra.mxu1 %vm1638_vm5, %v1120_v31  ;;  %4684 = vmatpush3.msk.msra.mxu0 %vm1638_vm5, %v1123_v32 }
 0x338   : > { %4646 = vmatprep.mubr.msk.f32.mxu1 %vm5453_vm0, %v5454_v6  ;;  %4661 = vmatprep.mubr.msk.f32.mxu0 %vm5453_vm0, %v5454_v6 }
 0x339   : > { %5074 = vmatprep.subr.bf16.mxu1 %v5452_v3  ;;  %5077 = vmatprep.subr.bf16.mxu0 %v5452_v3 }
 0x33a   : > { %4647 = vmatmul.mubr.msk.f32.gmra.mrb[16].mxu1 %vm737_vm2, %v1114_v33  ;;  %4662 = vmatmul.mubr.msk.f32.gmra.mrb[28].mxu0 %vm737_vm2, %v1117_v34 }
 0x33b   : > { %4670 = vmatprep.mubr.msk.f32.mxu1 %vm5453_vm0, %v5454_v6  ;;  %4685 = vmatprep.mubr.msk.f32.mxu0 %vm5453_vm0, %v5454_v6 }
 0x3f9   : > { %v1214_v35 = vpop.f32.mrb[6].mxu1  ;;  %v1303_v36 = vpop.f32.mrb[18].mxu0 }
 0x3fa   : > { %v4612_v37 = vpop.f32.mrb[7].mxu1  ;;  %v4627_v38 = vpop.f32.mrb[19].mxu0  ;;  %v1496_v39 = vsel %vm1495_vm6, %v1214_v35, -inf  ;;  %v1506_v40 = vsel %vm1495_vm6, %v1303_v36, -inf }
 0x3fb   : > { %1497 = vmax.xlane.f32.xlu0 %v1496_v39  ;;  %1507 = vmax.xlane.f32.xlu1 %v1506_v40 }
 0x3fd   : > { %v1219_v42 = vpop.f32.mrb[8].mxu1  ;;  %v1308_v43 = vpop.f32.mrb[20].mxu0 }
 0x3fe   : > { %v4615_v44 = vpop.f32.mrb[9].mxu1  ;;  %v4630_v45 = vpop.f32.mrb[21].mxu0  ;;  %v1499_v46 = vsel %vm1495_vm6, %v1219_v42, -inf  ;;  %v1509_v47 = vsel %vm1495_vm6, %v1308_v43, -inf }
 0x3ff   : > { %1500 = vmax.xlane.f32.xlu0 %v1499_v46  ;;  %1510 = vmax.xlane.f32.xlu1 %v1509_v47 }
 0x401   : > { %v1224_v48 = vpop.f32.mrb[10].mxu1  ;;  %v1313_v49 = vpop.f32.mrb[22].mxu0 }
 0x402   : > { %v4618_v50 = vpop.f32.mrb[11].mxu1  ;;  %v4633_v51 = vpop.f32.mrb[23].mxu0  ;;  %v1503_v52 = vsel %vm1502_vm7, %v1224_v48, -inf  ;;  %v1512_v53 = vsel %vm1502_vm7, %v1313_v49, -inf }
 0x403   : > { %1504 = vmax.xlane.f32.xlu0 %v1503_v52  ;;  %1513 = vmax.xlane.f32.xlu1 %v1512_v53 }
 0x405   : > { %v1392_v54 = vpop.f32.mrb[12].mxu1  ;;  %v1481_v55 = vpop.f32.mrb[24].mxu0 }
 0x406   : > { %v4642_v56 = vpop.f32.mrb[13].mxu1  ;;  %v4657_v57 = vpop.f32.mrb[25].mxu0  ;;  %v1515_v58 = vsel %vm1495_vm6, %v1392_v54, -inf  ;;  %v1524_v59 = vsel %vm1495_vm6, %v1481_v55, -inf }
 0x407   : > { %1516 = vmax.xlane.f32.xlu0 %v1515_v58  ;;  %1525 = vmax.xlane.f32.xlu1 %v1524_v59 }
 0x409   : > { %v1397_v60 = vpop.f32.mrb[14].mxu1  ;;  %v1486_v61 = vpop.f32.mrb[26].mxu0 }
 0x40a   : > { %v4645_v0 = vpop.f32.mrb[15].mxu1  ;;  %v4660_v1 = vpop.f32.mrb[27].mxu0  ;;  %v1518_v2 = vsel %vm1495_vm6, %v1397_v60, -inf  ;;  %v1527_v4 = vsel %vm1495_vm6, %v1486_v61, -inf }
 0x40b   : > { %1519 = vmax.xlane.f32.xlu0 %v1518_v2  ;;  %1528 = vmax.xlane.f32.xlu1 %v1527_v4 }
 0x40d   : > { %v5907_v5 = vpop.f32.mrb[16].mxu1  ;;  %v5909_v7 = vpop.f32.mrb[28].mxu0 }
 0x40e   : > { %v4648_v12 = vpop.f32.mrb[17].mxu1  ;;  %v4663_v13 = vpop.f32.mrb[29].mxu0  ;;  %v1521_v14 = vsel %vm1502_vm7, %v5907_v5, -inf  ;;  %v1530_v15 = vsel %vm1502_vm7, %v5909_v7, -inf }
 0x40f   : > { %1522 = vmax.xlane.f32.xlu0 %v1521_v14  ;;  %1531 = vmax.xlane.f32.xlu1 %v1530_v15 }
 0x488   : > { %v1498_v18 = vpop.xlane.xlu0 %1497  ;;  %v1508_v20 = vpop.xlane.xlu1 %1507 }
 0x489   : > { %v1533_v21 = vsub.f32 %v1214_v35, %v1498_v18  ;;  %v1536_v22 = vsub.f32 %v1303_v36, %v1508_v20 }
 0x48b   : > { %v1545_v23 = vmul.f32 1.442695, %v1533_v21  ;;  %v1551_v25 = vmul.f32 1.442695, %v1536_v22 }
 0x48c   : > { %v1501_v26 = vpop.xlane.xlu0 %1500  ;;  %v1511_v28 = vpop.xlane.xlu1 %1510 }
 0x48d   : > { %5242 = vpow2.f32 %v1545_v23  ;;  %v1534_v30 = vsub.f32 %v1219_v42, %v1501_v26  ;;  %v1537_v31 = vsub.f32 %v1308_v43, %v1511_v28 }
 0x48e   : > { %5244 = vpow2.f32 %v1551_v25 }
 0x48f   : > { %v1547_v32 = vmul.f32 1.442695, %v1534_v30  ;;  %v1553_v33 = vmul.f32 1.442695, %v1537_v31 }
 0x490   : > { %v1505_v34 = vpop.xlane.xlu0 %1504  ;;  %v1514_v37 = vpop.xlane.xlu1 %1513 }
 0x491   : > { %5246 = vpow2.f32 %v1547_v32  ;;  %v1535_v38 = vsub.f32 %v1224_v48, %v1505_v34  ;;  %v1538_v39 = vsub.f32 %v1313_v49, %v1514_v37 }
 0x492   : > { %5248 = vpow2.f32 %v1553_v33 }
 0x493   : > { %v1549_v40 = vmul.f32 1.442695, %v1535_v38  ;;  %v1555_v44 = vmul.f32 1.442695, %v1538_v39 }
 0x494   : > { %v1517_v35 = vpop.xlane.xlu0 %1516  ;;  %v1526_v36 = vpop.xlane.xlu1 %1525 }
 0x495   : > { %5250 = vpow2.f32 %v1549_v40  ;;  %v1539_v45 = vsub.f32 %v1392_v54, %v1517_v35  ;;  %v1542_v46 = vsub.f32 %v1481_v55, %v1526_v36 }
 0x496   : > { %5252 = vpow2.f32 %v1555_v44 }
 0x497   : > { %v5915_v47 = vpop.eup %5242  ;;  %v1557_v42 = vmul.f32 1.442695, %v1539_v45  ;;  %v1563_v43 = vmul.f32 1.442695, %v1542_v46 }
 0x498   : > { %v5917_v50 = vpop.eup %5244  ;;  %v1520_v51 = vpop.xlane.xlu0 %1519  ;;  %v1569_v48 = vsel %vm1495_vm6, %v5915_v47, 0.0 }
 0x499   : > { %v1529_v52 = vpop.xlane.xlu1 %1528  ;;  %5254 = vpow2.f32 %v1557_v42  ;;  %v1540_v49 = vsub.f32 %v1397_v60, %v1520_v51  ;;  %1570 = vadd.xlane.f32.xlu0 %v1569_v48  ;;  %v1578_v54 = vsel %vm1495_vm6, %v5917_v50, 0.0 }
 0x49a   : > { %v1543_v53 = vsub.f32 %v1486_v61, %v1529_v52  ;;  %5256 = vpow2.f32 %v1563_v43  ;;  %1579 = vadd.xlane.f32.xlu1 %v1578_v54  ;;  %v1126_v52 = vmul.f32 %v5797_v62, %v5861_v27 }
 0x49b   : > { %v5923_v55 = vpop.eup %5246  ;;  %v1559_v56 = vmul.f32 1.442695, %v1540_v49 }
 0x49c   : > { %v1565_v57 = vmul.f32 1.442695, %v1543_v53  ;;  %v5925_v58 = vpop.eup %5248  ;;  %v1523_v59 = vpop.xlane.xlu0 %1522  ;;  %v1572_v1 = vsel %vm1495_vm6, %v5923_v55, 0.0 }
 0x49d   : > { %v1532_v0 = vpop.xlane.xlu1 %1531  ;;  %5258 = vpow2.f32 %v1559_v56  ;;  %v1541_v60 = vsub.f32 %v5907_v5, %v1523_v59  ;;  %1573 = vadd.xlane.f32.xlu0 %v1572_v1  ;;  %v1581_v2 = vsel %vm1495_vm6, %v5925_v58, 0.0 }
 0x49e   : > { %v1544_v61 = vsub.f32 %v5909_v7, %v1532_v0  ;;  %5260 = vpow2.f32 %v1565_v57  ;;  %1582 = vadd.xlane.f32.xlu1 %v1581_v2 }
 0x49f   : > { %v5933_v4 = vpop.eup %5250  ;;  %v1561_v12 = vmul.f32 1.442695, %v1541_v60 }
 0x4a0   : > { %v1567_v13 = vmul.f32 1.442695, %v1544_v61  ;;  %v5935_v14 = vpop.eup %5252  ;;  %v1575_v15 = vsel %vm1502_vm7, %v5933_v4, 0.0 }
 0x4a1   : > { %5262 = vpow2.f32 %v1561_v12  ;;  %1576 = vadd.xlane.f32.xlu0 %v1575_v15  ;;  %v1584_v5 = vsel %vm1502_vm7, %v5935_v14, 0.0 }
 0x4a2   : > { %5264 = vpow2.f32 %v1567_v13  ;;  %1585 = vadd.xlane.f32.xlu1 %v1584_v5 }
 0x4a3   : > { %v5941_v7 = vpop.eup %5254 }
 0x4a4   : > { %v5943_v18 = vpop.eup %5256  ;;  %v1587_v20 = vsel %vm1495_vm6, %v5941_v7, 0.0 }
 0x4a5   : > { %1588 = vadd.xlane.f32.xlu0 %v1587_v20  ;;  %v1596_v21 = vsel %vm1495_vm6, %v5943_v18, 0.0 }
 0x4a6   : > { %1597 = vadd.xlane.f32.xlu1 %v1596_v21 }
 0x4a7   : > { %v5949_v22 = vpop.eup %5258 }
 0x4a8   : > { %v5951_v23 = vpop.eup %5260  ;;  %v1590_v25 = vsel %vm1495_vm6, %v5949_v22, 0.0 }
 0x4a9   : > { %1591 = vadd.xlane.f32.xlu0 %v1590_v25  ;;  %v1599_v26 = vsel %vm1495_vm6, %v5951_v23, 0.0 }
 0x4aa   : > { %1600 = vadd.xlane.f32.xlu1 %v1599_v26 }
 0x4ab   : > { %v5957_v28 = vpop.eup %5262 }
 0x4ac   : > { %v5959_v30 = vpop.eup %5264  ;;  %v1593_v31 = vsel %vm1502_vm7, %v5957_v28, 0.0 }
 0x4ad   : > { %1594 = vadd.xlane.f32.xlu0 %v1593_v31  ;;  %v1602_v32 = vsel %vm1502_vm7, %v5959_v30, 0.0 }
 0x4ae   : > { %1603 = vadd.xlane.f32.xlu1 %v1602_v32 }
 0x526   : > { %v1571_v33 = vpop.xlane.xlu0 %1570 }
 0x527   : > { %5266 = vrcp.f32 %v1571_v33  ;;  %v1580_v34 = vpop.xlane.xlu1 %1579 }
 0x528   : > { %5268 = vrcp.f32 %v1580_v34 }
 0x52a   : > { %v1574_v37 = vpop.xlane.xlu0 %1573 }
 0x52b   : > { %5270 = vrcp.f32 %v1574_v37  ;;  %v1583_v38 = vpop.xlane.xlu1 %1582 }
 0x52c   : > { %5272 = vrcp.f32 %v1583_v38 }
 0x52e   : > { %v1577_v39 = vpop.xlane.xlu0 %1576 }
 0x52f   : > { %5274 = vrcp.f32 %v1577_v39  ;;  %v1586_v40 = vpop.xlane.xlu1 %1585 }
 0x530   : > { %5276 = vrcp.f32 %v1586_v40 }
 0x531   : > { %v5267_v44 = vpop.eup %5266 }
 0x532   : > { %v5269_v35 = vpop.eup %5268  ;;  %v1617_v36 = vmul.f32 %v5267_v44, %v5915_v47  ;;  %v1589_v45 = vpop.xlane.xlu0 %1588 }
 0x533   : > { %v1620_v46 = vmul.f32 %v5269_v35, %v5917_v50  ;;  %5278 = vrcp.f32 %v1589_v45  ;;  %v1598_v42 = vpop.xlane.xlu1 %1597 }
 0x534   : > { %5280 = vrcp.f32 %v1598_v42  ;;  %4671 = vmatmul.mubr.msk.f32.vlgmr.msra.gmra.mrb[18].mxu1 %vm1495_vm6, %v1617_v36 }
 0x535   : > { %v5271_v43 = vpop.eup %5270  ;;  %4686 = vmatmul.mubr.msk.f32.vlgmr.msra.gmra.mrb[30].mxu0 %vm1495_vm6, %v1620_v46  ;;  %5076 = vmatpush3.bf16.msra.mxu1 %v5075_v16 }
 0x536   : > { %v5273_v51 = vpop.eup %5272  ;;  %5079 = vmatpush3.bf16.msra.mxu0 %v5078_v17  ;;  %v1592_v47 = vpop.xlane.xlu0 %1591  ;;  %4673 = vmatprep.mubr.msk.f32.mxu1 %vm5453_vm0, %v5454_v6  ;;  %v1618_v50 = vmul.f32 %v5271_v43, %v5923_v55 }
 0x537   : > { %5282 = vrcp.f32 %v1592_v47  ;;  %v1601_v48 = vpop.xlane.xlu1 %1600  ;;  %4688 = vmatprep.mubr.msk.f32.mxu0 %vm5453_vm0, %v5454_v6  ;;  %4698 = vmatprep.subr.mxu1 %v5454_v6  ;;  %v1621_v8 = vmul.f32 %v5273_v51, %v5925_v58 }
 0x538   : > { %5284 = vrcp.f32 %v1601_v48  ;;  %4713 = vmatprep.subr.mxu0 %v5454_v6  ;;  %4674 = vmatmul.mubr.msk.f32.gmra.mrb[20].mxu1 %vm1495_vm6, %v1618_v50 }
 0x539   : > { %v5275_v10 = vpop.eup %5274  ;;  %4689 = vmatmul.mubr.msk.f32.gmra.mrb[32].mxu0 %vm1495_vm6, %v1621_v8  ;;  %4699 = vmatpush3.msk.msra.mxu1 %vm1638_vm5, %v1126_v52 }
 0x53a   : > { %v5277_v62 = vpop.eup %5276  ;;  %4714 = vmatpush3.msk.msra.mxu0 %vm1638_vm5, %v1129_v9  ;;  %v1595_v11 = vpop.xlane.xlu0 %1594  ;;  %4676 = vmatprep.mubr.msk.f32.mxu1 %vm5453_vm0, %v5454_v6  ;;  %v1619_v16 = vmul.f32 %v5275_v10, %v5933_v4 }
 0x53b   : > { %5286 = vrcp.f32 %v1595_v11  ;;  %v1604_v63 = vpop.xlane.xlu1 %1603  ;;  %4691 = vmatprep.mubr.msk.f32.mxu0 %vm5453_vm0, %v5454_v6  ;;  %v1622_v17 = vmul.f32 %v5277_v62, %v5935_v14  ;;  %5080 = vmatprep.subr.bf16.mxu1 %v5452_v3 }
 0x53c   : > { %5288 = vrcp.f32 %v1604_v63  ;;  %4677 = vmatmul.mubr.msk.f32.gmra.mrb[22].mxu1 %vm1495_vm6, %v1619_v16  ;;  %5086 = vmatprep.subr.bf16.mxu0 %v5452_v3 }
 0x53d   : > { %v5279_v27 = vpop.eup %5278  ;;  %4692 = vmatmul.mubr.msk.f32.gmra.mrb[34].mxu0 %vm1495_vm6, %v1622_v17  ;;  %4700 = vmatprep.mubr.msk.f32.mxu1 %vm5453_vm0, %v5454_v6 }
 0x53e   : > { %v5281_v49 = vpop.eup %5280  ;;  %v1623_v53 = vmul.f32 %v5279_v27, %v5941_v7  ;;  %4715 = vmatprep.mubr.msk.f32.mxu0 %vm5453_vm0, %v5454_v6 }
 0x53f   : > { %v1626_v54 = vmul.f32 %v5281_v49, %v5943_v18 }
 0x540   : > { %4701 = vmatmul.mubr.msk.f32.vlgmr.msra.gmra.mrb[24].mxu1 %vm1495_vm6, %v1623_v53 }
 0x541   : > { %v5283_v55 = vpop.eup %5282  ;;  %4716 = vmatmul.mubr.msk.f32.vlgmr.msra.gmra.mrb[36].mxu0 %vm1495_vm6, %v1626_v54  ;;  %4703 = vmatprep.mubr.msk.f32.mxu1 %vm5453_vm0, %v5454_v6 }
 0x542   : > { %v5285_v56 = vpop.eup %5284  ;;  %4718 = vmatprep.mubr.msk.f32.mxu0 %vm5453_vm0, %v5454_v6  ;;  %v1624_v57 = vmul.f32 %v5283_v55, %v5949_v22 }
 0x543   : > { %v1627_v58 = vmul.f32 %v5285_v56, %v5951_v23 }
 0x544   : > { %4704 = vmatmul.mubr.msk.f32.gmra.mrb[26].mxu1 %vm1495_vm6, %v1624_v57 }
 0x545   : > { %v5287_v59 = vpop.eup %5286  ;;  %4719 = vmatmul.mubr.msk.f32.gmra.mrb[38].mxu0 %vm1495_vm6, %v1627_v58  ;;  %4706 = vmatprep.mubr.msk.f32.mxu1 %vm5453_vm0, %v5454_v6 }
 0x546   : > { %v5289_v0 = vpop.eup %5288  ;;  %4721 = vmatprep.mubr.msk.f32.mxu0 %vm5453_vm0, %v5454_v6  ;;  %v1625_v1 = vmul.f32 %v5287_v59, %v5957_v28 }
 0x547   : > { %v1628_v60 = vmul.f32 %v5289_v0, %v5959_v30 }
 0x548   : > { %4707 = vmatmul.mubr.msk.f32.gmra.mrb[28].mxu1 %vm1495_vm6, %v1625_v1 }
 0x549   : > { %4722 = vmatmul.mubr.msk.f32.gmra.mrb[40].mxu0 %vm1495_vm6, %v1628_v60  ;;  %4732 = vmatprep.mubr.msk.f32.mxu1 %vm5453_vm0, %v5454_v6 }
 0x54a   : > { %4773 = vmatprep.mubr.msk.f32.mxu0 %vm5453_vm0, %v5454_v6 }
 0x607   : > { %v1708_v61 = vpop.f32.mrb[18].mxu1 }
 0x608   : > { %v1998_v2 = vsel %vm737_vm2, %v1708_v61, 0.0  ;;  %v1800_v4 = vpop.f32.mrb[30].mxu0  ;;  %v4672_v12 = vpop.f32.mrb[19].mxu1 }
 0x609   : > { %v1999_v13 = vsel %vm737_vm2, %v1800_v4, 0.0  ;;  %v4687_v14 = vpop.f32.mrb[31].mxu0 }
 0x60a   : > { %v2000_v15 = vadd.f32 %v1999_v13, %v1998_v2  ;;  %v2081_v14 = vld [vmem:[%s6745_s14] sm:$0xff] }
 0x60b   : > { %v1713_v5 = vpop.f32.mrb[20].mxu1 }
 0x60c   : > { %v2005_v7 = vsel %vm737_vm2, %v1713_v5, 0.0  ;;  %v1805_v18 = vpop.f32.mrb[32].mxu0  ;;  %v4675_v20 = vpop.f32.mrb[21].mxu1 }
 0x60d   : > { %v2006_v21 = vsel %vm737_vm2, %v1805_v18, 0.0  ;;  %v4690_v22 = vpop.f32.mrb[33].mxu0  ;;  %v2084_v18 = vld [vmem:[%s6745_s14 + $0x18] sm:$0xff] }
 0x60e   : > { %v2007_v23 = vadd.f32 %v2006_v21, %v2005_v7  ;;  %v2083_v7 = vld [vmem:[%s6745_s14 + $0x10] sm:$0xff] }
 0x60f   : > { %v1718_v25 = vpop.f32.mrb[22].mxu1  ;;  %v5084_v20 = vpack.c.bf16 %v2084_v18, %v2083_v7 }
 0x610   : > { %v2012_v26 = vsel %vm744_vm3, %v1718_v25, 0.0  ;;  %v1810_v28 = vpop.f32.mrb[34].mxu0  ;;  %v4678_v30 = vpop.f32.mrb[23].mxu1 }
 0x611   : > { %v2013_v31 = vsel %vm744_vm3, %v1810_v28, 0.0  ;;  %v4693_v32 = vpop.f32.mrb[35].mxu0 }
 0x612   : > { %v2014_v33 = vadd.f32 %v2013_v31, %v2012_v26 }
 0x613   : > { %v1892_v34 = vpop.f32.mrb[24].mxu1 }
 0x614   : > { %v2001_v37 = vsel %vm737_vm2, %v1892_v34, 0.0  ;;  %v1984_v38 = vpop.f32.mrb[36].mxu0  ;;  %v4702_v39 = vpop.f32.mrb[25].mxu1  ;;  %v4209_v34 = vld [vmem:[%s6743_s12] ss:$0 sm:$0xff] }
 0x615   : > { %v2002_v40 = vadd.f32 %v2001_v37, %v2000_v15  ;;  %v4717_v44 = vpop.f32.mrb[37].mxu0  ;;  %v2003_v35 = vsel %vm737_vm2, %v1984_v38, 0.0  ;;  %v2082_v15 = vld [vmem:[%s6745_s14 + $0x8] sm:$0xff]  ;;  %v4210_v38 = vld [vmem:[%s6744_s13] ss:$0 sm:$0xff] }
 0x616   : > { %v5081_v5 = vpack.c.bf16 %v2082_v15, %v2081_v14 }
 0x617   : > { %v2004_v36 = vadd.f32 %v2003_v35, %v2002_v40  ;;  %v1897_v45 = vpop.f32.mrb[26].mxu1 }
 0x618   : > { %v2008_v46 = vsel %vm737_vm2, %v1897_v45, 0.0  ;;  %v1989_v42 = vpop.f32.mrb[38].mxu0  ;;  %v4705_v43 = vpop.f32.mrb[27].mxu1  ;;  %5082 = vmatpush3.bf16.msra.mxu1 %v5081_v5 }
 0x619   : > { %v6039_v51 = vadd.f32 %v2004_v36, %v5658_v19  ;;  %v2009_v47 = vadd.f32 %v2008_v46, %v2007_v23  ;;  %v4720_v50 = vpop.f32.mrb[39].mxu0  ;;  %v2010_v52 = vsel %vm737_vm2, %v1989_v42, 0.0  ;;  %5083 = vmatprep.subr.bf16.mxu1 %v5452_v3 }
 0x61a   : > { %v2262_v50 = vld [vmem:[%s6747_s16] sm:$0xff] }
 0x61b   : > { %v2011_v48 = vadd.f32 %v2010_v52, %v2009_v47  ;;  %v1902_v8 = vpop.f32.mrb[28].mxu1  ;;  %v2024_v9 = vsel %vm737_vm2, %v6039_v51, 0.0  ;;  %v2263_v52 = vld [vmem:[%s6747_s16 + $0x8] sm:$0xff] }
 0x61c   : > { %v2015_v10 = vsel %vm744_vm3, %v1902_v8, 0.0  ;;  %v1994_v62 = vpop.f32.mrb[40].mxu0  ;;  %v4708_v11 = vpop.f32.mrb[29].mxu1  ;;  %2025 = vadd.xlane.f32.xlu0 %v2024_v9  ;;  %5085 = vmatpush3.bf16.msra.mxu1 %v5084_v20  ;;  %v2264_v8 = vld [vmem:[%s6747_s16 + $0x10] sm:$0xff]  ;;  %v2265_v9 = vld [vmem:[%s6747_s16 + $0x18] sm:$0xff] }
 0x61d   : > { %v6046_v16 = vadd.f32 %v2011_v48, %v5665_v24  ;;  %v2016_v63 = vadd.f32 %v2015_v10, %v2014_v33  ;;  %v4723_v19 = vpop.f32.mrb[41].mxu0  ;;  %v2017_v17 = vsel %vm744_vm3, %v1994_v62, 0.0  ;;  %5110 = vmatprep.subr.bf16.mxu1 %v5452_v3  ;;  %v5087_v48 = vpack.c.bf16 %v2263_v52, %v2262_v50  ;;  %v2266_v62 = vld [vmem:[%s6747_s16 + $0x20] sm:$0xff]  ;;  %v2267_v11 = vld [vmem:[%s6747_s16 + $0x28] sm:$0xff] }
 0x61e   : > { %v5090_v10 = vpack.c.bf16 %v2265_v9, %v2264_v8  ;;  %v2268_v19 = vld [vmem:[%s6747_s16 + $0x30] sm:$0xff] }
 0x61f   : > { %v2018_v27 = vadd.f32 %v2017_v17, %v2016_v63  ;;  %v2027_v49 = vsel %vm737_vm2, %v6046_v16, 0.0  ;;  %5088 = vmatpush3.bf16.msra.mxu0 %v5087_v48  ;;  %v5093_v63 = vpack.c.bf16 %v2267_v11, %v2266_v62  ;;  %v2269_v17 = vld [vmem:[%s6747_s16 + $0x38] sm:$0xff] }
 0x620   : > { %2028 = vadd.xlane.f32.xlu1 %v2027_v49  ;;  %5089 = vmatprep.subr.bf16.mxu0 %v5452_v3  ;;  %v2270_v49 = vld [vmem:[%s6747_s16 + $0x40] sm:$0xff] }
 0x621   : > { %v6052_v53 = vadd.f32 %v2018_v27, %v5672_v29  ;;  %v5096_v27 = vpack.c.bf16 %v2269_v17, %v2268_v19 }
 0x623   : > { %v2030_v54 = vsel %vm744_vm3, %v6052_v53, 0.0  ;;  %5091 = vmatpush3.bf16.msra.mxu0 %v5090_v10 }
 0x624   : > { %2031 = vadd.xlane.f32.xlu0 %v2030_v54  ;;  %5092 = vmatprep.subr.bf16.mxu0 %v5452_v3  ;;  %v2271_v54 = vld [vmem:[%s6747_s16 + $0x48] sm:$0xff] }
 0x627   : > { %5094 = vmatpush3.bf16.msra.mxu0 %v5093_v63 }
 0x628   : > { %5095 = vmatprep.subr.bf16.mxu0 %v5452_v3 }
 0x62b   : > { %5097 = vmatpush3.bf16.msra.mxu0 %v5096_v27 }
 0x62c   : > { %5098 = vmatprep.subr.bf16.mxu0 %v5452_v3 }
 0x6a9   : > { %v2026_v55 = vpop.xlane.xlu0 %2025 }
 0x6aa   : > { %v2033_v56 = vmul.f32 0.03125, %v2026_v55  ;;  %v5099_v55 = vpack.c.bf16 %v2271_v54, %v2270_v49 }
 0x6ac   : > { %v2036_v24 = vsub.f32 %v6039_v51, %v2033_v56  ;;  %5100 = vmatpush3.bf16.msra.mxu0 %v5099_v55  ;;  %v2272_v56 = vld [vmem:[%s6747_s16 + $0x50] sm:$0xff] }
 0x6ad   : > { %v2029_v57 = vpop.xlane.xlu1 %2028  ;;  %5101 = vmatprep.subr.bf16.mxu0 %v5452_v3 }
 0x6ae   : > { %v2034_v58 = vmul.f32 0.03125, %v2029_v57  ;;  %v2039_v59 = vmul.f32 %v2036_v24, %v2036_v24 }
 0x6b0   : > { %v2037_v0 = vsub.f32 %v6046_v16, %v2034_v58  ;;  %v2042_v1 = vsel %vm737_vm2, %v2039_v59, 0.0  ;;  %v2274_v58 = vld [vmem:[%s6747_s16 + $0x60] sm:$0xff]  ;;  %v2275_v59 = vld [vmem:[%s6747_s16 + $0x68] sm:$0xff] }
 0x6b1   : > { %2043 = vadd.xlane.f32.xlu1 %v2042_v1  ;;  %v2032_v60 = vpop.xlane.xlu0 %2031  ;;  %v2276_v1 = vld [vmem:[%s6747_s16 + $0x70] sm:$0xff] }
 0x6b2   : > { %v2035_v61 = vmul.f32 0.03125, %v2032_v60  ;;  %v2040_v29 = vmul.f32 %v2037_v0, %v2037_v0  ;;  %v2277_v60 = vld [vmem:[%s6747_s16 + $0x78] sm:$0xff] }
 0x6b4   : > { %v2038_v2 = vsub.f32 %v6052_v53, %v2035_v61  ;;  %v2045_v4 = vsel %vm737_vm2, %v2040_v29, 0.0  ;;  %v5108_v61 = vpack.c.bf16 %v2277_v60, %v2276_v1  ;;  %v4211_v29 = vld [vmem:[%s6746_s15] ss:$0 sm:$0xff] }
 0x6b5   : > { %2046 = vadd.xlane.f32.xlu0 %v2045_v4 }
 0x6b6   : > { %v2041_v12 = vmul.f32 %v2038_v2, %v2038_v2 }
 0x6b8   : > { %v2048_v13 = vsel %vm744_vm3, %v2041_v12, 0.0 }
 0x6b9   : > { %2049 = vadd.xlane.f32.xlu1 %v2048_v13 }
 0x73e   : > { %v2044_v21 = vpop.xlane.xlu1 %2043 }
 0x73f   : > { %v2051_v22 = vmul.f32 0.03125, %v2044_v21 }
 0x741   : > { %v2054_v23 = vadd.f32 1e-05, %v2051_v22 }
 0x742   : > { %v2047_v25 = vpop.xlane.xlu0 %2046 }
 0x743   : > { %5290 = vrsqrt.f32 %v2054_v23  ;;  %v2052_v26 = vmul.f32 0.03125, %v2047_v25 }
 0x745   : > { %v2055_v28 = vadd.f32 1e-05, %v2052_v26 }
 0x746   : > { %v2050_v30 = vpop.xlane.xlu1 %2049 }
 0x747   : > { %5292 = vrsqrt.f32 %v2055_v28  ;;  %v2053_v31 = vmul.f32 0.03125, %v2050_v30 }
 0x749   : > { %v2056_v32 = vadd.f32 1e-05, %v2053_v31 }
 0x74b   : > { %5294 = vrsqrt.f32 %v2056_v32 }
 0x74d   : > { %v5291_v33 = vpop.eup %5290 }
 0x74e   : > { %v2060_v37 = vmul.f32 %v5291_v33, %v2036_v24  ;;  %v2273_v24 = vld [vmem:[%s6747_s16 + $0x58] sm:$0xff] }
 0x74f   : > { %v5102_v57 = vpack.c.bf16 %v2273_v24, %v2272_v56 }
 0x750   : > { %v2069_v39 = vmul.f32 %v4209_v34, %v2060_v37 }
 0x751   : > { %v5293_v40 = vpop.eup %5292  ;;  %5103 = vmatpush3.bf16.msra.mxu0 %v5102_v57 }
 0x752   : > { %v2078_v44 = vadd.f32 %v4210_v38, %v2069_v39  ;;  %v2061_v35 = vmul.f32 %v5293_v40, %v2037_v0  ;;  %5104 = vmatprep.subr.bf16.mxu0 %v5452_v3  ;;  %v5105_v0 = vpack.c.bf16 %v2275_v59, %v2274_v58 }
 0x754   : > { %4733 = vmatmul.mubr.msk.f32.vlgmr.msra.gmra.mrb[30].mxu1 %vm737_vm2, %v2078_v44  ;;  %v2070_v36 = vmul.f32 %v4209_v34, %v2061_v35 }
 0x755   : > { %v5295_v45 = vpop.eup %5294  ;;  %4735 = vmatprep.mubr.msk.f32.mxu1 %vm5453_vm0, %v5454_v6  ;;  %5106 = vmatpush3.bf16.msra.mxu0 %v5105_v0 }
 0x756   : > { %v2079_v46 = vadd.f32 %v4210_v38, %v2070_v36  ;;  %v2062_v42 = vmul.f32 %v5295_v45, %v2038_v2  ;;  %5107 = vmatprep.subr.bf16.mxu0 %v5452_v3 }
 0x758   : > { %4736 = vmatmul.mubr.msk.f32.gmra.mrb[32].mxu1 %vm737_vm2, %v2079_v46  ;;  %v2071_v43 = vmul.f32 %v4209_v34, %v2062_v42 }
 0x759   : > { %4738 = vmatprep.mubr.msk.f32.mxu1 %vm5453_vm0, %v5454_v6  ;;  %5109 = vmatpush3.bf16.msra.mxu0 %v5108_v61 }
 0x75a   : > { %v2080_v47 = vadd.f32 %v4210_v38, %v2071_v43  ;;  %5128 = vmatprep.subr.bf16.mxu0 %v5452_v3 }
 0x75c   : > { %4739 = vmatmul.mubr.msk.f32.gmra.mrb[34].mxu1 %vm737_vm2, %v2080_v47 }
 0x75d   : > { %4790 = vmatprep.mubr.msk.f32.mxu1 %vm5453_vm0, %v5454_v6 }
 0x827   : > { %v2167_v2 = vpop.f32.mrb[30].mxu1 }
 0x828   : > { %v6150_v4 = vadd.f32 %v4211_v29, %v2167_v2  ;;  %v4734_v12 = vpop.f32.mrb[31].mxu1 }
 0x82a   : > { %v6153_v13 = vmul.f32 0.70710677, %v6150_v4 }
 0x82b   : > { %v2172_v14 = vpop.f32.mrb[32].mxu1 }
 0x82c   : > { %v2190_v15 = vand.u32 2147483647, %v6153_v13  ;;  %v6156_v5 = vadd.f32 %v4211_v29, %v2172_v14  ;;  %v4737_v7 = vpop.f32.mrb[33].mxu1  ;;  %vm2184_vm8 = vcmp.ge.f32.partialorder %v6153_v13, 0.0 }
 0x82e   : > { %v2193_v18 = vmul.f32 0.3275911, %v2190_v15  ;;  %v6159_v20 = vmul.f32 0.70710677, %v6156_v5  ;;  %v2232_v34 = vsub.f32 0.0, %v2190_v15 }
 0x82f   : > { %v2177_v21 = vpop.f32.mrb[34].mxu1 }
 0x830   : > { %v2196_v22 = vadd.f32 1.0, %v2193_v18  ;;  %v2191_v23 = vand.u32 2147483647, %v6159_v20  ;;  %v4740_v25 = vpop.f32.mrb[35].mxu1  ;;  %v6162_v26 = vadd.f32 %v4211_v29, %v2177_v21  ;;  %v2235_v39 = vmul.f32 %v2232_v34, %v2190_v15 }
 0x831   : > { %v5455_v15 = vmov -1.0   ;;  %vm2185_vm9 = vcmp.ge.f32.partialorder %v6159_v20, 0.0  ;;  %v2253_v25 = vmul.f32 0.5, %v6150_v4 }
 0x832   : > { %5296 = vrcp.f32 %v2196_v22  ;;  %v2194_v28 = vmul.f32 0.3275911, %v2191_v23  ;;  %v6165_v30 = vmul.f32 0.70710677, %v6162_v26  ;;  %v2233_v40 = vsub.f32 0.0, %v2191_v23 }
 0x833   : > { %v2238_v45 = vmul.f32 1.442695, %v2235_v39  ;;  %v2187_v7 = vsel %vm2184_vm8, 1.0, %v5455_v15  ;;  %v2188_v13 = vsel %vm2185_vm9, 1.0, %v5455_v15  ;;  %v2254_v39 = vmul.f32 0.5, %v6156_v5 }
 0x834   : > { %v2197_v31 = vadd.f32 1.0, %v2194_v28  ;;  %v2192_v32 = vand.u32 2147483647, %v6165_v30  ;;  %v2236_v46 = vmul.f32 %v2233_v40, %v2191_v23  ;;  %vm2186_vm10 = vcmp.ge.f32.partialorder %v6165_v30, 0.0 }
 0x835   : > { %v2189_v4 = vsel %vm2186_vm10, 1.0, %v5455_v15 }
 0x836   : > { %5298 = vrcp.f32 %v2197_v31  ;;  %v2195_v33 = vmul.f32 0.3275911, %v2192_v32  ;;  %v2234_v43 = vsub.f32 0.0, %v2192_v32  ;;  %v2240_v48 = vmul.f32 1.442695, %v2236_v46 }
 0x837   : > { %v4215_v46 = vld [vmem:[%s6748_s17] ss:$0 sm:$0xff] }
 0x838   : > { %v2198_v37 = vadd.f32 1.0, %v2195_v33  ;;  %v2237_v10 = vmul.f32 %v2234_v43, %v2192_v32 }
 0x83a   : > { %5300 = vrcp.f32 %v2198_v37  ;;  %v2242_v49 = vmul.f32 1.442695, %v2237_v10 }
 0x83b   : > { %5302 = vpow2.f32 %v2238_v45 }
 0x83c   : > { %v5297_v38 = vpop.eup %5296  ;;  %5304 = vpow2.f32 %v2240_v48 }
 0x83d   : > { %v2205_v44 = vmul.f32 1.0614054, %v5297_v38  ;;  %5306 = vpow2.f32 %v2242_v49 }
 0x83f   : > { %v2208_v35 = vadd.f32 -1.4531521, %v2205_v44 }
 0x840   : > { %v5299_v36 = vpop.eup %5298 }
 0x841   : > { %v2211_v42 = vmul.f32 %v5297_v38, %v2208_v35  ;;  %v2206_v47 = vmul.f32 1.0614054, %v5299_v36 }
 0x843   : > { %v2214_v50 = vadd.f32 1.4214138, %v2211_v42  ;;  %v2209_v52 = vadd.f32 -1.4531521, %v2206_v47 }
 0x844   : > { %v5301_v8 = vpop.eup %5300 }
 0x845   : > { %v2217_v9 = vmul.f32 %v5297_v38, %v2214_v50  ;;  %v2212_v62 = vmul.f32 %v5299_v36, %v2209_v52  ;;  %v2207_v11 = vmul.f32 1.0614054, %v5301_v8  ;;  %v5303_v0 = vpop.eup %5302 }
 0x846   : > { %v5305_v14 = vpop.eup %5304 }
 0x847   : > { %v2220_v63 = vadd.f32 -0.28449672, %v2217_v9  ;;  %v2215_v19 = vadd.f32 1.4214138, %v2212_v62  ;;  %v2210_v17 = vadd.f32 -1.4531521, %v2207_v11  ;;  %v5307_v33 = vpop.eup %5306 }
 0x849   : > { %v2223_v27 = vmul.f32 %v5297_v38, %v2220_v63  ;;  %v2218_v54 = vmul.f32 %v5299_v36, %v2215_v19  ;;  %v2213_v55 = vmul.f32 %v5301_v8, %v2210_v17 }
 0x84b   : > { %v2226_v56 = vadd.f32 0.2548296, %v2223_v27  ;;  %v2221_v24 = vadd.f32 -0.28449672, %v2218_v54  ;;  %v2216_v57 = vadd.f32 1.4214138, %v2213_v55 }
 0x84d   : > { %v2229_v58 = vmul.f32 %v5297_v38, %v2226_v56  ;;  %v2224_v59 = vmul.f32 %v5299_v36, %v2221_v24  ;;  %v2219_v1 = vmul.f32 %v5301_v8, %v2216_v57 }
 0x84f   : > { %v2244_v60 = vmul.f32 %v5303_v0, %v2229_v58  ;;  %v2227_v61 = vadd.f32 0.2548296, %v2224_v59  ;;  %v2222_v29 = vadd.f32 -0.28449672, %v2219_v1 }
 0x851   : > { %v2247_v2 = vsub.f32 1.0, %v2244_v60  ;;  %v2230_v12 = vmul.f32 %v5299_v36, %v2227_v61  ;;  %v2225_v18 = vmul.f32 %v5301_v8, %v2222_v29  ;;  %v2255_v36 = vmul.f32 0.5, %v6162_v26  ;;  %v4220_v60 = vld [vmem:[%s6780_s6 + $0x20] sm:$0xff]  ;;  %v4221_v61 = vld [vmem:[%s6780_s6 + $0x28] sm:$0xff] }
 0x852   : > { %v5111_v29 = vpack.c.bf16 %v4221_v61, %v4220_v60 }
 0x853   : > { %v2250_v21 = vmul.f32 %v2247_v2, %v2187_v7  ;;  %v2245_v22 = vmul.f32 %v5305_v14, %v2230_v12  ;;  %v2228_v23 = vadd.f32 0.2548296, %v2225_v18  ;;  %v4222_v2 = vld [vmem:[%s6780_s6 + $0x30] sm:$0xff]  ;;  %v4223_v12 = vld [vmem:[%s6780_s6 + $0x38] sm:$0xff]  ;;  %s4319_s6 = sshll.u32 %s5583_s2, 4  ;;  %s5456_s2 = smov [#allocation2]  }
 0x854   : > { %5112 = vmatpush3.bf16.msra.mxu1 %v5111_v29  ;;  %v5114_v14 = vpack.c.bf16 %v4223_v12, %v4222_v2  ;;  %v4243_v29 = vld [vmem:[%s6742_s11 + $0x1] ss:$0 sm:$0xff]  ;;  %s6689_s27 = scalar_lea.hbm %s6751_s20, %s4319_s6 }
 0x855   : > { %v2256_v28 = vadd.f32 1.0, %v2250_v21  ;;  %v2248_v31 = vsub.f32 1.0, %v2245_v22  ;;  %v2231_v32 = vmul.f32 %v5301_v8, %v2228_v23  ;;  %5113 = vmatprep.subr.bf16.mxu1 %v5452_v3 }
 0x857   : > { %v2259_v34 = vmul.f32 %v2256_v28, %v2253_v25  ;;  %v2251_v37 = vmul.f32 %v2248_v31, %v2188_v13  ;;  %v2246_v38 = vmul.f32 %v5307_v33, %v2231_v32  ;;  %v4218_v33 = vld [vmem:[%s6781_s30 + $0x1] ss:$0 sm:$0xff] }
 0x858   : > { %5115 = vmatpush3.bf16.msra.mxu1 %v5114_v14 }
 0x859   : > { %4774 = vmatmul.mubr.f32.vlgmr.msra.gmra.mrb[42].mxu0 %v2259_v34  ;;  %v2257_v40 = vadd.f32 1.0, %v2251_v37  ;;  %v2249_v20 = vsub.f32 1.0, %v2246_v38  ;;  %5116 = vmatprep.subr.bf16.mxu1 %v5452_v3  ;;  %v4229_v37 = vld [vmem:[%s6739_s8 + $0x20] sm:$0xff]  ;;  %v4230_v38 = vld [vmem:[%s6739_s8 + $0x28] sm:$0xff] }
 0x85a   : > { %4776 = vmatprep.mubr.msk.f32.mxu0 %vm5453_vm0, %v5454_v6 }
 0x85b   : > { %v2260_v44 = vmul.f32 %v2257_v40, %v2254_v39  ;;  %v2252_v35 = vmul.f32 %v2249_v20, %v2189_v4  ;;  %v4219_v39 = vld [vmem:[%s6782_s5 + $0x1] ss:$0 sm:$0xff]  ;;  %v5117_v4 = vpack.c.bf16 %v4230_v38, %v4229_v37 }
 0x85d   : > { %4777 = vmatmul.mubr.f32.gmra.mrb[44].mxu0 %v2260_v44  ;;  %v2258_v30 = vadd.f32 1.0, %v2252_v35 }
 0x85e   : > { %4779 = vmatprep.mubr.msk.f32.mxu0 %vm5453_vm0, %v5454_v6 }
 0x85f   : > { %v2261_v45 = vmul.f32 %v2258_v30, %v2255_v36  ;;  %v4231_v36 = vld [vmem:[%s6739_s8 + $0x30] sm:$0xff]  ;;  %v4232_v30 = vld [vmem:[%s6739_s8 + $0x38] sm:$0xff] }
 0x861   : > { %4780 = vmatmul.mubr.f32.gmra.mrb[46].mxu0 %v2261_v45 }
 0x862   : > { %4839 = vmatprep.mubr.msk.f32.mxu0 %vm5453_vm0, %v5454_v6 }
 0x92c   : > { %v2344_v5 = vpop.f32.mrb[42].mxu0 }
 0x92d   : > { %v2358_v42 = vadd.f32 %v2344_v5, %v6039_v51  ;;  %v4775_v43 = vpop.f32.mrb[43].mxu0  ;;  %v5120_v5 = vpack.c.bf16 %v4232_v30, %v4231_v36 }
 0x92f   : > { %v6187_v47 = vadd.f32 %v4215_v46, %v2358_v42 }
 0x930   : > { %v2349_v26 = vpop.f32.mrb[44].mxu0 }
 0x931   : > { %v2359_v50 = vadd.f32 %v2349_v26, %v6046_v16  ;;  %v4778_v52 = vpop.f32.mrb[45].mxu0  ;;  %v2375_v48 = vsel %vm737_vm2, %v6187_v47, 0.0 }
 0x932   : > { %2376 = vadd.xlane.f32.xlu0 %v2375_v48  ;;  %v4238_v52 = vld [vmem:[%s6741_s10 + $0x20] sm:$0xff]  ;;  %v4239_v48 = vld [vmem:[%s6741_s10 + $0x28] sm:$0xff] }
 0x933   : > { %v6192_v8 = vadd.f32 %v4215_v46, %v2359_v50 }
 0x934   : > { %v2354_v9 = vpop.f32.mrb[46].mxu0 }
 0x935   : > { %v2378_v10 = vsel %vm737_vm2, %v6192_v8, 0.0  ;;  %v2360_v62 = vadd.f32 %v2354_v9, %v6052_v53  ;;  %v4781_v51 = vpop.f32.mrb[47].mxu0  ;;  %v5123_v9 = vpack.c.bf16 %v4239_v48, %v4238_v52 }
 0x936   : > { %2379 = vadd.xlane.f32.xlu1 %v2378_v10  ;;  %v4240_v10 = vld [vmem:[%s6741_s10 + $0x30] sm:$0xff] }
 0x937   : > { %v6197_v11 = vadd.f32 %v4215_v46, %v2360_v62  ;;  %v4241_v62 = vld [vmem:[%s6741_s10 + $0x38] sm:$0xff] }
 0x938   : > { %v5126_v51 = vpack.c.bf16 %v4241_v62, %v4240_v10 }
 0x939   : > { %v2381_v16 = vsel %vm744_vm3, %v6197_v11, 0.0 }
 0x93a   : > { %2382 = vadd.xlane.f32.xlu0 %v2381_v16 }
 0x9bf   : > { %v2377_v63 = vpop.xlane.xlu0 %2376 }
 0x9c0   : > { %v2384_v19 = vmul.f32 0.03125, %v2377_v63 }
 0x9c2   : > { %v2387_v17 = vsub.f32 %v6187_v47, %v2384_v19 }
 0x9c3   : > { %v2380_v27 = vpop.xlane.xlu1 %2379 }
 0x9c4   : > { %v2385_v49 = vmul.f32 0.03125, %v2380_v27  ;;  %v2390_v54 = vmul.f32 %v2387_v17, %v2387_v17 }
 0x9c6   : > { %v2388_v55 = vsub.f32 %v6192_v8, %v2385_v49  ;;  %v2393_v56 = vsel %vm737_vm2, %v2390_v54, 0.0 }
 0x9c7   : > { %2394 = vadd.xlane.f32.xlu1 %v2393_v56  ;;  %v2383_v53 = vpop.xlane.xlu0 %2382  ;;  %v4234_v56 = vld [vmem:[%s6740_s9 + $0x1] ss:$0 sm:$0xff] }
 0x9c8   : > { %v2391_v24 = vmul.f32 %v2388_v55, %v2388_v55  ;;  %v2386_v57 = vmul.f32 0.03125, %v2383_v53 }
 0x9ca   : > { %v2396_v58 = vsel %vm737_vm2, %v2391_v24, 0.0  ;;  %v2389_v59 = vsub.f32 %v6197_v11, %v2386_v57 }
 0x9cb   : > { %2397 = vadd.xlane.f32.xlu0 %v2396_v58 }
 0x9cc   : > { %v2392_v0 = vmul.f32 %v2389_v59, %v2389_v59 }
 0x9ce   : > { %v2399_v1 = vsel %vm744_vm3, %v2392_v0, 0.0 }
 0x9cf   : > { %2400 = vadd.xlane.f32.xlu1 %v2399_v1 }
 0xa54   : > { %v2395_v7 = vpop.xlane.xlu1 %2394 }
 0xa55   : > { %v2402_v18 = vmul.f32 0.03125, %v2395_v7 }
 0xa57   : > { %v2405_v21 = vadd.f32 1e-05, %v2402_v18 }
 0xa58   : > { %v2398_v22 = vpop.xlane.xlu0 %2397 }
 0xa59   : > { %5308 = vrsqrt.f32 %v2405_v21  ;;  %v2403_v23 = vmul.f32 0.03125, %v2398_v22 }
 0xa5b   : > { %v2406_v25 = vadd.f32 1e-05, %v2403_v23  ;;  %v6300_v23 = vld [vmem:[%s6786_s0] ss:$0 sm:$0xff] }
 0xa5c   : > { %v2401_v28 = vpop.xlane.xlu1 %2400 }
 0xa5d   : > { %5310 = vrsqrt.f32 %v2406_v25  ;;  %v2404_v31 = vmul.f32 0.03125, %v2401_v28  ;;  %v6306_v28 = vld [vmem:[%s6786_s0 + $0x1] ss:$0 sm:$0xff] }
 0xa5f   : > { %v2407_v13 = vadd.f32 1e-05, %v2404_v31 }
 0xa61   : > { %5312 = vrsqrt.f32 %v2407_v13 }
 0xa63   : > { %v5309_v32 = vpop.eup %5308 }
 0xa64   : > { %v2411_v34 = vmul.f32 %v5309_v32, %v2387_v17 }
 0xa66   : > { %v2420_v40 = vmul.f32 %v4218_v33, %v2411_v34 }
 0xa67   : > { %v5311_v20 = vpop.eup %5310 }
 0xa68   : > { %v2429_v44 = vadd.f32 %v4219_v39, %v2420_v40  ;;  %v2412_v35 = vmul.f32 %v5311_v20, %v2388_v55  ;;  %v6320_v20 = vld [vmem:[%s6786_s0 + $0x2] ss:$0 sm:$0xff] }
 0xa6a   : > { %4791 = vmatmul.mubr.msk.f32.vlgmr.msra.gmra.mrb[36].mxu1 %vm737_vm2, %v2429_v44  ;;  %v2421_v45 = vmul.f32 %v4218_v33, %v2412_v35 }
 0xa6b   : > { %4793 = vmatprep.mubr.msk.f32.mxu1 %vm5453_vm0, %v5454_v6  ;;  %5118 = vmatpush3.bf16.msra.mxu1 %v5117_v4  ;;  %v5313_v46 = vpop.eup %5312 }
 0xa6c   : > { %v2430_v42 = vadd.f32 %v4219_v39, %v2421_v45  ;;  %5119 = vmatprep.subr.bf16.mxu1 %v5452_v3  ;;  %v2413_v43 = vmul.f32 %v5313_v46, %v2389_v59  ;;  %v4225_v59 = vld [vmem:[%s6738_s7 + $0x1] ss:$0 sm:$0xff] }
 0xa6e   : > { %4794 = vmatmul.mubr.msk.f32.gmra.mrb[38].mxu1 %vm737_vm2, %v2430_v42  ;;  %v2422_v26 = vmul.f32 %v4218_v33, %v2413_v43 }
 0xa6f   : > { %4796 = vmatprep.mubr.msk.f32.mxu1 %vm5453_vm0, %v5454_v6  ;;  %5121 = vmatpush3.bf16.msra.mxu1 %v5120_v5 }
 0xa70   : > { %5122 = vmatprep.subr.bf16.mxu1 %v5452_v3  ;;  %v2431_v50 = vadd.f32 %v4219_v39, %v2422_v26 }
 0xa72   : > { %4797 = vmatmul.mubr.msk.f32.gmra.mrb[40].mxu1 %vm737_vm2, %v2431_v50 }
 0xa73   : > { %4807 = vmatprep.mubr.msk.f32.mxu1 %vm5453_vm0, %v5454_v6 }
 0xa76   : > { %4808 = vmatmul.mubr.msk.f32.vlgmr.msra.gmra.mrb[42].mxu1 %vm737_vm2, %v2429_v44 }
 0xa77   : > { %4810 = vmatprep.mubr.msk.f32.mxu1 %vm5453_vm0, %v5454_v6  ;;  %5124 = vmatpush3.bf16.msra.mxu1 %v5123_v9 }
 0xa78   : > { %5125 = vmatprep.subr.bf16.mxu1 %v5452_v3 }
 0xa7a   : > { %4811 = vmatmul.mubr.msk.f32.gmra.mrb[44].mxu1 %vm737_vm2, %v2430_v42 }
 0xa7b   : > { %4813 = vmatprep.mubr.msk.f32.mxu1 %vm5453_vm0, %v5454_v6  ;;  %5127 = vmatpush3.bf16.msra.mxu1 %v5126_v51 }
 0xa7c   : > { %5132 = vmatprep.subr.bf16.mxu1 %v5452_v3 }
 0xa7e   : > { %4814 = vmatmul.mubr.msk.f32.gmra.mrb[46].mxu1 %vm737_vm2, %v2431_v50 }
 0xa7f   : > { %4824 = vmatprep.mubr.msk.f32.mxu1 %vm5453_vm0, %v5454_v6 }
 0xa82   : > { %4825 = vmatmul.mubr.msk.f32.vlgmr.msra.gmra.mrb[48].mxu1 %vm737_vm2, %v2429_v44  ;;  %v6328_v44 = vld [vmem:[%s6786_s0 + $0x3] ss:$0 sm:$0xff]  ;;  %s5392_s0 = sshll.u32 %s5456_s2, 4  ;;  %s5393_s0 = int_to_ptr.vmem [resolvable:$false] %s5392_s0 }
 0xa83   : > { %4827 = vmatprep.mubr.msk.f32.mxu1 %vm5453_vm0, %v5454_v6  ;;  %s5394_s5 = scalar_lea.vmem %s5393_s0, 32  ;;  %p5395_p0 = scmp.lt.s32.totalorder %s6691_s29, %s5393_s0 }
 0xa84   : > { %p5396_p1 = scmp.lt.s32.totalorder %s5394_s5, %s5388_s23 }
 0xa86   : > { %4828 = vmatmul.mubr.msk.f32.gmra.mrb[50].mxu1 %vm737_vm2, %v2430_v42  ;;  %p5397_p2 = por %p5396_p1, %p5395_p0 }
 0xa87   : > { %4830 = vmatprep.mubr.msk.f32.mxu1 %vm5453_vm0, %v5454_v6 }
 0xa88   : > { %p5398_p3 = pnand %p5397_p2, %p5391_p13 }
 0xa8a   : > { %4831 = vmatmul.mubr.msk.f32.gmra.mrb[52].mxu1 %vm737_vm2, %v2431_v50 }
 0xa8b   : > { %4854 = vmatprep.mubr.msk.f32.mxu1 %vm5453_vm0, %v5454_v6 }
 0xb3d   : > { %v2520_v16 = vpop.f32.mrb[36].mxu1 }
 0xb3e   : > { %v4792_v63 = vpop.f32.mrb[37].mxu1  ;;  %v2521_v60 = vadd.f32 %v4225_v59, %v2520_v16 }
 0xb40   : > { %v2720_v12 = vmul.f32 0.35355338, %v2521_v60 }
 0xb41   : > { %v2525_v19 = vpop.f32.mrb[38].mxu1 }
 0xb42   : > { %v4795_v17 = vpop.f32.mrb[39].mxu1  ;;  %v2526_v14 = vadd.f32 %v4225_v59, %v2525_v19  ;;  %v2723_v25 = vmul.f32 %v6300_v23, %v2720_v12  ;;  %v2726_v31 = vmul.f32 %v6306_v28, %v2720_v12  ;;  %v2729_v10 = vmul.f32 %v6320_v20, %v2720_v12 }
 0xb43   : > { %v2732_v62 = vmul.f32 %v6328_v44, %v2720_v12 }
 0xb44   : > { %v2721_v13 = vmul.f32 0.35355338, %v2526_v14 }
 0xb45   : > { %v2530_v27 = vpop.f32.mrb[40].mxu1 }
 0xb46   : > { %v4798_v49 = vpop.f32.mrb[41].mxu1  ;;  %v2531_v34 = vadd.f32 %v4225_v59, %v2530_v27  ;;  %v2724_v46 = vmul.f32 %v6300_v23, %v2721_v13  ;;  %v2727_v50 = vmul.f32 %v6306_v28, %v2721_v13  ;;  %v2730_v16 = vmul.f32 %v6320_v20, %v2721_v13 }
 0xb47   : > { %v2733_v63 = vmul.f32 %v6328_v44, %v2721_v13 }
 0xb48   : > { %v2722_v26 = vmul.f32 0.35355338, %v2531_v34 }
 0xb49   : > { %v2613_v54 = vpop.f32.mrb[42].mxu1 }
 0xb4a   : > { %v4809_v55 = vpop.f32.mrb[43].mxu1  ;;  %v2614_v24 = vadd.f32 %v4234_v56, %v2613_v54  ;;  %v2725_v48 = vmul.f32 %v6300_v23, %v2722_v26  ;;  %v2728_v9 = vmul.f32 %v6306_v28, %v2722_v26  ;;  %v2731_v27 = vmul.f32 %v6320_v20, %v2722_v26 }
 0xb4b   : > { %v2734_v49 = vmul.f32 %v6328_v44, %v2722_v26 }
 0xb4d   : > { %v2618_v53 = vpop.f32.mrb[44].mxu1 }
 0xb4e   : > { %v2619_v57 = vadd.f32 %v4234_v56, %v2618_v53  ;;  %v4812_v58 = vpop.f32.mrb[45].mxu1 }
 0xb50   : > { %v5129_v0 = vpack.c.bf16 %v2619_v57, %v2614_v24 }
 0xb51   : > { %v2623_v1 = vpop.f32.mrb[46].mxu1 }
 0xb52   : > { %v4815_v61 = vpop.f32.mrb[47].mxu1  ;;  %5131 = vmatpush3.bf16.xpose.msk.msra.mxu0 %vm5765_vm4, %v5129_v0  ;;  %5135 = vmatpush3.bf16.xpose.msk.msra.mxu1 %vm5765_vm4, %v5129_v0  ;;  %v2624_v21 = vadd.f32 %v4234_v56, %v2623_v1 }
 0xb53   : > { %4837 = vmatprep.subr.mxu0 %v5454_v6  ;;  %4852 = vmatprep.subr.mxu1 %v5454_v6 }
 0xb55   : > { %v2706_v2 = vpop.f32.mrb[48].mxu1 }
 0xb56   : > { %v4826_v7 = vpop.f32.mrb[49].mxu1  ;;  %v2707_v18 = vadd.f32 %v4243_v29, %v2706_v2 }
 0xb58   : > { %v2735_v37 = vmul.f32 %v6300_v23, %v2707_v18  ;;  %v2738_v38 = vmul.f32 %v6306_v28, %v2707_v18  ;;  %v6334_v36 = vmul.f32 %v6320_v20, %v2707_v18  ;;  %v6337_v30 = vmul.f32 %v6328_v44, %v2707_v18 }
 0xb59   : > { %v2711_v22 = vpop.f32.mrb[50].mxu1 }
 0xb5a   : > { %v2712_v32 = vadd.f32 %v4243_v29, %v2711_v22  ;;  %v4829_v33 = vpop.f32.mrb[51].mxu1  ;;  %4838 = vmatpush3.xpose.msk.msra.mxu0 %vm737_vm2, %v2624_v21  ;;  %4853 = vmatpush3.xpose.msk.msra.mxu1 %vm737_vm2, %v2624_v21 }
 0xb5b   : > { %5136 = vmatprep.subr.bf16.mxu0 %v5452_v3  ;;  %5140 = vmatprep.subr.bf16.mxu1 %v5452_v3 }
 0xb5c   : > { %v2736_v39 = vmul.f32 %v6300_v23, %v2712_v32  ;;  %v2739_v40 = vmul.f32 %v6306_v28, %v2712_v32  ;;  %v6323_v4 = vmul.f32 %v6320_v20, %v2712_v32  ;;  %v6331_v35 = vmul.f32 %v6328_v44, %v2712_v32 }
 0xb5d   : > { %v2716_v45 = vpop.f32.mrb[52].mxu1  ;;  %4840 = vmatmul.mubr.msk.f32.vlgmr.msra.gmra.mrb[48].mxu0 %vm737_vm2, %v2723_v25  ;;  %4855 = vmatmul.mubr.msk.f32.vlgmr.msra.gmra.mrb[54].mxu1 %vm737_vm2, %v2726_v31 }
 0xb5e   : > { %v4832_v5 = vpop.f32.mrb[53].mxu1  ;;  %5139 = vmatpush3.bf16.xpose.msk.msra.mxu0 %vm5765_vm4, %v5129_v0  ;;  %5143 = vmatpush3.bf16.xpose.msk.msra.mxu1 %vm5765_vm4, %v5129_v0  ;;  %v5145_v42 = vpack.c.bf16 %v2736_v39, %v2735_v37  ;;  %v5148_v43 = vpack.c.bf16 %v2739_v40, %v2738_v38  ;;  %v5151_v52 = vpack.c.bf16 %v6323_v4, %v6334_v36 }
 0xb5f   : > { %4842 = vmatprep.mubr.msk.f32.mxu0 %vm5453_vm0, %v5454_v6  ;;  %4857 = vmatprep.mubr.msk.f32.mxu1 %vm5453_vm0, %v5454_v6  ;;  %v5154_v41 = vpack.c.bf16 %v6331_v35, %v6337_v30  ;;  %v6375_v51 = vadd.f32 %v4243_v29, %v2716_v45 }
 0xb60   : > { %4867 = vmatprep.subr.mxu0 %v5454_v6  ;;  %4882 = vmatprep.subr.mxu1 %v5454_v6 }
 0xb61   : > { %4843 = vmatmul.mubr.msk.f32.gmra.mrb[50].mxu0 %vm737_vm2, %v2724_v46  ;;  %4858 = vmatmul.mubr.msk.f32.gmra.mrb[56].mxu1 %vm737_vm2, %v2727_v50  ;;  %v2737_v19 = vmul.f32 %v6300_v23, %v6375_v51  ;;  %v2740_v17 = vmul.f32 %v6306_v28, %v6375_v51  ;;  %v2743_v30 = vmul.f32 %v6320_v20, %v6375_v51 }
 0xb62   : > { %4845 = vmatprep.mubr.msk.f32.mxu0 %vm5453_vm0, %v5454_v6  ;;  %4860 = vmatprep.mubr.msk.f32.mxu1 %vm5453_vm0, %v5454_v6 }
 0xb65   : > { %4846 = vmatmul.mubr.msk.f32.gmra.mrb[52].mxu0 %vm737_vm2, %v2725_v48  ;;  %4861 = vmatmul.mubr.msk.f32.gmra.mrb[58].mxu1 %vm737_vm2, %v2728_v9 }
 0xb66   : > { %4868 = vmatpush3.xpose.msk.msra.mxu0 %vm737_vm2, %v2624_v21  ;;  %4883 = vmatpush3.xpose.msk.msra.mxu1 %vm737_vm2, %v2624_v21 }
 0xb67   : > { %4869 = vmatprep.mubr.msk.f32.mxu0 %vm5453_vm0, %v5454_v6  ;;  %4884 = vmatprep.mubr.msk.f32.mxu1 %vm5453_vm0, %v5454_v6 }
 0xb68   : > { %5144 = vmatprep.subr.bf16.mxu0 %v5452_v3  ;;  %5147 = vmatprep.subr.bf16.mxu1 %v5452_v3 }
 0xb69   : > { %4870 = vmatmul.mubr.msk.f32.vlgmr.msra.gmra.mrb[54].mxu0 %vm737_vm2, %v2729_v10  ;;  %4885 = vmatmul.mubr.msk.f32.vlgmr.msra.gmra.mrb[60].mxu1 %vm737_vm2, %v2732_v62 }
 0xb6a   : > { %5146 = vmatpush3.bf16.msra.mxu0 %v5145_v42  ;;  %5149 = vmatpush3.bf16.msra.mxu1 %v5148_v43 }
 0xb6b   : > { %4872 = vmatprep.mubr.msk.f32.mxu0 %vm5453_vm0, %v5454_v6  ;;  %4887 = vmatprep.mubr.msk.f32.mxu1 %vm5453_vm0, %v5454_v6 }
 0xb6c   : > { %4897 = vmatprep.subr.mxu0 %v5454_v6  ;;  %4912 = vmatprep.subr.mxu1 %v5454_v6 }
 0xb6d   : > { %4873 = vmatmul.mubr.msk.f32.gmra.mrb[56].mxu0 %vm737_vm2, %v2730_v16  ;;  %4888 = vmatmul.mubr.msk.f32.gmra.mrb[62].mxu1 %vm737_vm2, %v2733_v63 }
 0xb6e   : > { %4898 = vmatpush3.msk.msra.mxu0 %vm1638_vm5, %v2737_v19  ;;  %4913 = vmatpush3.msk.msra.mxu1 %vm1638_vm5, %v2740_v17 }
 0xb6f   : > { %4875 = vmatprep.mubr.msk.f32.mxu0 %vm5453_vm0, %v5454_v6  ;;  %4890 = vmatprep.mubr.msk.f32.mxu1 %vm5453_vm0, %v5454_v6 }
 0xb70   : > { %5150 = vmatprep.subr.bf16.mxu0 %v5452_v3  ;;  %5153 = vmatprep.subr.bf16.mxu1 %v5452_v3 }
 0xb71   : > { %4876 = vmatmul.mubr.msk.f32.gmra.mrb[58].mxu0 %vm737_vm2, %v2731_v27  ;;  %4891 = vmatmul.mubr.msk.f32.gmra.mrb[64].mxu1 %vm737_vm2, %v2734_v49 }
 0xb72   : > { %4899 = vmatprep.mubr.msk.f32.mxu0 %vm5453_vm0, %v5454_v6  ;;  %4914 = vmatprep.mubr.msk.f32.mxu1 %vm5453_vm0, %v5454_v6 }
 0xc30   : > { %v2831_v54 = vpop.f32.mrb[48].mxu0  ;;  %v2920_v55 = vpop.f32.mrb[54].mxu1 }
 0xc31   : > { %v4841_v56 = vpop.f32.mrb[49].mxu0  ;;  %v4856_v53 = vpop.f32.mrb[55].mxu1  ;;  %v3121_v24 = vsel %vm1495_vm6, %v2920_v55, -inf  ;;  %v3112_v57 = vsel %vm1495_vm6, %v2831_v54, -inf }
 0xc32   : > { %3122 = vmax.xlane.f32.xlu1 %v3121_v24  ;;  %3113 = vmax.xlane.f32.xlu0 %v3112_v57 }
 0xc34   : > { %v2836_v58 = vpop.f32.mrb[50].mxu0  ;;  %v2925_v59 = vpop.f32.mrb[56].mxu1 }
 0xc35   : > { %v4844_v0 = vpop.f32.mrb[51].mxu0  ;;  %v4859_v1 = vpop.f32.mrb[57].mxu1  ;;  %v3124_v60 = vsel %vm1495_vm6, %v2925_v59, -inf  ;;  %v3115_v61 = vsel %vm1495_vm6, %v2836_v58, -inf }
 0xc36   : > { %3125 = vmax.xlane.f32.xlu1 %v3124_v60  ;;  %3116 = vmax.xlane.f32.xlu0 %v3115_v61 }
 0xc38   : > { %v2841_v29 = vpop.f32.mrb[52].mxu0  ;;  %v2930_v2 = vpop.f32.mrb[58].mxu1 }
 0xc39   : > { %v4847_v12 = vpop.f32.mrb[53].mxu0  ;;  %v4862_v14 = vpop.f32.mrb[59].mxu1  ;;  %v3127_v7 = vsel %vm1502_vm7, %v2930_v2, -inf  ;;  %v3118_v18 = vsel %vm1502_vm7, %v2841_v29, -inf }
 0xc3a   : > { %3128 = vmax.xlane.f32.xlu1 %v3127_v7  ;;  %3119 = vmax.xlane.f32.xlu0 %v3118_v18 }
 0xc3c   : > { %v3009_v21 = vpop.f32.mrb[54].mxu0  ;;  %v3098_v22 = vpop.f32.mrb[60].mxu1 }
 0xc3d   : > { %v4871_v23 = vpop.f32.mrb[55].mxu0  ;;  %v4886_v25 = vpop.f32.mrb[61].mxu1  ;;  %v3139_v28 = vsel %vm1495_vm6, %v3098_v22, -inf  ;;  %v3130_v31 = vsel %vm1495_vm6, %v3009_v21, -inf }
 0xc3e   : > { %3140 = vmax.xlane.f32.xlu1 %v3139_v28  ;;  %3131 = vmax.xlane.f32.xlu0 %v3130_v31 }
 0xc40   : > { %v6419_v13 = vpop.f32.mrb[56].mxu0  ;;  %v6421_v32 = vpop.f32.mrb[62].mxu1 }
 0xc41   : > { %v4874_v33 = vpop.f32.mrb[57].mxu0  ;;  %v4889_v34 = vpop.f32.mrb[63].mxu1 }
 0xc42   : > { %v3133_v33 = vsel %vm1495_vm6, %v6419_v13, -inf  ;;  %v3142_v34 = vsel %vm1495_vm6, %v6421_v32, -inf }
 0xc44   : > { %v6423_v37 = vpop.f32.mrb[58].mxu0  ;;  %v6425_v38 = vpop.f32.mrb[64].mxu1 }
 0xc45   : > { %v4877_v39 = vpop.f32.mrb[59].mxu0  ;;  %v4892_v40 = vpop.f32.mrb[65].mxu1  ;;  %v3136_v31 = vsel %vm1502_vm7, %v6423_v37, -inf }
 0xc46   : > { %v3145_v39 = vsel %vm1502_vm7, %v6425_v38, -inf }
 0xcbf   : > { %v3123_v45 = vpop.xlane.xlu1 %3122  ;;  %v3114_v5 = vpop.xlane.xlu0 %3113 }
 0xcc0   : > { %v3151_v46 = vsub.f32 %v2920_v55, %v3123_v45  ;;  %v3148_v42 = vsub.f32 %v2831_v54, %v3114_v5 }
 0xcc2   : > { %v3166_v43 = vmul.f32 1.442695, %v3151_v46  ;;  %v3160_v26 = vmul.f32 1.442695, %v3148_v42 }
 0xcc3   : > { %v3126_v50 = vpop.xlane.xlu1 %3125  ;;  %v3117_v48 = vpop.xlane.xlu0 %3116 }
 0xcc4   : > { %5314 = vpow2.f32 %v3166_v43  ;;  %v3152_v9 = vsub.f32 %v2925_v59, %v3126_v50  ;;  %v3149_v10 = vsub.f32 %v2836_v58, %v3117_v48 }
 0xcc5   : > { %5316 = vpow2.f32 %v3160_v26 }
 0xcc6   : > { %v3168_v62 = vmul.f32 1.442695, %v3152_v9  ;;  %v3162_v16 = vmul.f32 1.442695, %v3149_v10 }
 0xcc7   : > { %v3129_v63 = vpop.xlane.xlu1 %3128  ;;  %v3120_v19 = vpop.xlane.xlu0 %3119 }
 0xcc8   : > { %5318 = vpow2.f32 %v3168_v62  ;;  %v3153_v17 = vsub.f32 %v2930_v2, %v3129_v63  ;;  %v3150_v27 = vsub.f32 %v2841_v29, %v3120_v19 }
 0xcc9   : > { %5320 = vpow2.f32 %v3162_v16 }
 0xcca   : > { %v3170_v49 = vmul.f32 1.442695, %v3153_v17  ;;  %v3164_v56 = vmul.f32 1.442695, %v3150_v27  ;;  %v2746_v17 = vmul.f32 %v6328_v44, %v6375_v51 }
 0xccb   : > { %v3141_v55 = vpop.xlane.xlu1 %3140  ;;  %v3132_v54 = vpop.xlane.xlu0 %3131 }
 0xccc   : > { %5322 = vpow2.f32 %v3170_v49  ;;  %v3157_v53 = vsub.f32 %v3098_v22, %v3141_v55  ;;  %v3154_v24 = vsub.f32 %v3009_v21, %v3132_v54 }
 0xccd   : > { %5324 = vpow2.f32 %v3164_v56 }
 0xcce   : > { %v5315_v57 = vpop.eup %5314  ;;  %v3178_v59 = vmul.f32 1.442695, %v3157_v53  ;;  %v3172_v58 = vmul.f32 1.442695, %v3154_v24 }
 0xccf   : > { %v5317_v0 = vpop.eup %5316  ;;  %v3193_v1 = vsel %vm1495_vm6, %v5315_v57, 0.0 }
 0xcd0   : > { %5326 = vpow2.f32 %v3178_v59  ;;  %3194 = vadd.xlane.f32.xlu1 %v3193_v1  ;;  %v3184_v60 = vsel %vm1495_vm6, %v5317_v0, 0.0 }
 0xcd1   : > { %5328 = vpow2.f32 %v3172_v58  ;;  %3185 = vadd.xlane.f32.xlu0 %v3184_v60 }
 0xcd2   : > { %v5319_v61 = vpop.eup %5318 }
 0xcd3   : > { %v5321_v29 = vpop.eup %5320  ;;  %v3196_v2 = vsel %vm1495_vm6, %v5319_v61, 0.0 }
 0xcd4   : > { %3197 = vadd.xlane.f32.xlu1 %v3196_v2  ;;  %v3187_v12 = vsel %vm1495_vm6, %v5321_v29, 0.0 }
 0xcd5   : > { %3188 = vadd.xlane.f32.xlu0 %v3187_v12 }
 0xcd6   : > { %v5323_v14 = vpop.eup %5322 }
 0xcd7   : > { %v6431_v7 = vpop.eup %5324  ;;  %v3199_v18 = vsel %vm1502_vm7, %v5323_v14, 0.0 }
 0xcd8   : > { %3200 = vadd.xlane.f32.xlu1 %v3199_v18  ;;  %v3190_v21 = vsel %vm1502_vm7, %v6431_v7, 0.0 }
 0xcd9   : > { %3191 = vadd.xlane.f32.xlu0 %v3190_v21 }
 0xcda   : > { %v6436_v22 = vpop.eup %5326 }
 0xcdb   : > { %v6438_v23 = vpop.eup %5328  ;;  %v3211_v25 = vsel %vm1495_vm6, %v6436_v22, 0.0 }
 0xcdc   : > { %3212 = vadd.xlane.f32.xlu1 %v3211_v25  ;;  %v3202_v28 = vsel %vm1495_vm6, %v6438_v23, 0.0 }
 0xcdd   : > { %3203 = vadd.xlane.f32.xlu0 %v3202_v28 }
 0xce0   : > { %3137 = vmax.xlane.f32.xlu1 %v3136_v31 }
 0xce1   : > { %3134 = vmax.xlane.f32.xlu0 %v3133_v33 }
 0xce5   : > { %3143 = vmax.xlane.f32.xlu0 %v3142_v34 }
 0xce9   : > { %3146 = vmax.xlane.f32.xlu0 %v3145_v39 }
 0xd5d   : > { %v3195_v40 = vpop.xlane.xlu1 %3194 }
 0xd5e   : > { %5330 = vrcp.f32 %v3195_v40  ;;  %v3186_v45 = vpop.xlane.xlu0 %3185 }
 0xd5f   : > { %5332 = vrcp.f32 %v3186_v45 }
 0xd61   : > { %v3198_v5 = vpop.xlane.xlu1 %3197 }
 0xd62   : > { %5334 = vrcp.f32 %v3198_v5  ;;  %v3189_v46 = vpop.xlane.xlu0 %3188 }
 0xd63   : > { %5336 = vrcp.f32 %v3189_v46 }
 0xd65   : > { %v3201_v42 = vpop.xlane.xlu1 %3200 }
 0xd66   : > { %5338 = vrcp.f32 %v3201_v42  ;;  %v3192_v43 = vpop.xlane.xlu0 %3191 }
 0xd67   : > { %5340 = vrcp.f32 %v3192_v43 }
 0xd68   : > { %v5331_v26 = vpop.eup %5330 }
 0xd69   : > { %v5333_v50 = vpop.eup %5332  ;;  %v3235_v48 = vmul.f32 %v5331_v26, %v5315_v57  ;;  %v3213_v9 = vpop.xlane.xlu1 %3212 }
 0xd6a   : > { %v3232_v10 = vmul.f32 %v5333_v50, %v5317_v0  ;;  %5342 = vrcp.f32 %v3213_v9  ;;  %v3204_v62 = vpop.xlane.xlu0 %3203 }
 0xd6b   : > { %5344 = vrcp.f32 %v3204_v62  ;;  %4915 = vmatmul.mubr.msk.f32.vlgmr.msra.gmra.mrb[66].mxu1 %vm1495_vm6, %v3235_v48 }
 0xd6c   : > { %v5335_v16 = vpop.eup %5334  ;;  %4900 = vmatmul.mubr.msk.f32.vlgmr.msra.gmra.mrb[60].mxu0 %vm1495_vm6, %v3232_v10  ;;  %5155 = vmatpush3.bf16.msra.mxu1 %v5154_v41 }
 0xd6d   : > { %v5337_v63 = vpop.eup %5336  ;;  %5152 = vmatpush3.bf16.msra.mxu0 %v5151_v52  ;;  %4902 = vmatprep.mubr.msk.f32.mxu0 %vm5453_vm0, %v5454_v6  ;;  %v3236_v19 = vmul.f32 %v5335_v16, %v5319_v61  ;;  %v3138_v60 = vpop.xlane.xlu1 %3137 }
 0xd6e   : > { %v3135_v27 = vpop.xlane.xlu0 %3134  ;;  %4917 = vmatprep.mubr.msk.f32.mxu1 %vm5453_vm0, %v5454_v6  ;;  %4927 = vmatprep.subr.mxu0 %v5454_v6  ;;  %v3233_v35 = vmul.f32 %v5337_v63, %v5321_v29 }
 0xd6f   : > { %4942 = vmatprep.subr.mxu1 %v5454_v6  ;;  %4918 = vmatmul.mubr.msk.f32.gmra.mrb[68].mxu1 %vm1495_vm6, %v3236_v19  ;;  %v3155_v1 = vsub.f32 %v6419_v13, %v3135_v27 }
 0xd70   : > { %v5339_v4 = vpop.eup %5338  ;;  %4903 = vmatmul.mubr.msk.f32.gmra.mrb[62].mxu0 %vm1495_vm6, %v3233_v35  ;;  %4943 = vmatpush3.msk.msra.mxu1 %vm1638_vm5, %v2746_v17 }
 0xd71   : > { %v5341_v44 = vpop.eup %5340  ;;  %4928 = vmatpush3.msk.msra.mxu0 %vm1638_vm5, %v2743_v30  ;;  %4905 = vmatprep.mubr.msk.f32.mxu0 %vm5453_vm0, %v5454_v6  ;;  %v3237_v36 = vmul.f32 %v5339_v4, %v5323_v14  ;;  %v3174_v21 = vmul.f32 1.442695, %v3155_v1 }
 0xd72   : > { %v6476_v52 = vpop.xlane.xlu0 %3143  ;;  %4920 = vmatprep.mubr.msk.f32.mxu1 %vm5453_vm0, %v5454_v6  ;;  %v3234_v20 = vmul.f32 %v5341_v44, %v6431_v7  ;;  %5156 = vmatprep.subr.bf16.mxu0 %v5452_v3 }
 0xd73   : > { %v3158_v41 = vsub.f32 %v6421_v32, %v6476_v52  ;;  %4921 = vmatmul.mubr.msk.f32.gmra.mrb[70].mxu1 %vm1495_vm6, %v3237_v36  ;;  %5162 = vmatprep.subr.bf16.mxu1 %v5452_v3  ;;  %5346 = vpow2.f32 %v3174_v21  ;;  %v6556_v21 = vld [vmem:[%s6744_s13 + $0x1] ss:$0 sm:$0xff] }
 0xd74   : > { %v5343_v51 = vpop.eup %5342  ;;  %4906 = vmatmul.mubr.msk.f32.gmra.mrb[64].mxu0 %vm1495_vm6, %v3234_v20  ;;  %4944 = vmatprep.mubr.msk.f32.mxu1 %vm5453_vm0, %v5454_v6 }
 0xd75   : > { %v5345_v49 = vpop.eup %5344  ;;  %v3241_v56 = vmul.f32 %v5343_v51, %v6436_v22  ;;  %4929 = vmatprep.mubr.msk.f32.mxu0 %vm5453_vm0, %v5454_v6  ;;  %v3156_v22 = vsub.f32 %v6423_v37, %v3138_v60 }
 0xd76   : > { %v3238_v55 = vmul.f32 %v5345_v49, %v6438_v23  ;;  %v3147_v23 = vpop.xlane.xlu0 %3146 }
 0xd77   : > { %4945 = vmatmul.mubr.msk.f32.vlgmr.msra.gmra.mrb[72].mxu1 %vm1495_vm6, %v3241_v56  ;;  %v3176_v40 = vmul.f32 1.442695, %v3156_v22  ;;  %v3159_v45 = vsub.f32 %v6425_v38, %v3147_v23 }
 0xd78   : > { %4930 = vmatmul.mubr.msk.f32.vlgmr.msra.gmra.mrb[66].mxu0 %vm1495_vm6, %v3238_v55  ;;  %4947 = vmatprep.mubr.msk.f32.mxu1 %vm5453_vm0, %v5454_v6 }
 0xd79   : > { %4932 = vmatprep.mubr.msk.f32.mxu0 %vm5453_vm0, %v5454_v6  ;;  %5348 = vpow2.f32 %v3176_v40  ;;  %v3182_v50 = vmul.f32 1.442695, %v3159_v45 }
 0xd7b   : > { %5350 = vpow2.f32 %v3182_v50 }
 0xd7d   : > { %v5347_v38 = vpop.eup %5346 }
 0xd7e   : > { %v3205_v16 = vsel %vm1495_vm6, %v5347_v38, 0.0 }
 0xd83   : > { %v5349_v63 = vpop.eup %5348 }
 0xd84   : > { %v3208_v19 = vsel %vm1502_vm7, %v5349_v63, 0.0 }
 0xd85   : > { %v5351_v17 = vpop.eup %5350 }
 0xd86   : > { %v3217_v27 = vsel %vm1502_vm7, %v5351_v17, 0.0 }
 0xe3e   : > { %v3414_v54 = vpop.f32.mrb[66].mxu1 }
 0xe3f   : > { %v3322_v53 = vpop.f32.mrb[60].mxu0  ;;  %v3613_v24 = vsel %vm737_vm2, %v3414_v54, 0.0  ;;  %v4916_v57 = vpop.f32.mrb[67].mxu1  ;;  %v4291_v54 = vld [vmem:[%s6745_s14 + $0x20] sm:$0xff] }
 0xe40   : > { %v3612_v59 = vsel %vm737_vm2, %v3322_v53, 0.0  ;;  %v4901_v58 = vpop.f32.mrb[61].mxu0  ;;  %v4292_v53 = vld [vmem:[%s6745_s14 + $0x28] sm:$0xff]  ;;  %v4293_v57 = vld [vmem:[%s6745_s14 + $0x30] sm:$0xff] }
 0xe41   : > { %v3614_v0 = vadd.f32 %v3613_v24, %v3612_v59  ;;  %v5157_v24 = vpack.c.bf16 %v4292_v53, %v4291_v54  ;;  %v4294_v59 = vld [vmem:[%s6745_s14 + $0x38] sm:$0xff] }
 0xe42   : > { %v3419_v61 = vpop.f32.mrb[68].mxu1  ;;  %v5160_v58 = vpack.c.bf16 %v4294_v59, %v4293_v57 }
 0xe43   : > { %v3327_v29 = vpop.f32.mrb[62].mxu0  ;;  %v3620_v2 = vsel %vm737_vm2, %v3419_v61, 0.0  ;;  %v4919_v12 = vpop.f32.mrb[69].mxu1  ;;  %5158 = vmatpush3.bf16.msra.mxu0 %v5157_v24 }
 0xe44   : > { %v3619_v14 = vsel %vm737_vm2, %v3327_v29, 0.0  ;;  %v4904_v7 = vpop.f32.mrb[63].mxu0  ;;  %5159 = vmatprep.subr.bf16.mxu0 %v5452_v3  ;;  %v6551_v12 = vld [vmem:[%s6743_s12 + $0x1] ss:$0 sm:$0xff] }
 0xe45   : > { %v6504_v18 = vadd.f32 %v3620_v2, %v3619_v14 }
 0xe46   : > { %v3424_v25 = vpop.f32.mrb[70].mxu1 }
 0xe47   : > { %v3332_v28 = vpop.f32.mrb[64].mxu0  ;;  %v3627_v31 = vsel %vm744_vm3, %v3424_v25, 0.0  ;;  %v4922_v13 = vpop.f32.mrb[71].mxu1  ;;  %5161 = vmatpush3.bf16.msra.mxu0 %v5160_v58 }
 0xe48   : > { %v3626_v33 = vsel %vm744_vm3, %v3332_v28, 0.0  ;;  %v4907_v34 = vpop.f32.mrb[65].mxu0  ;;  %5186 = vmatprep.subr.bf16.mxu0 %v5452_v3 }
 0xe49   : > { %v6509_v39 = vadd.f32 %v3627_v31, %v3626_v33 }
 0xe4a   : > { %v3598_v5 = vpop.f32.mrb[72].mxu1 }
 0xe4b   : > { %v3506_v46 = vpop.f32.mrb[66].mxu0  ;;  %v4946_v42 = vpop.f32.mrb[73].mxu1  ;;  %v3617_v48 = vsel %vm737_vm2, %v3598_v5, 0.0 }
 0xe4c   : > { %v3615_v37 = vsel %vm737_vm2, %v3506_v46, 0.0  ;;  %v4931_v43 = vpop.f32.mrb[67].mxu0 }
 0xe4d   : > { %v3616_v26 = vadd.f32 %v3615_v37, %v3614_v0  ;;  %v4300_v37 = vld [vmem:[%s6747_s16 + $0x80] sm:$0xff]  ;;  %v4301_v43 = vld [vmem:[%s6747_s16 + $0x88] sm:$0xff] }
 0xe4f   : > { %v3618_v9 = vadd.f32 %v3617_v48, %v3616_v26  ;;  %v5163_v26 = vpack.c.bf16 %v4301_v43, %v4300_v37  ;;  %v4304_v48 = vld [vmem:[%s6747_s16 + $0xa0] sm:$0xff] }
 0xe51   : > { %v6515_v10 = vadd.f32 %v3618_v9, %v6187_v47  ;;  %v3180_v47 = vmul.f32 1.442695, %v3158_v41  ;;  %5164 = vmatpush3.bf16.msra.mxu1 %v5163_v26  ;;  %v4305_v9 = vld [vmem:[%s6747_s16 + $0xa8] sm:$0xff] }
 0xe52   : > { %5165 = vmatprep.subr.bf16.mxu1 %v5452_v3 }
 0xe53   : > { %v3640_v62 = vsel %vm737_vm2, %v6515_v10, 0.0  ;;  %5352 = vpow2.f32 %v3180_v47  ;;  %v4310_v47 = vld [vmem:[%s6747_s16 + $0xd0] sm:$0xff] }
 0xe54   : > { %3641 = vadd.xlane.f32.xlu1 %v3640_v62  ;;  %v5169_v62 = vpack.c.bf16 %v4305_v9, %v4304_v48 }
 0xe58   : > { %3206 = vadd.xlane.f32.xlu1 %v3205_v16  ;;  %v4307_v16 = vld [vmem:[%s6747_s16 + $0xb8] sm:$0xff] }
 0xe5c   : > { %3209 = vadd.xlane.f32.xlu1 %v3208_v19  ;;  %v4308_v19 = vld [vmem:[%s6747_s16 + $0xc0] sm:$0xff] }
 0xe5d   : > { %v5353_v51 = vpop.eup %5352 }
 0xe5e   : > { %v3214_v56 = vsel %vm1495_vm6, %v5353_v51, 0.0 }
 0xe60   : > { %3218 = vadd.xlane.f32.xlu1 %v3217_v27 }
 0xee1   : > { %v3642_v35 = vpop.xlane.xlu1 %3641 }
 0xee2   : > { %v3649_v30 = vmul.f32 0.03125, %v3642_v35  ;;  %v4311_v35 = vld [vmem:[%s6747_s16 + $0xd8] sm:$0xff] }
 0xee4   : > { %v3652_v4 = vsub.f32 %v6515_v10, %v3649_v30  ;;  %v5178_v30 = vpack.c.bf16 %v4311_v35, %v4310_v47 }
 0xee5   : > { %v3207_v44 = vpop.xlane.xlu1 %3206 }
 0xee6   : > { %5354 = vrcp.f32 %v3207_v44  ;;  %v3655_v36 = vmul.f32 %v3652_v4, %v3652_v4  ;;  %v4313_v44 = vld [vmem:[%s6747_s16 + $0xe8] sm:$0xff] }
 0xee8   : > { %v3658_v20 = vsel %vm737_vm2, %v3655_v36, 0.0 }
 0xee9   : > { %3659 = vadd.xlane.f32.xlu0 %v3658_v20  ;;  %v3210_v49 = vpop.xlane.xlu1 %3209  ;;  %v4314_v20 = vld [vmem:[%s6747_s16 + $0xf0] sm:$0xff] }
 0xeea   : > { %5356 = vrcp.f32 %v3210_v49 }
 0xeed   : > { %3215 = vadd.xlane.f32.xlu0 %v3214_v56  ;;  %v3219_v29 = vpop.xlane.xlu1 %3218 }
 0xef0   : > { %v5355_v55 = vpop.eup %5354 }
 0xef1   : > { %v3239_v32 = vmul.f32 %v5355_v55, %v5347_v38  ;;  %v4306_v38 = vld [vmem:[%s6747_s16 + $0xb0] sm:$0xff] }
 0xef3   : > { %4933 = vmatmul.mubr.msk.f32.gmra.mrb[68].mxu0 %vm1495_vm6, %v3239_v32 }
 0xef4   : > { %v5357_v52 = vpop.eup %5356  ;;  %4935 = vmatprep.mubr.msk.f32.mxu0 %vm5453_vm0, %v5454_v6 }
 0xef5   : > { %v3240_v41 = vmul.f32 %v5357_v52, %v5349_v63  ;;  %v5172_v63 = vpack.c.bf16 %v4307_v16, %v4306_v38  ;;  %v6632_v52 = vld [vmem:[%s6746_s15 + $0x1] ss:$0 sm:$0xff] }
 0xef7   : > { %4936 = vmatmul.mubr.msk.f32.gmra.mrb[70].mxu0 %vm1495_vm6, %v3240_v41 }
 0xef8   : > { %4961 = vmatprep.mubr.msk.f32.mxu0 %vm5453_vm0, %v5454_v6 }
 0xf76   : > { %v3660_v0 = vpop.xlane.xlu0 %3659 }
 0xf77   : > { %v3667_v1 = vmul.f32 0.03125, %v3660_v0 }
 0xf79   : > { %v3670_v60 = vadd.f32 1e-05, %v3667_v1 }
 0xf7a   : > { %v3216_v61 = vpop.xlane.xlu0 %3215 }
 0xf7b   : > { %5358 = vrsqrt.f32 %v3670_v60 }
 0xf7c   : > { %5360 = vrcp.f32 %v3216_v61 }
 0xf7d   : > { %5362 = vrcp.f32 %v3219_v29 }
 0xf85   : > { %v5359_v2 = vpop.eup %5358 }
 0xf86   : > { %v5361_v14 = vpop.eup %5360  ;;  %v3676_v7 = vmul.f32 %v5359_v2, %v3652_v4  ;;  %v4312_v4 = vld [vmem:[%s6747_s16 + $0xe0] sm:$0xff] }
 0xf87   : > { %v3242_v22 = vmul.f32 %v5361_v14, %v5353_v51  ;;  %v5363_v23 = vpop.eup %5362  ;;  %v5181_v36 = vpack.c.bf16 %v4313_v44, %v4312_v4  ;;  %v4315_v51 = vld [vmem:[%s6747_s16 + $0xf8] sm:$0xff]  ;;  %v3986_v4 = vld [vmem:[%s6749_s18 + $0x8] sm:$0xff] }
 0xf88   : > { %v3685_v25 = vmul.f32 %v6551_v12, %v3676_v7  ;;  %v3243_v31 = vmul.f32 %v5363_v23, %v5351_v17  ;;  %v4309_v17 = vld [vmem:[%s6747_s16 + $0xc8] sm:$0xff]  ;;  %v5184_v49 = vpack.c.bf16 %v4315_v51, %v4314_v20  ;;  %v3988_v20 = vld [vmem:[%s6749_s18 + $0x18] sm:$0xff] }
 0xf89   : > { %4948 = vmatmul.mubr.msk.f32.gmra.mrb[74].mxu1 %vm1495_vm6, %v3242_v22  ;;  %v5175_v27 = vpack.c.bf16 %v4309_v17, %v4308_v19 }
 0xf8a   : > { %v3694_v28 = vadd.f32 %v6556_v21, %v3685_v25  ;;  %4950 = vmatprep.mubr.msk.f32.mxu1 %vm5453_vm0, %v5454_v6 }
 0xf8c   : > { %4962 = vmatmul.mubr.msk.f32.vlgmr.msra.gmra.mrb[72].mxu0 %vm737_vm2, %v3694_v28 }
 0xf8d   : > { %4951 = vmatmul.mubr.msk.f32.gmra.mrb[76].mxu1 %vm1495_vm6, %v3243_v31  ;;  %4964 = vmatprep.mubr.msk.f32.mxu0 %vm5453_vm0, %v5454_v6 }
 0xf8e   : > { %5002 = vmatprep.mubr.msk.f32.mxu1 %vm5453_vm0, %v5454_v6 }
 0xfc6   : > { %v3511_v13 = vpop.f32.mrb[68].mxu0 }
 0xfc7   : > { %v3622_v33 = vsel %vm737_vm2, %v3511_v13, 0.0  ;;  %v4934_v34 = vpop.f32.mrb[69].mxu0 }
 0xfc8   : > { %v3623_v40 = vadd.f32 %v3622_v33, %v6504_v18  ;;  %v4302_v18 = vld [vmem:[%s6747_s16 + $0x90] sm:$0xff] }
 0xfca   : > { %v3516_v45 = vpop.f32.mrb[70].mxu0 }
 0xfcb   : > { %v3629_v5 = vsel %vm744_vm3, %v3516_v45, 0.0  ;;  %v4937_v46 = vpop.f32.mrb[71].mxu0 }
 0xfcc   : > { %v3630_v42 = vadd.f32 %v3629_v5, %v6509_v39  ;;  %v4303_v39 = vld [vmem:[%s6747_s16 + $0x98] sm:$0xff] }
 0xfcd   : > { %v5166_v50 = vpack.c.bf16 %v4303_v39, %v4302_v18 }
 0xfcf   : > { %5167 = vmatpush3.bf16.msra.mxu1 %v5166_v50 }
 0xfd0   : > { %5168 = vmatprep.subr.bf16.mxu1 %v5452_v3 }
 0xfd3   : > { %5170 = vmatpush3.bf16.msra.mxu1 %v5169_v62 }
 0xfd4   : > { %5171 = vmatprep.subr.bf16.mxu1 %v5452_v3 }
 0xfd7   : > { %5173 = vmatpush3.bf16.msra.mxu1 %v5172_v63 }
 0xfd8   : > { %5174 = vmatprep.subr.bf16.mxu1 %v5452_v3 }
 0xfdb   : > { %5176 = vmatpush3.bf16.msra.mxu1 %v5175_v27 }
 0xfdc   : > { %5177 = vmatprep.subr.bf16.mxu1 %v5452_v3 }
 0xfdf   : > { %5179 = vmatpush3.bf16.msra.mxu1 %v5178_v30  ;;  %v3985_v30 = vld [vmem:[%s6749_s18] sm:$0xff] }
 0xfe0   : > { %5180 = vmatprep.subr.bf16.mxu1 %v5452_v3  ;;  %v5187_v44 = vpack.c.bf16 %v3986_v4, %v3985_v30 }
 0xfe2   : > { %5188 = vmatpush3.bf16.msra.mxu0 %v5187_v44 }
 0xfe3   : > { %5182 = vmatpush3.bf16.msra.mxu1 %v5181_v36  ;;  %5189 = vmatprep.subr.bf16.mxu0 %v5452_v3  ;;  %v3987_v36 = vld [vmem:[%s6749_s18 + $0x10] sm:$0xff] }
 0xfe4   : > { %5183 = vmatprep.subr.bf16.mxu1 %v5452_v3  ;;  %v5190_v51 = vpack.c.bf16 %v3988_v20, %v3987_v36 }
 0xfe6   : > { %5191 = vmatpush3.bf16.msra.mxu0 %v5190_v51 }
 0xfe7   : > { %5185 = vmatpush3.bf16.msra.mxu1 %v5184_v49 }
0x105c   : > { %v3603_v56 = vpop.f32.mrb[74].mxu1 }
0x105d   : > { %v3624_v55 = vsel %vm737_vm2, %v3603_v56, 0.0  ;;  %v4949_v32 = vpop.f32.mrb[75].mxu1 }
0x105e   : > { %v3625_v41 = vadd.f32 %v3624_v55, %v3623_v40 }
0x105f   : > { %v3785_v54 = vpop.f32.mrb[72].mxu0 }
0x1060   : > { %v3608_v53 = vpop.f32.mrb[76].mxu1  ;;  %v3786_v24 = vadd.f32 %v6632_v52, %v3785_v54  ;;  %v4963_v57 = vpop.f32.mrb[73].mxu0  ;;  %v3634_v59 = vadd.f32 %v3625_v41, %v6192_v8 }
0x1061   : > { %v3631_v58 = vsel %vm744_vm3, %v3608_v53, 0.0  ;;  %v4952_v0 = vpop.f32.mrb[77].mxu1 }
0x1062   : > { %v3632_v1 = vadd.f32 %v3631_v58, %v3630_v42  ;;  %v3799_v60 = vmul.f32 0.70710677, %v3786_v24  ;;  %v3643_v61 = vsel %vm737_vm2, %v3634_v59, 0.0  ;;  %v3871_v39 = vmul.f32 0.5, %v3786_v24 }
0x1063   : > { %3644 = vadd.xlane.f32.xlu0 %v3643_v61 }
0x1064   : > { %v3808_v29 = vand.u32 2147483647, %v3799_v60  ;;  %v3635_v2 = vadd.f32 %v3632_v1, %v6197_v11  ;;  %vm3802_vm11 = vcmp.ge.f32.partialorder %v3799_v60, 0.0 }
0x1065   : > { %v3805_v26 = vsel %vm3802_vm11, 1.0, %v5455_v15 }
0x1066   : > { %v3811_v14 = vmul.f32 0.3275911, %v3808_v29  ;;  %v3646_v7 = vsel %vm744_vm3, %v3635_v2, 0.0  ;;  %v3850_v23 = vsub.f32 0.0, %v3808_v29 }
0x1067   : > { %3647 = vadd.xlane.f32.xlu1 %v3646_v7 }
0x1068   : > { %v3814_v22 = vadd.f32 1.0, %v3811_v14  ;;  %v3853_v8 = vmul.f32 %v3850_v23, %v3808_v29 }
0x106a   : > { %5364 = vrcp.f32 %v3814_v22  ;;  %v3856_v13 = vmul.f32 1.442695, %v3853_v8 }
0x106c   : > { %5366 = vpow2.f32 %v3856_v13  ;;  %v3989_v13 = vld [vmem:[%s6750_s19] sm:$0x1] }
0x1074   : > { %v5365_v25 = vpop.eup %5364 }
0x1075   : > { %v3823_v28 = vmul.f32 1.0614054, %v5365_v25 }
0x1076   : > { %v5367_v42 = vpop.eup %5366 }
0x1077   : > { %v3826_v31 = vadd.f32 -1.4531521, %v3823_v28 }
0x1079   : > { %v3829_v33 = vmul.f32 %v5365_v25, %v3826_v31 }
0x107b   : > { %v3832_v34 = vadd.f32 1.4214138, %v3829_v33 }
0x107d   : > { %v3835_v40 = vmul.f32 %v5365_v25, %v3832_v34 }
0x107f   : > { %v3838_v45 = vadd.f32 -0.28449672, %v3835_v40 }
0x1081   : > { %v3841_v5 = vmul.f32 %v5365_v25, %v3838_v45 }
0x1083   : > { %v3844_v46 = vadd.f32 0.2548296, %v3841_v5 }
0x1085   : > { %v3847_v11 = vmul.f32 %v5365_v25, %v3844_v46 }
0x1087   : > { %v3862_v37 = vmul.f32 %v5367_v42, %v3847_v11 }
0x1089   : > { %v3865_v43 = vsub.f32 1.0, %v3862_v37 }
0x108b   : > { %v3868_v18 = vmul.f32 %v3865_v43, %v3805_v26 }
0x108d   : > { %v3874_v50 = vadd.f32 1.0, %v3868_v18 }
0x108f   : > { %v3877_v48 = vmul.f32 %v3874_v50, %v3871_v39 }
0x1091   : > { %5003 = vmatmul.mubr.f32.vlgmr.msra.gmra.mrb[78].mxu1 %v3877_v48 }
0x1092   : > { %5005 = vmatprep.mubr.msk.f32.mxu1 %vm5453_vm0, %v5454_v6 }
0x10f0   : > { %v3645_v9 = vpop.xlane.xlu0 %3644 }
0x10f1   : > { %v3650_v62 = vmul.f32 0.03125, %v3645_v9 }
0x10f3   : > { %v3653_v38 = vsub.f32 %v3634_v59, %v3650_v62 }
0x10f4   : > { %v3648_v16 = vpop.xlane.xlu1 %3647 }
0x10f5   : > { %v3651_v63 = vmul.f32 0.03125, %v3648_v16  ;;  %v3656_v19 = vmul.f32 %v3653_v38, %v3653_v38 }
0x10f7   : > { %v3654_v17 = vsub.f32 %v3635_v2, %v3651_v63  ;;  %v3661_v27 = vsel %vm737_vm2, %v3656_v19, 0.0  ;;  %v4317_v2 = vld [vmem:[%s6748_s17 + $0x1] ss:$0 sm:$0xff] }
0x10f8   : > { %3662 = vadd.xlane.f32.xlu0 %v3661_v27 }
0x10f9   : > { %v3657_v47 = vmul.f32 %v3654_v17, %v3654_v17 }
0x10fb   : > { %v3664_v35 = vsel %vm744_vm3, %v3657_v47, 0.0 }
0x10fc   : > { %3665 = vadd.xlane.f32.xlu1 %v3664_v35 }
0x1164   : > { %v3963_v49 = vpop.f32.mrb[78].mxu1 }
0x1165   : > { %v5004_v56 = vpop.f32.mrb[79].mxu1  ;;  %v3975_v61 = vadd.f32 %v3963_v49, %v6515_v10 }
0x1167   : > { %v3984_v14 = vadd.f32 %v4317_v2, %v3975_v61 }
0x1185   : > { %v3663_v55 = vpop.xlane.xlu0 %3662 }
0x1186   : > { %v3668_v32 = vmul.f32 0.03125, %v3663_v55 }
0x1188   : > { %v3671_v41 = vadd.f32 1e-05, %v3668_v32 }
0x1189   : > { %v3666_v54 = vpop.xlane.xlu1 %3665 }
0x118a   : > { %5368 = vrsqrt.f32 %v3671_v41  ;;  %v3669_v53 = vmul.f32 0.03125, %v3666_v54 }
0x118c   : > { %v3672_v24 = vadd.f32 1e-05, %v3669_v53 }
0x118e   : > { %5370 = vrsqrt.f32 %v3672_v24 }
0x1194   : > { %v5369_v3 = vpop.eup %5368 }
0x1195   : > { %v3677_v57 = vmul.f32 %v5369_v3, %v3653_v38 }
0x1197   : > { %v3686_v59 = vmul.f32 %v6551_v12, %v3677_v57 }
0x1198   : > { %v5371_v58 = vpop.eup %5370 }
0x1199   : > { %v3695_v0 = vadd.f32 %v6556_v21, %v3686_v59  ;;  %v3678_v1 = vmul.f32 %v5371_v58, %v3654_v17 }
0x119b   : > { %4965 = vmatmul.mubr.msk.f32.gmra.mrb[74].mxu0 %vm737_vm2, %v3695_v0  ;;  %v3687_v60 = vmul.f32 %v6551_v12, %v3678_v1 }
0x119c   : > { %4967 = vmatprep.mubr.msk.f32.mxu0 %vm5453_vm0, %v5454_v6 }
0x119d   : > { %v3696_v29 = vadd.f32 %v6556_v21, %v3687_v60 }
0x119f   : > { %4968 = vmatmul.mubr.msk.f32.gmra.mrb[76].mxu0 %vm737_vm2, %v3696_v29 }
0x11a0   : > { %5019 = vmatprep.mubr.msk.f32.mxu0 %vm5453_vm0, %v5454_v6 }
0x11a3   : > { %5020 = vmatmul.mubr.msk.f32.vlgmr.msra.gmra.mrb[78].mxu0 %vm737_vm2, %v3984_v14 }
0x126e   : > { %v3790_v12 = vpop.f32.mrb[74].mxu0 }
0x126f   : > { %v3791_v7 = vadd.f32 %v6632_v52, %v3790_v12  ;;  %v4966_v22 = vpop.f32.mrb[75].mxu0 }
0x1271   : > { %v3800_v23 = vmul.f32 0.70710677, %v3791_v7  ;;  %v3872_v57 = vmul.f32 0.5, %v3791_v7 }
0x1272   : > { %v3795_v10 = vpop.f32.mrb[76].mxu0 }
0x1273   : > { %v3809_v25 = vand.u32 2147483647, %v3800_v23  ;;  %v3796_v21 = vadd.f32 %v6632_v52, %v3795_v10  ;;  %v4969_v8 = vpop.f32.mrb[77].mxu0  ;;  %vm3803_vm12 = vcmp.ge.f32.partialorder %v3800_v23, 0.0 }
0x1274   : > { %v3806_v53 = vsel %vm3803_vm12, 1.0, %v5455_v15 }
0x1275   : > { %v3812_v28 = vmul.f32 0.3275911, %v3809_v25  ;;  %v3801_v31 = vmul.f32 0.70710677, %v3796_v21  ;;  %v3851_v52 = vsub.f32 0.0, %v3809_v25  ;;  %v3873_v61 = vmul.f32 0.5, %v3796_v21 }
0x1276   : > { %v4059_v33 = vpop.f32.mrb[78].mxu0 }
0x1277   : > { %v3815_v34 = vadd.f32 1.0, %v3812_v28  ;;  %v3810_v40 = vand.u32 2147483647, %v3801_v31  ;;  %v5021_v45 = vpop.f32.mrb[79].mxu0  ;;  %v4060_v5 = vadd.f32 %v4059_v33, %v3989_v13  ;;  %v3854_v43 = vmul.f32 %v3851_v52, %v3809_v25 }
0x1278   : > { %vm3804_vm13 = vcmp.ge.f32.partialorder %v3801_v31, 0.0 }
0x1279   : > { %5372 = vrcp.f32 %v3815_v34  ;;  %v3813_v46 = vmul.f32 0.3275911, %v3810_v40  ;;  %v4063_v11 = vsel %vm1638_vm5, %v4060_v5, -inf  ;;  %v3852_v26 = vsub.f32 0.0, %v3810_v40 }
0x127a   : > { %4064 = vmax.xlane.f32.xlu0 %v4063_v11  ;;  %v3858_v48 = vmul.f32 1.442695, %v3854_v43  ;;  %v3807_v0 = vsel %vm3804_vm13, 1.0, %v5455_v15 }
0x127b   : > { %v3816_v42 = vadd.f32 1.0, %v3813_v46  ;;  %v3855_v9 = vmul.f32 %v3852_v26, %v3810_v40 }
0x127d   : > { %5374 = vrcp.f32 %v3816_v42  ;;  %v3860_v19 = vmul.f32 1.442695, %v3855_v9 }
0x127e   : > { %5376 = vpow2.f32 %v3858_v48 }
0x127f   : > { %5378 = vpow2.f32 %v3860_v19 }
0x1283   : > { %v5373_v37 = vpop.eup %5372 }
0x1284   : > { %v3824_v18 = vmul.f32 1.0614054, %v5373_v37 }
0x1286   : > { %v3827_v39 = vadd.f32 -1.4531521, %v3824_v18 }
0x1287   : > { %v5375_v50 = vpop.eup %5374 }
0x1288   : > { %v3830_v62 = vmul.f32 %v5373_v37, %v3827_v39  ;;  %v3825_v38 = vmul.f32 1.0614054, %v5375_v50  ;;  %v5377_v49 = vpop.eup %5376 }
0x1289   : > { %v5379_v54 = vpop.eup %5378 }
0x128a   : > { %v3833_v16 = vadd.f32 1.4214138, %v3830_v62  ;;  %v3828_v63 = vadd.f32 -1.4531521, %v3825_v38 }
0x128c   : > { %v3836_v17 = vmul.f32 %v5373_v37, %v3833_v16  ;;  %v3831_v27 = vmul.f32 %v5375_v50, %v3828_v63 }
0x128e   : > { %v3839_v47 = vadd.f32 -0.28449672, %v3836_v17  ;;  %v3834_v35 = vadd.f32 1.4214138, %v3831_v27 }
0x1290   : > { %v3842_v30 = vmul.f32 %v5373_v37, %v3839_v47  ;;  %v3837_v4 = vmul.f32 %v5375_v50, %v3834_v35 }
0x1292   : > { %v3845_v44 = vadd.f32 0.2548296, %v3842_v30  ;;  %v3840_v36 = vadd.f32 -0.28449672, %v3837_v4 }
0x1294   : > { %v3848_v20 = vmul.f32 %v5373_v37, %v3845_v44  ;;  %v3843_v51 = vmul.f32 %v5375_v50, %v3840_v36 }
0x1296   : > { %v3863_v56 = vmul.f32 %v5377_v49, %v3848_v20  ;;  %v3846_v55 = vadd.f32 0.2548296, %v3843_v51 }
0x1298   : > { %v3866_v32 = vsub.f32 1.0, %v3863_v56  ;;  %v3849_v41 = vmul.f32 %v5375_v50, %v3846_v55 }
0x129a   : > { %v3869_v24 = vmul.f32 %v3866_v32, %v3806_v53  ;;  %v3864_v3 = vmul.f32 %v5379_v54, %v3849_v41 }
0x129c   : > { %v3875_v59 = vadd.f32 1.0, %v3869_v24  ;;  %v3867_v58 = vsub.f32 1.0, %v3864_v3 }
0x129e   : > { %v3878_v1 = vmul.f32 %v3875_v59, %v3872_v57  ;;  %v3870_v60 = vmul.f32 %v3867_v58, %v3807_v0 }
0x12a0   : > { %5006 = vmatmul.mubr.f32.gmra.mrb[80].mxu1 %v3878_v1  ;;  %v3876_v29 = vadd.f32 1.0, %v3870_v60 }
0x12a1   : > { %5008 = vmatprep.mubr.msk.f32.mxu1 %vm5453_vm0, %v5454_v6 }
0x12a2   : > { %v3879_v2 = vmul.f32 %v3876_v29, %v3873_v61 }
0x12a4   : > { %5009 = vmatmul.mubr.f32.gmra.mrb[82].mxu1 %v3879_v2 }
0x1307   : > { %v4065_v14 = vpop.xlane.xlu0 %4064 }
0x1308   : > { %v4066_v12 = vsub.f32 %v4060_v5, %v4065_v14 }
0x130a   : > { %v4067_v22 = vmul.f32 1.442695, %v4066_v12 }
0x130c   : > { %5380 = vpow2.f32 %v4067_v22 }
0x1316   : > { %v5381_v7 = vpop.eup %5380 }
0x1317   : > { %v4069_v23 = vsel %vm1638_vm5, %v5381_v7, 0.0 }
0x1318   : > { %4070 = vadd.xlane.f32.xlu1 %v4069_v23 }
0x1373   : > { %v3968_v15 = vpop.f32.mrb[80].mxu1 }
0x1374   : > { %v5007_v10 = vpop.f32.mrb[81].mxu1 }
0x1377   : > { %v3972_v25 = vpop.f32.mrb[82].mxu1 }
0x1378   : > { %v5010_v21 = vpop.f32.mrb[83].mxu1 }
0x13a5   : > { %v4071_v8 = vpop.xlane.xlu1 %4070 }
0x13a6   : > { %5382 = vrcp.f32 %v4071_v8 }
0x13b0   : > { %v5383_v6 = vpop.eup %5382 }
0x13b1   : > { %v4073_v28 = vmul.f32 %v5383_v6, %v5381_v7 }
0x13b3   : > { %4074 = vst [vmem:[%s621_s1] sm:$0x1] %v4073_v28 }
0x13b4   : > { %5401 = shalt.err (!%p5398_p3)
}
0x13b5   : > { %s5402_s3 = scalar_lea.hbm %s6689_s27, 16  ;;  %s5406_s25 = scalar_lea.hbm %s6751_s20, 32 }
0x13b6   : > { %p5403_p4 = scmp.ne.s32.totalorder %s6689_s27, %s5402_s3  ;;  %p5407_p9 = scmp.lt.u32.totalorder %s6689_s27, %s6751_s20 }
0x13b7   : > { %p5408_p10 = scmp.lt.u32.totalorder %s5406_s25, %s5402_s3  ;;  %p5410_p12 = scmp.lt.u32.totalorder %s5402_s3, %s6689_s27 }
0x13b8   : > { %p5404_p7 = pnand %p5403_p4, %p5600_p5 }
0x13b9   : > { %p5409_p11 = por %p5408_p10, %p5407_p9 }
0x13ba   : > { %p5405_p8 = pneg %p5404_p7 }
0x13bb   : > { %p5411_p13 = por %p5410_p12, %p5409_p11 }
0x13bd   : > { %p5412_p0 = pnand %p5411_p13, %p5405_p8 }
0x13bf   : > { %5415 = shalt.err (!%p5412_p0)
}
0x13c0   : > { %5193 = dma.vmem_to_hbm [thread:$0]  (%p5600_p5), %s6691_s29, 16, %s6689_s27, %s4076_s28  }
0x13c1 PF: > { %s6787_s5 = sld [smem:[#allocation5_spill]]  ;;  %p5199_p1 = scmp.ge.s32.totalorder %s5450_s24, 2 }
0x13c3   : > { %p5196_p2 = pnand %p5199_p1, %p5604_p6 }
0x13c7   : > { %s4100_s2 = sand.u32 1, %s6787_s5  }
0x13c8   : > { %s4101_s6 = scalar_lea.sflag [#allocation3], %s4100_s2 }
0x13c9   : > { %5433 = dma.done.wait (!%p5196_p2), %s4101_s6, 16  }
0x13ca   : > { %5435 = vsyncadd (!%p5196_p2), %s4101_s6, 4294967280  ;;  %s6789_s24 = sld [smem:[#allocation7_spill]]  ;;  %s6790_s3 = sld [smem:[#allocation6_spill]] }
0x13cb   : > { %s6791_s23 = sld [smem:[#allocation8_spill]]  ;;  %s6792_s1 = smov %s5442_s22 }
0x13d0   : > { %p30_p3 = scmp.ge.s32.totalorder %s6789_s24, 4   ;;  %s6793_s22 = smov %s6790_s3 }
0x13d2   :  { %32 = sbr.rel (!%p30_p3) target bundleno = 11 (0xb), region = 149 }
0x13d9   :  { %4105 = vsyncpa [#allocation3], 1 }
0x13da   :  { %4107 = vsyncpa [#allocation3 + $0x1], 1 }

</bundles_post_ra>
